<compile_context>
chip_gen: v5e
topology: v5e:2x2
jax: 0.10.0
libtpu: 0.0.40
codegen_flags: <defaults>
</compile_context>

<pallas_src>
import functools
import math

import jax
import jax.numpy as jnp
from jax.experimental import pallas as pl
from jax.experimental.pallas import tpu as pltpu

_LANE = 128
_SUBLANE = 8
_MXU_ALIGN = 256                      # cap alignment; fine on v5e/v6e/v7x


def _round_up(n, m):
    return ((n + m - 1) // m) * m


def _cdiv(a, b):
    return -(-a // b)


@functools.lru_cache(maxsize=1)
def _vmem_budget_and_limit():
    """(working budget, vmem_limit_bytes) scaled to this chip's VMEM."""
    cap = None
    try:
        cap = int(pltpu.get_tpu_info().vmem_capacity_bytes)
    except Exception:
        cap = None
    if cap is None or cap <= 0:
        cap = 64 * 1024 * 1024                    # v7x per-TensorCore (smallest)
    limit = min(96 * 1024 * 1024, (cap * 3) // 4)  # 96 MiB on v5e/v6e, 48 on v7x
    budget = (limit * 2) // 3                      # 64 MiB on v5e/v6e, 32 on v7x
    return budget, limit


def sine_layer_kernel(x_ref, w_ref, b_ref, o_ref, *, omega_0, use_vpu):
    # x_ref: (TM, IN)  w_ref: (IN, TN)  b_ref: (1, TN) f32  o_ref: (TM, TN)
    if use_vpu:
        # True SIREN first layer (in_channels = 2 or 3): a K<8 MXU dot wastes
        # >98% of the MXU K dim, so use a VPU broadcast-FMA sum over K instead.
        x = x_ref[...].astype(jnp.float32)
        w = w_ref[...].astype(jnp.float32)
        in_ch = w_ref.shape[0]
        y = x[:, 0:1] * w[0:1, :]
        for k in range(1, in_ch):
            y = y + x[:, k:k + 1] * w[k:k + 1, :]
    else:
        y = jnp.dot(x_ref[...], w_ref[...], preferred_element_type=jnp.float32)
    y = (y + b_ref[...]) * omega_0            # bias add + omega scale in f32
    o_ref[...] = jnp.sin(y).astype(o_ref.dtype)


def sine_layer(x, w_t, b, *, omega_0=30.0, tile_m=None, tile_n=None,
               out_dtype=None):
    """SIREN sine layer: sin(omega_0 * (x @ w_t + b)).

    x   : (..., in_channels)            f32 or bf16, any leading batch dims
    w_t : (in_channels, out_channels)   nn.Linear weight, pre-transposed
    b   : (out_channels,)
    """
    if out_dtype is None:
        out_dtype = x.dtype

    *batch_dims, IN = x.shape
    x2 = x.reshape(-1, IN)
    N = x2.shape[0]
    assert w_t.shape[0] == IN, "w_t must be (in_channels, out_channels)"
    OUT = w_t.shape[1]

    budget, vmem_limit = _vmem_budget_and_limit()

    # ---- lane-dense output: pad OUT (weight cols + bias) to a multiple of 128.
    OUT_p = _round_up(OUT, _LANE)
    if OUT_p != OUT:
        w_t = jnp.pad(w_t, ((0, 0), (0, OUT_p - OUT)))
        b = jnp.pad(b, (0, OUT_p - OUT))
    b2d = b.reshape(1, OUT_p).astype(jnp.float32)

    x_item = x2.dtype.itemsize
    w_item = w_t.dtype.itemsize
    o_item = jnp.dtype(out_dtype).itemsize

    # sublane granule, accounting for sub-32-bit packing (bf16 -> 16 rows).
    pack = max(1, 4 // min(x_item, o_item))
    sub = _SUBLANE * pack

    # ---- tile the OUT axis only if the (double-buffered) weight panel is big.
    if tile_n is None:
        tile_n = OUT_p
        if 2 * IN * OUT_p * w_item > budget // 2:
            for cand in (2048, 1024, 512, 256, _LANE):
                if OUT_p % cand == 0 and 2 * IN * cand * w_item <= budget // 2:
                    tile_n = cand
                    break
            else:
                tile_n = _LANE
    else:
        assert tile_n % _LANE == 0 and OUT_p % tile_n == 0
    grid_n = OUT_p // tile_n

    # ---- row tile cap from the VMEM budget (with layout padding and the
    #      f32 matmul/epilogue intermediates included).
    if tile_m is None:
        in_lane = _round_up(IN, _LANE)     # x tile lane padding in VMEM
        in_sub = _round_up(IN, sub)        # W tile sublane padding in VMEM
        resident = (2 * in_sub * tile_n * w_item          # W   (double-buffered)
                    + 2 * _SUBLANE * tile_n * 4)          # bias (double-buffered)
        per_row = (2 * in_lane * x_item                   # x   (double-buffered)
                   + 2 * tile_n * o_item                  # out (double-buffered)
                   + 2 * tile_n * 4)                      # f32 dot + epilogue temps
        avail = max(budget - resident, per_row * sub)
        tile_m_cap = int(min(2048, avail // per_row))
        if tile_m_cap >= _MXU_ALIGN:
            tile_m_cap = (tile_m_cap // _MXU_ALIGN) * _MXU_ALIGN
        tile_m_cap = max(sub, (tile_m_cap // sub) * sub)
    else:
        tile_m_cap = max(sub, _round_up(tile_m, sub))

    grid_m = _cdiv(N, tile_m_cap)
    # Megacore: guarantee >= 2 blocks so v7x's 2nd TC gets work (neutral on 1-TC).
    if grid_m == 1 and grid_n == 1 and N >= 2 * sub:
        grid_m = 2
    # Balanced row tiles: avoid a nearly-all-padding tail block.
    tile_m = _round_up(_cdiv(N, grid_m), sub)
    grid_m = _cdiv(N, tile_m)
    N_pad = grid_m * tile_m
    if N_pad != N:
        x2 = jnp.pad(x2, ((0, N_pad - N), (0, 0)))

    # ---- grid-axis order: minimize HBM re-fetch of the streamed operand.
    #      rows-outer re-streams W (grid_m-1) extra times; cols-outer re-streams x.
    w_refetch = IN * OUT_p * w_item * (grid_m - 1)
    x_refetch = N_pad * IN * x_item * (grid_n - 1)
    cols_outer = (grid_n > 1) and (x_refetch < w_refetch)

    if cols_outer:
        grid = (grid_n, grid_m)
        x_spec = pl.BlockSpec((tile_m, IN), lambda j, i: (i, 0))
        w_spec = pl.BlockSpec((IN, tile_n), lambda j, i: (0, j))
        b_spec = pl.BlockSpec((1, tile_n), lambda j, i: (0, j))
        o_spec = pl.BlockSpec((tile_m, tile_n), lambda j, i: (i, j))
    else:
        grid = (grid_m, grid_n)
        x_spec = pl.BlockSpec((tile_m, IN), lambda i, j: (i, 0))
        w_spec = pl.BlockSpec((IN, tile_n), lambda i, j: (0, j))
        b_spec = pl.BlockSpec((1, tile_n), lambda i, j: (0, j))
        o_spec = pl.BlockSpec((tile_m, tile_n), lambda i, j: (i, j))

    kernel = functools.partial(sine_layer_kernel, omega_0=float(omega_0),
                               use_vpu=IN < _SUBLANE)

    out = pl.pallas_call(
        kernel,
        out_shape=jax.ShapeDtypeStruct((N_pad, OUT_p), out_dtype),
        grid_spec=pltpu.PrefetchScalarGridSpec(
            num_scalar_prefetch=0,
            grid=grid,
            in_specs=[x_spec, w_spec, b_spec],
            out_specs=o_spec,
        ),
        compiler_params=pltpu.CompilerParams(
            dimension_semantics=("parallel", "parallel"),
            vmem_limit_bytes=vmem_limit,
        ),
    )(x2, w_t, b2d)

    if N_pad != N or OUT_p != OUT:
        # TODO(synk): this slice is an extra HBM round-trip of the output; in a
        # fused multi-layer SIREN the padded layout should flow into the next
        # layer instead of being sliced per layer.
        out = out[:N, :OUT]
    return out.reshape(*batch_dims, OUT)


def init_sine_layer_params(key, in_channels, out_channels, *, is_first=False,
                           omega_0=30.0, dtype=jnp.float32):
    """Deterministic init matching SineLayer.init_weights (synthetic RNG)."""
    kw, kb = jax.random.split(key)
    if is_first:
        bound_w = 1.0 / in_channels
    else:
        bound_w = math.sqrt(6.0 / in_channels) / omega_0
    # torch weight is (out, in); store transposed (in, out) for the kernel.
    w_t = jax.random.uniform(kw, (in_channels, out_channels), jnp.float32,
                             minval=-bound_w, maxval=bound_w).astype(dtype)
    # nn.Linear default bias init: U(-1/sqrt(in), 1/sqrt(in)); keep in f32.
    bound_b = 1.0 / math.sqrt(in_channels)
    b = jax.random.uniform(kb, (out_channels,), jnp.float32,
                           minval=-bound_b, maxval=bound_b)
    return w_t, b


if __name__ == "__main__":
    key = jax.random.PRNGKey(0)
    k1, k2, k3, k4, k5, k6, k7, k8 = jax.random.split(key, 8)
    omega_0 = 30.0

    # --- Test 1: true SIREN first layer (IN=2, VPU path), ragged N (row pad),
    #             OUT<128 (lane pad), forced 2-block megacore split.
    N, IN, OUT = 300, 2, 64
    x = jax.random.uniform(k1, (N, IN), jnp.float32, minval=-1.0, maxval=1.0)
    w_t, b = init_sine_layer_params(k2, IN, OUT, is_first=True, omega_0=omega_0)
    out = jax.block_until_ready(sine_layer(x, w_t, b, omega_0=omega_0))
    ref = jnp.sin(omega_0 * (x @ w_t + b))
    assert out.shape == (N, OUT)
    assert jnp.allclose(out, ref, atol=2e-4, rtol=2e-4), "first-layer (VPU) mismatch"

    # --- Test 2: bf16 hidden layer with leading batch dims (halved HBM traffic).
    B, H, IN2, OUT2 = 2, 150, 64, 64
    x2 = jax.random.uniform(k3, (B, H, IN2), jnp.float32,
                            minval=-1.0, maxval=1.0).astype(jnp.bfloat16)
    w2, b2 = init_sine_layer_params(k4, IN2, OUT2, is_first=False,
                                    omega_0=omega_0, dtype=jnp.bfloat16)
    out2 = jax.block_until_ready(sine_layer(x2, w2, b2, omega_0=omega_0))
    ref2 = jnp.sin(omega_0 * (x2.astype(jnp.float32) @ w2.astype(jnp.float32) + b2))
    assert out2.shape == (B, H, OUT2) and out2.dtype == jnp.bfloat16
    assert jnp.allclose(out2.astype(jnp.float32), ref2, atol=2e-2, rtol=2e-2), \
        "bf16 hidden-layer mismatch"

    # --- Test 3: multi-step row grid (explicit tile_m) on an MXU-aligned shape.
    N3, IN3, OUT3 = 1024, 64, 256
    x3 = jax.random.uniform(k5, (N3, IN3), jnp.float32, minval=-1.0, maxval=1.0)
    w3, b3 = init_sine_layer_params(k6, IN3, OUT3, is_first=False, omega_0=omega_0)
    out3 = jax.block_until_ready(sine_layer(x3, w3, b3, omega_0=omega_0, tile_m=256))
    ref3 = jnp.sin(omega_0 * (x3 @ w3 + b3))
    assert out3.shape == (N3, OUT3)
    assert jnp.allclose(out3, ref3, atol=1e-4, rtol=1e-4), "tiled-grid mismatch"

    # --- Test 4: tiled OUT axis with the swapped (cols-outer) grid order.
    N4, IN4, OUT4 = 256, 32, 512
    x4 = jax.random.uniform(k7, (N4, IN4), jnp.float32, minval=-1.0, maxval=1.0)
    w4, b4 = init_sine_layer_params(k8, IN4, OUT4, is_first=False, omega_0=omega_0)
    out4 = jax.block_until_ready(
        sine_layer(x4, w4, b4, omega_0=omega_0, tile_m=64, tile_n=128))
    ref4 = jnp.sin(omega_0 * (x4 @ w4 + b4))
    assert out4.shape == (N4, OUT4)
    assert jnp.allclose(out4, ref4, atol=1e-4, rtol=1e-4), "cols-outer grid mismatch"

    print("KERNEL_OK")
</pallas_src>

<mosaic_0001>
module attributes {stable_mosaic.version = 11 : i64} {
  func.func @sine_layer_kernel(%arg0: i32, %arg1: i32, %arg2: memref<152x2xf32, #tpu.memory_space<vmem>>, %arg3: memref<2x128xf32, #tpu.memory_space<vmem>>, %arg4: memref<1x128xf32, #tpu.memory_space<vmem>>, %arg5: memref<152x128xf32, #tpu.memory_space<vmem>>) attributes {dimension_semantics = [#tpu.dimension_semantics<parallel>, #tpu.dimension_semantics<parallel>], iteration_bounds = array<i64: 2, 1>, scalar_prefetch = 0 : i64, scratch_operands = 0 : i64, tpu.core_type = #tpu.core_type<tc>, window_params = [{transform_indices = @transform_0, window_bounds = array<i64: 152, 2>}, {transform_indices = @transform_1, window_bounds = array<i64: 2, 128>}, {transform_indices = @transform_2, window_bounds = array<i64: 1, 128>}, {transform_indices = @transform_3, window_bounds = array<i64: 152, 128>}]} {
    %c0 = arith.constant 0 : index
    %c0_0 = arith.constant 0 : index
    %0 = vector.load %arg2[%c0, %c0_0] : memref<152x2xf32, #tpu.memory_space<vmem>>, vector<152x2xf32>
    %c0_1 = arith.constant 0 : index
    %c0_2 = arith.constant 0 : index
    %1 = vector.load %arg3[%c0_1, %c0_2] : memref<2x128xf32, #tpu.memory_space<vmem>>, vector<2x128xf32>
    %2 = vector.extract_strided_slice %0 {offsets = [0, 0], sizes = [152, 1], strides = [1, 1]} : vector<152x2xf32> to vector<152x1xf32>
    %3 = vector.extract_strided_slice %1 {offsets = [0, 0], sizes = [1, 128], strides = [1, 1]} : vector<2x128xf32> to vector<1x128xf32>
    %4 = vector.broadcast %2 : vector<152x1xf32> to vector<152x128xf32>
    %5 = vector.broadcast %3 : vector<1x128xf32> to vector<152x128xf32>
    %6 = arith.mulf %4, %5 : vector<152x128xf32>
    %7 = vector.extract_strided_slice %0 {offsets = [0, 1], sizes = [152, 1], strides = [1, 1]} : vector<152x2xf32> to vector<152x1xf32>
    %8 = vector.extract_strided_slice %1 {offsets = [1, 0], sizes = [1, 128], strides = [1, 1]} : vector<2x128xf32> to vector<1x128xf32>
    %9 = vector.broadcast %7 : vector<152x1xf32> to vector<152x128xf32>
    %10 = vector.broadcast %8 : vector<1x128xf32> to vector<152x128xf32>
    %11 = arith.mulf %9, %10 : vector<152x128xf32>
    %12 = arith.addf %6, %11 : vector<152x128xf32>
    %c0_3 = arith.constant 0 : index
    %c0_4 = arith.constant 0 : index
    %13 = vector.load %arg4[%c0_3, %c0_4] : memref<1x128xf32, #tpu.memory_space<vmem>>, vector<1x128xf32>
    %14 = vector.broadcast %13 : vector<1x128xf32> to vector<152x128xf32>
    %15 = arith.addf %12, %14 : vector<152x128xf32>
    %cst = arith.constant 3.000000e+01 : f32
    %16 = vector.broadcast %cst : f32 to vector<152x128xf32>
    %17 = arith.mulf %15, %16 : vector<152x128xf32>
    %18 = math.sin %17 : vector<152x128xf32>
    %c0_5 = arith.constant 0 : index
    %c0_6 = arith.constant 0 : index
    %19 = vector.load %arg5[%c0_5, %c0_6] : memref<152x128xf32, #tpu.memory_space<vmem>>, vector<152x128xf32>
    tpu.vector_store %arg5[%c0_5, %c0_6], %18 {strides = array<i32>} : memref<152x128xf32, #tpu.memory_space<vmem>>, vector<152x128xf32>,
    return
  }
  func.func @transform_0(%arg0: i32, %arg1: i32) -> (i32, i32) {
    %c0_i32 = arith.constant 0 : i32
    %c0_i32_0 = arith.constant 0 : i32
    return %arg0, %c0_i32 : i32, i32
  }
  func.func @transform_1(%arg0: i32, %arg1: i32) -> (i32, i32) {
    %c0_i32 = arith.constant 0 : i32
    %c0_i32_0 = arith.constant 0 : i32
    return %c0_i32, %arg1 : i32, i32
  }
  func.func @transform_2(%arg0: i32, %arg1: i32) -> (i32, i32) {
    %c0_i32 = arith.constant 0 : i32
    %c0_i32_0 = arith.constant 0 : i32
    return %c0_i32, %arg1 : i32, i32
  }
  func.func @transform_3(%arg0: i32, %arg1: i32) -> (i32, i32) {
    %c0_i32 = arith.constant 0 : i32
    return %arg0, %arg1 : i32, i32
  }
}

</mosaic_0001>

<bundles_post_ra>
// kernel: tpu_custom_call.1
= control target key start
LH: loop header
LB: loop body
LE: loop exit
PB: predicated region body
PF: predicated region fallthrough
CT: control target
= control target key end

     0   :  { %8 = vsyncpa [#allocation3], 0  ;;  %s6070_s0 = inlined_call_operand.vmem [shape: f32[304,2], index: 0, kind: input, shape index: {}]   ;;  %s6071_s1 = inlined_call_operand.vmem [shape: f32[2,128], index: 1, kind: input, shape index: {}]   ;;  %s6072_s2 = inlined_call_operand.vmem [shape: f32[1,128], index: 2, kind: input, shape index: {}]   ;;  %s6073_s3 = inlined_call_operand.hbm [shape: f32[304,128], index: 3, kind: output, shape index: {}]  }
   0x1   :  { %10 = vsyncpa [#allocation3 + $0x1], 0  ;;  %s3845_s12 = smov 0   ;;  %s3847_s13 = smov 0  }
   0x2   :  { %s3849_s14 = smov 0   ;;  %s3851_s15 = smov 0  }
   0x3   :  { %s3853_s16 = smov 0   ;;  %s3855_s17 = smov 0  }
   0x4 LB: > { %s3589_s18 = sadd.s32 4294967295, %s3813_s17   ;;  %s3590_s19 = sadd.s32 4294967294, %s3813_s17   ;;  %s3813_s17 = sphi %s3855_s17, %s16_s17   ;;  %s3809_s16 = sphi %s3853_s16, %s6109_s16   ;;  %s3805_s15 = sphi %s3851_s15, %s6108_s15   ;;  %s3801_s14 = sphi %s3849_s14, %s6107_s14   ;;  %s3797_s13 = sphi %s3847_s13, %s6106_s13   ;;  %s3793_s12 = sphi %s3845_s12, %s6105_s12  }
   0x5   : > { %s28_s20 = sadd.s32 1, %s3809_s16  ;;  %s115_s21 = sadd.s32 1, %s3801_s14 }
   0x6   : > { %p30_p0 = scmp.ge.s32.totalorder %s28_s20, 2  ;;  %p125_p1 = scmp.ne.s32.totalorder %s3801_s14, %s3797_s13 }
   0x7   : > { %p126_p2 = scmp.eq.s32.totalorder %s3589_s18, 1  ;;  %p131_p3 = scmp.ne.s32.totalorder %s3797_s13, %s3793_s12 }
   0x8   : > { %s6111_s20 = smov (%p30_p0, %s28_s20), 0  ;;  %p132_p5 = scmp.eq.s32.totalorder %s3590_s19, 1 }
   0x9   : > { %p3885_p4 = por %p126_p2, %p125_p1  ;;  %s110_s23 = ssub.s32 %s3809_s16, %s6111_s20 }
   0xa   : > { %p3595_p6 = scmp.ge.s32.totalorder %s3813_s17, 1  ;;  %p113_p7 = scmp.eq.s32.totalorder %s110_s23, 0 }
   0xb   : > { %p3892_p8 = por %p132_p5, %p131_p3  ;;  %p172_p9 = scmp.lt.s32.totalorder %s3813_s17, 3 }
   0xc   : > { %s3898_s25 = scalar_select %p113_p7, %s3801_s14, %s115_s21  }
   0xd   : > { %p173_p10 = pnand %p3595_p6, %p172_p9 }
   0xe   : > { %s203_s26 = smul.u32 (!%p173_p10), 19, %s3805_s15  ;;  %s200_s8 = sand.u32 (!%p173_p10), 1, %s3797_s13  }
   0xf   : > { %176 = sbr.rel (%p173_p10) target bundleno = 954 (0x3ba), region = 32  ;;  %s3755_s21 = scalar_lea.hbm (!%p173_p10), %s6073_s3, 304 }
  0x10   : > { %p204_p11 = scmp.lt.s32.totalorder (!%p173_p10), %s203_s26, 37  ;;  %s3658_s9 = smul.u32 (!%p173_p10), 152, %s200_s8 }
  0x11   : > { %s3657_s29 = smul.u32 (!%p173_p10), 152, %s3805_s15  ;;  %s3474_s15 = scalar_lea.sflag (!%p173_p10), [#allocation3], %s200_s8 }
  0x12   : > { %s4236_s10 = scalar_lea.vmem (!%p173_p10), [#allocation2], %s3658_s9 }
  0x13   : > { %s3486_s5 = scalar_lea.hbm (!%p173_p10), %s6073_s3, %s3657_s29  ;;  %s3487_s6 = sshll.u32 (!%p173_p10), %s4236_s10, 4  ;;  %s3488_s6 = int_to_ptr.vmem [resolvable:$true] %s3487_s6 }
  0x14   : > { %v3815_v0 = vmov 0   ;;  %s6113_s26 = smov (!%p204_p11, %s203_s26), 37  ;;  %v3816_v20 = vmov 1   ;;  %v236_v28 = vld [vmem:[%s6071_s1] sm:$0x3]  ;;  %s3489_s7 = sshll.u32 %s3486_s5, 4  ;;  %s3490_s7 = int_to_ptr.hbm [resolvable:$true] %s3489_s7 }
  0x15   : > { %3726 = vset.pattern.permute.xlu2 %v3815_v0  ;;  %3725 = vset.pattern.permute.xlu1 %v3815_v0  ;;  %s3596_s27 = sshll.u32 %s6113_s26, 3  ;;  %v3943_v29 = vperm.slane %v236_v28, 1  ;;  %v3945_v31 = vperm.slane %v236_v28, 0  ;;  %v3951_v34 = vld [vmem:[%s6072_s2] ss:$0 sm:$0xff]  ;;  %s3749_s9 = sshra.s32 %s3490_s7, 4  ;;  %s3750_s9 = int_to_ptr.hbm [resolvable:$true] %s3749_s9 }
  0x16   : > { %3724 = vset.pattern.permute.xlu0 %v3815_v0  ;;  %s3907_s30 = scalar_lea.vmem %s6070_s0, %s3596_s27  ;;  %v3817_v62 = vmov 683565275   ;;  %s3751_s11 = scalar_lea.hbm %s3750_s9, 152 }
  0x17   : > { %v221_v1 = vld [vmem:[%s3907_s30 + $0x20] sm:$0xff]  ;;  %v219_v2 = vld [vmem:[%s3907_s30 + $0x10] sm:$0xff]  ;;  %v222_v4 = vld [vmem:[%s3907_s30 + $0x28] sm:$0xff]  ;;  %p3752_p12 = scmp.ne.s32.totalorder %s3750_s9, %s3751_s11  ;;  %p3756_p1 = scmp.lt.s32.totalorder %s3750_s9, %s6073_s3 }
  0x18   : > { %v217_v3 = vld [vmem:[%s3907_s30] sm:$0xff]  ;;  %259 = vperm.xlu2 %3726, %v221_v1   ;;  %249 = vperm.xlu1 %3725, %v219_v2   ;;  %v220_v5 = vld [vmem:[%s3907_s30 + $0x18] sm:$0xff]  ;;  %v218_v6 = vld [vmem:[%s3907_s30 + $0x8] sm:$0xff]  ;;  %p3757_p2 = scmp.lt.s32.totalorder %s3755_s21, %s3751_s11 }
  0x19   : > { %239 = vperm.xlu0 %3724, %v217_v3   ;;  %v225_v7 = vld [vmem:[%s3907_s30 + $0x40] sm:$0xff]  ;;  %v224_v8 = vld [vmem:[%s3907_s30 + $0x38] sm:$0xff]  ;;  %v223_v9 = vld [vmem:[%s3907_s30 + $0x30] sm:$0xff]  ;;  %p3753_p13 = pnand %p3752_p12, %p3885_p4 }
  0x1a   : > { %v228_v10 = vld [vmem:[%s3907_s30 + $0x58] sm:$0xff]  ;;  %v227_v11 = vld [vmem:[%s3907_s30 + $0x50] sm:$0xff]  ;;  %v226_v12 = vld [vmem:[%s3907_s30 + $0x48] sm:$0xff]  ;;  %p3758_p3 = por %p3757_p2, %p3756_p1 }
  0x1b   : > { %v231_v13 = vld [vmem:[%s3907_s30 + $0x70] sm:$0xff]  ;;  %v230_v14 = vld [vmem:[%s3907_s30 + $0x68] sm:$0xff]  ;;  %v229_v15 = vld [vmem:[%s3907_s30 + $0x60] sm:$0xff]  ;;  %p3754_p0 = pneg %p3753_p13 }
  0x1c   : > { %v234_v16 = vld [vmem:[%s3907_s30 + $0x88] sm:$0xff]  ;;  %v233_v17 = vld [vmem:[%s3907_s30 + $0x80] sm:$0xff]  ;;  %v232_v18 = vld [vmem:[%s3907_s30 + $0x78] sm:$0xff] }
  0x1d   : > { %v235_v19 = vld [vmem:[%s3907_s30 + $0x90] sm:$0xff]  ;;  %p3759_p5 = pnand %p3758_p3, %p3754_p0 }
  0x20   : > { %264 = vperm.xlu2 %3726, %v222_v4   ;;  %254 = vperm.xlu1 %3725, %v220_v5  }
  0x21   : > { %244 = vperm.xlu0 %3724, %v218_v6  }
  0x28   : > { %279 = vperm.xlu2 %3726, %v225_v7   ;;  %274 = vperm.xlu1 %3725, %v224_v8  }
  0x29   : > { %269 = vperm.xlu0 %3724, %v223_v9  }
  0x30   : > { %294 = vperm.xlu2 %3726, %v228_v10   ;;  %289 = vperm.xlu1 %3725, %v227_v11  }
  0x31   : > { %284 = vperm.xlu0 %3724, %v226_v12  }
  0x38   : > { %309 = vperm.xlu2 %3726, %v231_v13   ;;  %304 = vperm.xlu1 %3725, %v230_v14  }
  0x39   : > { %299 = vperm.xlu0 %3724, %v229_v15  }
  0x40   : > { %324 = vperm.xlu2 %3726, %v234_v16   ;;  %319 = vperm.xlu1 %3725, %v233_v17  }
  0x41   : > { %314 = vperm.xlu0 %3724, %v232_v18  }
  0x48   : > { %3728 = vset.pattern.permute.xlu2 %v3816_v20  ;;  %3727 = vset.pattern.permute.xlu1 %v3816_v20 }
  0x49   : > { %329 = vperm.xlu0 %3724, %v235_v19   ;;  %357 = vperm.xlu2 %3728, %v218_v6  }
  0x4a   : > { %353 = vperm.xlu1 %3727, %v217_v3   ;;  %v3819_v3 = vmov 2131351028  }
  0x51   : > { %3729 = vset.pattern.permute.xlu0 %v3816_v20  ;;  %369 = vperm.xlu2 %3728, %v221_v1   ;;  %v3818_v1 = vmov 2475754826  }
  0x52   : > { %365 = vperm.xlu1 %3727, %v220_v5   ;;  %361 = vperm.xlu0 %3729, %v219_v2   ;;  %v3820_v5 = vmov 2102212464  }
  0x59   : > { %377 = vperm.xlu2 %3728, %v223_v9  }
  0x5a   : > { %373 = vperm.xlu1 %3727, %v222_v4   ;;  %381 = vperm.xlu0 %3729, %v224_v8  }
  0x61   : > { %389 = vperm.xlu2 %3728, %v226_v12  }
  0x62   : > { %385 = vperm.xlu1 %3727, %v225_v7   ;;  %393 = vperm.xlu0 %3729, %v227_v11  }
  0x69   : > { %401 = vperm.xlu2 %3728, %v229_v15  }
  0x6a   : > { %397 = vperm.xlu1 %3727, %v228_v10   ;;  %405 = vperm.xlu0 %3729, %v230_v14   ;;  %v3821_v10 = vmov 920167782  }
  0x71   : > { %413 = vperm.xlu2 %3728, %v232_v18  }
  0x72   : > { %409 = vperm.xlu1 %3727, %v231_v13   ;;  %417 = vperm.xlu0 %3729, %v233_v17   ;;  %v260_v21 = vpop.permute.xlu2 %259  ;;  %v6075_v13 = vmov 1326507024  }
  0x73   : > { %v337_v42 = vmul.f32 %v3945_v31, %v260_v21 }
  0x79   : > { %425 = vperm.xlu2 %3728, %v235_v19  }
  0x7a   : > { %421 = vperm.xlu1 %3727, %v234_v16   ;;  %v3928_v22 = vpop.permute.xlu2 %264 }
  0x82   : > { %v3930_v23 = vpop.permute.xlu2 %279 }
  0x8a   : > { %v3932_v24 = vpop.permute.xlu2 %294 }
  0x8b   : > { %v3936_v26 = vpop.permute.xlu0 %239 }
  0x92   : > { %v3934_v25 = vpop.permute.xlu2 %309 }
  0x93   : > { %v245_v30 = vpop.permute.xlu0 %244 }
  0x94   : > { %v334_v33 = vmul.f32 %v3945_v31, %v245_v30 }
  0x9a   : > { %v3938_v27 = vpop.permute.xlu2 %324 }
  0xa3   : > { %v358_v32 = vpop.permute.xlu2 %357 }
  0xa4   : > { %v430_v35 = vmul.f32 %v3943_v29, %v358_v32 }
  0xa6   : > { %v449_v36 = vadd.f32 %v430_v35, %v334_v33 }
  0xa8   : > { %v472_v37 = vadd.f32 %v3951_v34, %v449_v36 }
  0xaa   : > { %v3955_v38 = vmul.f32 30.0, %v472_v37 }
  0xab   : > { %v370_v39 = vpop.permute.xlu2 %369 }
  0xac   : > { %v664_v40 = vand.u32 2147483647, %v3955_v38  ;;  %v667_v41 = vand.u32 2139095040, %v3955_v38  ;;  %v433_v43 = vmul.f32 %v3943_v29, %v370_v39  ;;  %v270_v39 = vpop.permute.xlu0 %269 }
  0xae   : > { %v668_v44 = vshrl.u32 %v667_v41, 23  ;;  %v671_v45 = vand.u32 8388607, %v664_v40  ;;  %v452_v46 = vadd.f32 %v433_v43, %v337_v42 }
  0xb0   : > { %v3600_v47 = vadd.s32 4294967169, %v668_v44  ;;  %v672_v48 = vor.u32 8388608, %v671_v45  ;;  %v475_v49 = vadd.f32 %v3951_v34, %v452_v46 }
  0xb2   : > { %v674_v50 = vadd.s32 1, %v3600_v47  ;;  %v3964_v51 = vmul.f32 30.0, %v475_v49  ;;  %v3966_v52 = vshll.u32 %v672_v48, 8 }
  0xb3   : > { %v378_v45 = vpop.permute.xlu2 %377 }
  0xb4   : > { %vm675_vm0 = vcmp.gt.s32.totalorder %v674_v50, 0  ;;  %v1129_v54 = vand.u32 2147483647, %v3964_v51  ;;  %v1132_v55 = vand.u32 2139095040, %v3964_v51  ;;  %v3971_v59 = vand.u32 65535, %v3966_v52 }
  0xb5   : > { %v676_v53 = vsel %vm675_vm0, %v674_v50, 0  ;;  %v714_v48 = vshrl.u32 %v3966_v52, 16 }
  0xb6   : > { %v678_v56 = vand.u32 31, %v676_v53  ;;  %v677_v57 = vshrl.u32 %v676_v53, 5  ;;  %v1133_v60 = vshrl.u32 %v1132_v55, 23  ;;  %v1136_v61 = vand.u32 8388607, %v1129_v54 }
  0xb8   : > { %v679_v58 = vsub.s32 32, %v678_v56  ;;  %v681_v63 = vshll.u32 %v3817_v62, %v678_v56  ;;  %v684_v2 = vshll.u32 %v3818_v1, %v678_v56  ;;  %v687_v4 = vshll.u32 %v3819_v3, %v678_v56 }
  0xb9   : > { %v690_v6 = vshll.u32 %v3820_v5, %v678_v56  ;;  %v693_v11 = vshll.u32 %v3821_v10, %v678_v56  ;;  %vm696_vm1 = vcmp.lt.s32.totalorder %v677_v57, 1  ;;  %vm697_vm2 = vcmp.lt.s32.totalorder %v677_v57, 2 }
  0xba   : > { %v682_v7 = vshrl.u32 %v3818_v1, %v679_v58  ;;  %v685_v8 = vshrl.u32 %v3819_v3, %v679_v58  ;;  %v688_v9 = vshrl.u32 %v3820_v5, %v679_v58  ;;  %v691_v12 = vshrl.u32 %v3821_v10, %v679_v58 }
  0xbb   : > { %v694_v14 = vshrl.u32 %v6075_v13, %v679_v58  ;;  %v3609_v18 = vadd.s32 4294967169, %v1133_v60  ;;  %v680_v19 = vshrl.u32 %v3817_v62, %v679_v58  ;;  %vm699_vm3 = vcmp.lt.s32.totalorder %v677_v57, 4 }
  0xbc   : > { %v683_v15 = vor.u32 %v682_v7, %v681_v63  ;;  %v686_v16 = vor.u32 %v685_v8, %v684_v2  ;;  %v689_v17 = vor.u32 %v688_v9, %v687_v4  ;;  %v692_v20 = vor.u32 %v691_v12, %v690_v6 }
  0xbd   : > { %v695_v21 = vor.u32 %v694_v14, %v693_v11  ;;  %vm698_vm4 = vcmp.lt.s32.totalorder %v677_v57, 3  ;;  %v1137_v36 = vor.u32 8388608, %v1136_v61  ;;  %v1139_v37 = vadd.s32 1, %v3609_v18 }
  0xbe   : > { %v701_v28 = vsel %vm699_vm3, %v689_v17, 2102212464  ;;  %v704_v30 = vsel %vm696_vm1, %v683_v15, %v686_v16  ;;  %v708_v32 = vsel %vm696_vm1, %v686_v16, %v689_v17  ;;  %v705_v33 = vsel %vm699_vm3, %v692_v20, 920167782 }
  0xbf   : > { %v709_v35 = vsel %vm699_vm3, %v695_v21, 1326507024  ;;  %v700_v41 = vsel %vm696_vm1, %v680_v19, %v683_v15  ;;  %v702_v42 = vsel %vm698_vm4, %v686_v16, %v701_v28  ;;  %v706_v43 = vsel %vm698_vm4, %v689_v17, %v705_v33 }
  0xc0   : > { %v710_v44 = vsel %vm698_vm4, %v692_v20, %v709_v35  ;;  %v707_v46 = vsel %vm697_vm2, %v704_v30, %v706_v43  ;;  %vm1140_vm5 = vcmp.gt.s32.totalorder %v1139_v37, 0  ;;  %v339_v56 = vmul.f32 %v3945_v31, %v270_v39 }
  0xc1   : > { %v711_v47 = vsel %vm697_vm2, %v708_v32, %v710_v44  ;;  %v737_v53 = vand.u32 65535, %v707_v46  ;;  %v738_v55 = vshrl.u32 %v707_v46, 16  ;;  %v3994_v58 = vsel %vm697_vm2, %v700_v41, %v702_v42 }
  0xc2   : > { %v715_v49 = vand.u32 65535, %v711_v47  ;;  %v716_v50 = vshrl.u32 %v711_v47, 16  ;;  %v435_v60 = vmul.f32 %v3943_v29, %v378_v45  ;;  %v1141_v2 = vsel %vm1140_vm5, %v1139_v37, 0 }
  0xc3   : > { %v3998_v4 = vshll.u32 %v1137_v36, 8  ;;  %v740_v8 = vmul.u32 %v738_v55, %v3971_v59  ;;  %v741_v9 = vmul.u32 %v737_v53, %v714_v48  ;;  %v739_v57 = vmul.u32 %v737_v53, %v3971_v59 }
  0xc4   : > { %v718_v61 = vmul.u32 %v716_v50, %v3971_v59  ;;  %v719_v63 = vmul.u32 %v715_v49, %v714_v48  ;;  %v717_v6 = vmul.u32 %v715_v49, %v3971_v59  ;;  %v720_v7 = vmul.u32 %v716_v50, %v714_v48 }
  0xc5   : > { %v742_v14 = vmul.u32 %v738_v55, %v714_v48  ;;  %v743_v17 = vshll.u32 %v740_v8, 16  ;;  %v744_v18 = vshrl.u32 %v740_v8, 16  ;;  %v745_v20 = vshll.u32 %v741_v9, 16 }
  0xc6   : > { %v721_v11 = vshll.u32 %v718_v61, 16  ;;  %v722_v12 = vshrl.u32 %v718_v61, 16  ;;  %v723_v15 = vshll.u32 %v719_v63, 16  ;;  %v724_v16 = vshrl.u32 %v719_v63, 16 }
  0xc7   : > { %v1143_v21 = vand.u32 31, %v1141_v2  ;;  %v746_v30 = vshrl.u32 %v741_v9, 16  ;;  %vm747_vm7 = vc.u32 %v739_v57, %v743_v17  ;;  %v749_v32 = vadd.s32 %v743_v17, %v739_v57 }
  0xc8   : > { %vm725_vm6 = vc.u32 %v717_v6, %v721_v11  ;;  %v727_v19 = vadd.s32 %v721_v11, %v717_v6  ;;  %v748_v35 = vsel %vm747_vm7, 1, %v3815_v0  ;;  %v4008_v39 = vshrl.u32 %v1141_v2, 5 }
  0xc9   : > { %v726_v28 = vsel %vm725_vm6, 1, %v3815_v0  ;;  %v4005_v36 = vsub.s32 32, %v1143_v21  ;;  %v750_v37 = vadd.s32 %v748_v35, %v742_v14  ;;  %vm751_vm9 = vc.u32 %v749_v32, %v745_v20 }
  0xca   : > { %v728_v33 = vadd.s32 %v726_v28, %v720_v7  ;;  %vm729_vm8 = vc.u32 %v727_v19, %v723_v15  ;;  %v752_v42 = vsel %vm751_vm9, 1, %v3815_v0  ;;  %v4011_v43 = vadd.s32 %v749_v32, %v745_v20 }
  0xcb   : > { %v730_v59 = vsel %vm729_vm8, 1, %v3815_v0  ;;  %v1146_v44 = vshll.u32 %v3817_v62, %v1143_v21  ;;  %v754_v45 = vadd.s32 %v752_v42, %v750_v37  ;;  %v1147_v46 = vshrl.u32 %v3818_v1, %v4005_v36 }
  0xcc   : > { %v732_v41 = vadd.s32 %v730_v59, %v728_v33  ;;  %v1149_v47 = vshll.u32 %v3818_v1, %v1143_v21  ;;  %v1150_v48 = vshrl.u32 %v3819_v3, %v4005_v36  ;;  %v1152_v50 = vshll.u32 %v3819_v3, %v1143_v21 }
  0xcd   : > { %v1153_v53 = vshrl.u32 %v3820_v5, %v4005_v36  ;;  %v1155_v55 = vshll.u32 %v3820_v5, %v1143_v21  ;;  %v755_v61 = vadd.s32 %v754_v45, %v744_v18  ;;  %v4023_v63 = vor.u32 %v1147_v46, %v1146_v44 }
  0xce   : > { %v733_v49 = vadd.s32 %v732_v41, %v722_v12  ;;  %v4025_v2 = vor.u32 %v1150_v48, %v1149_v47  ;;  %v1156_v6 = vshrl.u32 %v3821_v10, %v4005_v36  ;;  %v1158_v9 = vshll.u32 %v3821_v10, %v1143_v21 }
  0xcf   : > { %v1154_v8 = vor.u32 %v1153_v53, %v1152_v50  ;;  %v1159_v11 = vshrl.u32 %v6075_v13, %v4005_v36  ;;  %v756_v12 = vadd.s32 %v755_v61, %v746_v30  ;;  %v454_v14 = vadd.f32 %v435_v60, %v339_v56 }
  0xd0   : > { %v4029_v7 = vadd.s32 %v733_v49, %v724_v16  ;;  %v1157_v57 = vor.u32 %v1156_v6, %v1155_v55  ;;  %v757_v15 = vmul.u32 %v3966_v52, %v3994_v58  ;;  %vm1161_vm11 = vcmp.lt.s32.totalorder %v4008_v39, 1 }
  0xd1   : > { %v1160_v17 = vor.u32 %v1159_v11, %v1158_v9  ;;  %v760_v16 = vadd.s32 1, %v756_v12  ;;  %vm1164_vm12 = vcmp.lt.s32.totalorder %v4008_v39, 4  ;;  %v1169_v18 = vsel %vm1161_vm11, %v4023_v63, %v4025_v2 }
  0xd2   : > { %vm759_vm10 = vc.u32 %v4029_v7, %v4011_v43  ;;  %v1178_v19 = vand.u32 65535, %v3998_v4  ;;  %vm1163_vm13 = vcmp.lt.s32.totalorder %v4008_v39, 3  ;;  %v1170_v52 = vsel %vm1164_vm12, %v1157_v57, 920167782 }
  0xd3   : > { %v1173_v56 = vsel %vm1161_vm11, %v4025_v2, %v1154_v8  ;;  %v1174_v58 = vsel %vm1164_vm12, %v1160_v17, 1326507024  ;;  %v761_v60 = vsel %vm759_vm10, %v760_v16, %v756_v12  ;;  %vm1162_vm14 = vcmp.lt.s32.totalorder %v4008_v39, 2 }
  0xd4   : > { %v1171_v20 = vsel %vm1163_vm13, %v1154_v8, %v1170_v52  ;;  %v1175_v21 = vsel %vm1163_vm13, %v1157_v57, %v1174_v58  ;;  %v762_v28 = vadd.s32 %v761_v60, %v757_v15  ;;  %v1179_v33 = vshrl.u32 %v3998_v4, 16 }
  0xd5   : > { %v1172_v30 = vsel %vm1162_vm14, %v1169_v18, %v1171_v20  ;;  %v1176_v32 = vsel %vm1162_vm14, %v1173_v56, %v1175_v21  ;;  %v477_v41 = vadd.f32 %v3951_v34, %v454_v14  ;;  %v1145_v14 = vshrl.u32 %v3817_v62, %v4005_v36  ;;  %v4073_v36 = vpop.permute.xlu1 %249 }
  0xd6   : > { %v1180_v35 = vand.u32 65535, %v1176_v32  ;;  %v1181_v59 = vshrl.u32 %v1176_v32, 16  ;;  %v1203_v37 = vshrl.u32 %v1172_v30, 16  ;;  %v763_v42 = vadd.s32 536870912, %v762_v28 }
  0xd7   : > { %v1202_v44 = vand.u32 65535, %v1172_v30  ;;  %v4064_v53 = vmul.f32 30.0, %v477_v41  ;;  %v1166_v17 = vsel %vm1164_vm12, %v1154_v8, 2102212464  ;;  %vm666_vm3 = vcmp.lt.s32.totalorder %v3955_v38, 0 }
  0xd8   : > { %v1183_v45 = vmul.u32 %v1181_v59, %v1178_v19  ;;  %v1184_v46 = vmul.u32 %v1180_v35, %v1179_v33  ;;  %v764_v47 = vshrl.u32 %v763_v42, 30  ;;  %v1205_v48 = vmul.u32 %v1203_v37, %v1178_v19 }
  0xd9   : > { %v1182_v49 = vmul.u32 %v1180_v35, %v1178_v19  ;;  %v1185_v61 = vmul.u32 %v1181_v59, %v1179_v33  ;;  %v1204_v6 = vmul.u32 %v1202_v44, %v1178_v19  ;;  %v1206_v57 = vmul.u32 %v1202_v44, %v1179_v33 }
  0xda   : > { %v1186_v50 = vshll.u32 %v1183_v45, 16  ;;  %v765_v55 = vshll.u32 %v764_v47, 30  ;;  %v1208_v9 = vshll.u32 %v1205_v48, 16  ;;  %v1188_v11 = vshll.u32 %v1184_v46, 16 }
  0xdb   : > { %v1187_v18 = vshrl.u32 %v1183_v45, 16  ;;  %v1207_v58 = vmul.u32 %v1203_v37, %v1179_v33  ;;  %v1210_v20 = vshll.u32 %v1206_v57, 16  ;;  %v788_v8 = vsub.s32 4, %v764_v47 }
  0xdc   : > { %vm1190_vm15 = vc.u32 %v1182_v49, %v1186_v50  ;;  %v1192_v12 = vadd.s32 %v1186_v50, %v1182_v49  ;;  %v766_v15 = vsub.s32 %v762_v28, %v765_v55  ;;  %vm1212_vm1 = vc.u32 %v1204_v6, %v1208_v9 }
  0xdd   : > { %v1191_v16 = vsel %vm1190_vm15, 1, %v3815_v0  ;;  %v1213_v21 = vsel %vm1212_vm1, 1, %v3815_v0  ;;  %v1214_v28 = vadd.s32 %v1208_v9, %v1204_v6  ;;  %v1442_v35 = vand.u32 2139095040, %v4064_v53 }
  0xde   : > { %v1193_v52 = vadd.s32 %v1191_v16, %v1185_v61  ;;  %vm1194_vm0 = vc.u32 %v1192_v12, %v1188_v11  ;;  %vm767_vm2 = vcmp.lt.s32.totalorder %v766_v15, 0  ;;  %v768_v19 = vsub.s32 0, %v766_v15 }
  0xdf   : > { %v1195_v56 = vsel %vm1194_vm0, 1, %v3815_v0  ;;  %v1215_v32 = vadd.s32 %v1213_v21, %v1207_v58  ;;  %vm1216_vm4 = vc.u32 %v1214_v28, %v1210_v20  ;;  %v1165_v33 = vsel %vm1161_vm11, %v1145_v14, %v4023_v63 }
  0xe0   : > { %v1197_v60 = vadd.s32 %v1195_v56, %v1193_v52  ;;  %v769_v30 = vsel %vm767_vm2, %v768_v19, %v766_v15  ;;  %v1167_v37 = vsel %vm1163_vm13, %v4025_v2, %v1166_v17  ;;  %v1189_v42 = vshrl.u32 %v1184_v46, 16  ;;  %v4105_v19 = vpop.permute.xlu1 %254 }
  0xe1   : > { %v770_v59 = vclz %v769_v30  ;;  %v1217_v44 = vsel %vm1216_vm4, 1, %v3815_v0  ;;  %v1209_v49 = vshrl.u32 %v1205_v48, 16  ;;  %v1443_v55 = vshrl.u32 %v1442_v35, 23 }
  0xe2   : > { %v1198_v41 = vadd.s32 %v1197_v60, %v1187_v18  ;;  %v1219_v50 = vadd.s32 %v1217_v44, %v1215_v32  ;;  %vm4086_vm5 = vcmp.le.f32.partialorder %v664_v40, 0.7853982  ;;  %v789_v63 = vsel %vm666_vm3, %v788_v8, %v764_v47  ;;  %v390_v60 = vpop.permute.xlu2 %389  ;;  %v285_v8 = vpop.permute.xlu0 %284 }
  0xe3   : > { %v3601_v45 = vadd.s32 4294967294, %v770_v59  ;;  %v758_v2 = vadd.s32 %v4011_v43, %v4029_v7  ;;  %v1211_v46 = vshrl.u32 %v1206_v57, 16  ;;  %v1168_v11 = vsel %vm1162_vm14, %v1165_v33, %v1167_v37 }
  0xe4   : > { %v4092_v6 = vadd.s32 %v1198_v41, %v1189_v42  ;;  %v1220_v9 = vadd.s32 %v1219_v50, %v1209_v49  ;;  %v4098_v12 = vadd.s32 %v1214_v28, %v1210_v20  ;;  %v3615_v40 = vadd.s32 4294967169, %v1443_v55 }
  0xe5   : > { %vm3602_vm6 = vcmp.lt.s32.totalorder %v3601_v45, 0  ;;  %v791_v47 = vsel %vm4086_vm5, 0, %v789_v63  ;;  %v6074_v43 = vand.u32 2147483647, %v4064_v53  ;;  %v1222_v58 = vmul.u32 %v3998_v4, %v1168_v11 }
  0xe6   : > { %v773_v48 = vsel %vm3602_vm6, 0, %v3601_v45  ;;  %v1221_v16 = vadd.s32 %v1220_v9, %v1211_v46  ;;  %vm1224_vm7 = vc.u32 %v4092_v6, %v4098_v12  ;;  %v1449_v7 = vadd.s32 1, %v3615_v40 }
  0xe7   : > { %v774_v14 = vsub.s32 32, %v773_v48  ;;  %v778_v17 = vsub.s32 4294967266, %v773_v48  ;;  %v775_v57 = vshll.u32 %v766_v15, %v773_v48  ;;  %v808_v56 = vadd.s32 3, %v791_v47 }
  0xe8   : > { %v1225_v39 = vadd.s32 1, %v1221_v16  ;;  %vm1450_vm8 = vcmp.gt.s32.totalorder %v1449_v7, 0  ;;  %v1446_v35 = vand.u32 8388607, %v6074_v43  ;;  %v438_v41 = vmul.f32 %v3943_v29, %v390_v60 }
  0xe9   : > { %v776_v18 = vshrl.u32 %v758_v2, %v774_v14  ;;  %v779_v52 = vadd.s32 127, %v778_v17  ;;  %v1451_v30 = vsel %vm1450_vm8, %v1449_v7, 0  ;;  %v342_v4 = vmul.f32 %v3945_v31, %v285_v8 }
  0xea   : > { %v1226_v28 = vsel %vm1224_vm7, %v1225_v39, %v1221_v16  ;;  %v1453_v15 = vand.u32 31, %v1451_v30  ;;  %v4114_v45 = vand.u32 3, %v808_v56  ;;  %v1447_v50 = vor.u32 8388608, %v1446_v35 }
  0xeb   : > { %v777_v20 = vor.u32 %v776_v18, %v775_v57  ;;  %v780_v21 = vshll.u32 %v779_v52, 23  ;;  %v1227_v32 = vadd.s32 %v1226_v28, %v1222_v58  ;;  %v457_v48 = vadd.f32 %v438_v41, %v342_v4  ;;  %v4135_v18 = vpop.permute.xlu1 %274 }
  0xec   : > { %v4111_v37 = vsub.s32 32, %v1453_v15  ;;  %v1456_v46 = vshll.u32 %v3817_v62, %v1453_v15  ;;  %v1459_v40 = vshll.u32 %v3818_v1, %v1453_v15  ;;  %v1465_v17 = vshll.u32 %v3820_v5, %v1453_v15 }
  0xed   : > { %v781_v59 = vor.u32 4788187, %v780_v21  ;;  %v1228_v33 = vadd.s32 536870912, %v1227_v32  ;;  %v784_v44 = vcvt.s32.f32 %v777_v20  ;;  %v4130_v16 = vshrl.u32 %v1451_v30, 5 }
  0xee   : > { %v1457_v55 = vshrl.u32 %v3818_v1, %v4111_v37  ;;  %v1460_v63 = vshrl.u32 %v3819_v3, %v4111_v37  ;;  %v1466_v9 = vshrl.u32 %v3821_v10, %v4111_v37  ;;  %v1463_v14 = vshrl.u32 %v3820_v5, %v4111_v37 }
  0xef   : > { %v782_v42 = vand.u32 2147483647, %v781_v59  ;;  %v4116_v49 = vshrl.u32 %v1228_v33, 30  ;;  %v1462_v7 = vshll.u32 %v3819_v3, %v1453_v15  ;;  %v1469_v57 = vshrl.u32 %v6075_v13, %v4111_v37 }
  0xf0   : > { %v4139_v39 = vor.u32 %v1457_v55, %v1456_v46  ;;  %v4141_v56 = vor.u32 %v1460_v63, %v1459_v40  ;;  %v1467_v58 = vor.u32 %v1466_v9, %v1465_v17  ;;  %v1468_v20 = vshll.u32 %v3821_v10, %v1453_v15 }
  0xf1   : > { %v785_v2 = vmul.f32 %v784_v44, %v782_v42  ;;  %v1230_v11 = vshll.u32 %v4116_v49, 30  ;;  %v4146_v21 = vshll.u32 %v1447_v50, 8  ;;  %v480_v28 = vadd.f32 %v3951_v34, %v457_v48 }
  0xf2   : > { %vm1131_vm10 = vcmp.lt.s32.totalorder %v3964_v51, 0  ;;  %v1223_v15 = vadd.s32 %v4098_v12, %v4092_v6  ;;  %vm1471_vm11 = vcmp.lt.s32.totalorder %v4130_v16, 1  ;;  %vm1474_vm12 = vcmp.lt.s32.totalorder %v4130_v16, 4 }
  0xf3   : > { %v786_v47 = vxor.u32 2147483648, %v785_v2  ;;  %v4137_v52 = vsub.s32 %v1227_v32, %v1230_v11  ;;  %v4156_v32 = vor.u32 %v1463_v14, %v1462_v7  ;;  %v1470_v59 = vor.u32 %v1469_v57, %v1468_v20  ;;  %v4191_v7 = vpop.permute.xlu1 %289 }
  0xf4   : > { %v1479_v41 = vsel %vm1471_vm11, %v4139_v39, %v4141_v56  ;;  %v1480_v33 = vsel %vm1474_vm12, %v1467_v58, 920167782  ;;  %vm1473_vm13 = vcmp.lt.s32.totalorder %v4130_v16, 3  ;;  %vm1472_vm14 = vcmp.lt.s32.totalorder %v4130_v16, 2 }
  0xf5   : > { %v787_v60 = vsel %vm666_vm3, %v786_v47, %v785_v2  ;;  %vm1232_vm9 = vcmp.lt.s32.totalorder %v4137_v52, 0  ;;  %v1233_v8 = vsub.s32 0, %v4137_v52  ;;  %v1481_v6 = vsel %vm1473_vm13, %v4156_v32, %v1480_v33 }
  0xf6   : > { %v4152_v30 = vsel %vm4086_vm5, %v3955_v38, %v787_v60  ;;  %v1488_v12 = vand.u32 65535, %v4146_v21  ;;  %v4178_v50 = vmul.f32 30.0, %v480_v28  ;;  %v1482_v46 = vsel %vm1472_vm14, %v1479_v41, %v1481_v6 }
  0xf7   : > { %v792_v35 = vmul.f32 %v4152_v30, %v4152_v30  ;;  %v1234_v61 = vsel %vm1232_vm9, %v1233_v8, %v4137_v52  ;;  %v1253_v9 = vsub.s32 4, %v4116_v49  ;;  %v1483_v48 = vsel %vm1471_vm11, %v4141_v56, %v4156_v32 }
  0xf8   : > { %v1235_v44 = vclz %v1234_v61  ;;  %v1484_v11 = vsel %vm1474_vm12, %v1470_v59, 1326507024  ;;  %v1513_v40 = vshrl.u32 %v1482_v46, 16  ;;  %v1489_v20 = vshrl.u32 %v4146_v21, 16 }
  0xf9   : > { %v793_v4 = vmul.f32 -0.001358992, %v792_v35  ;;  %v800_v42 = vmul.f32 -0.00019511016, %v792_v35  ;;  %v1485_v47 = vsel %vm1473_vm13, %v1467_v58, %v1484_v11  ;;  %v1907_v28 = vand.u32 2139095040, %v4178_v50 }
  0xfa   : > { %v3610_v2 = vadd.s32 4294967294, %v1235_v44  ;;  %v1486_v60 = vsel %vm1472_vm14, %v1483_v48, %v1485_v47  ;;  %v1512_v41 = vand.u32 65535, %v1482_v46  ;;  %vm811_vm0 = vcmp.eq.s32.totalorder %v4114_v45, 0 }
  0xfb   : > { %v794_v55 = vadd.f32 0.041655596, %v793_v4  ;;  %v801_v63 = vadd.f32 0.008332121, %v800_v42  ;;  %vm814_vm1 = vcmp.eq.s32.totalorder %v4114_v45, 2  ;;  %v4202_v33 = vsel %vm1131_vm10, %v1253_v9, %v4116_v49 }
  0xfc   : > { %vm3611_vm15 = vcmp.lt.s32.totalorder %v3610_v2, 0  ;;  %v1490_v4 = vand.u32 65535, %v1486_v60  ;;  %v1491_v42 = vshrl.u32 %v1486_v60, 16  ;;  %vm810_vm2 = vcmp.lt.s32.totalorder %v4114_v45, 2 }
  0xfd   : > { %v795_v14 = vmul.f32 %v794_v55, %v792_v35  ;;  %v802_v17 = vmul.f32 %v801_v63, %v792_v35  ;;  %v1238_v57 = vsel %vm3611_vm15, 0, %v3610_v2  ;;  %v4205_v63 = vmul.u32 %v1513_v40, %v1488_v12 }
  0xfe   : > { %v1239_v59 = vsub.s32 32, %v1238_v57  ;;  %v1243_v58 = vsub.s32 4294967266, %v1238_v57  ;;  %vm807_vm3 = vweird.f32 %v3955_v38  ;;  %v1240_v2 = vshll.u32 %v4137_v52, %v1238_v57 }
  0xff   : > { %v796_v8 = vadd.f32 -0.4999988, %v795_v14  ;;  %v803_v61 = vadd.f32 -0.16666654, %v802_v17  ;;  %v1493_v48 = vmul.u32 %v1491_v42, %v1488_v12  ;;  %v1494_v11 = vmul.u32 %v1490_v4, %v1489_v20 }
 0x100   : > { %v1241_v55 = vshrl.u32 %v1223_v15, %v1239_v59  ;;  %v1244_v46 = vadd.s32 127, %v1243_v58  ;;  %v1514_v14 = vmul.u32 %v1512_v41, %v1488_v12  ;;  %v4210_v17 = vmul.u32 %v1512_v41, %v1489_v20 }
 0x101   : > { %v797_v44 = vmul.f32 %v796_v8, %v792_v35  ;;  %v804_v6 = vmul.f32 %v803_v61, %v792_v35  ;;  %vm4214_vm4 = vcmp.le.f32.partialorder %v1129_v54, 0.7853982  ;;  %v1492_v60 = vmul.u32 %v1490_v4, %v1488_v12 }
 0x102   : > { %v1242_v15 = vor.u32 %v1241_v55, %v1240_v2  ;;  %v1245_v47 = vshll.u32 %v1244_v46, 23  ;;  %v1496_v8 = vshll.u32 %v1493_v48, 16  ;;  %v1495_v61 = vmul.u32 %v1491_v42, %v1489_v20  ;;  %v4223_v2 = vpop.permute.xlu1 %304 }
 0x103   : > { %v798_v49 = vadd.f32 1.0, %v797_v44  ;;  %v805_v9 = vadd.f32 1.0, %v804_v6  ;;  %v1498_v59 = vshll.u32 %v1494_v11, 16  ;;  %v1518_v44 = vshll.u32 %v4205_v63, 16 }
 0x104   : > { %v1246_v58 = vor.u32 4788187, %v1245_v47  ;;  %vm1500_vm5 = vc.u32 %v1492_v60, %v1496_v8  ;;  %v1502_v41 = vadd.s32 %v1496_v8, %v1492_v60  ;;  %v1497_v6 = vshrl.u32 %v1493_v48, 16 }
 0x105   : > { %v806_v52 = vmul.f32 %v805_v9, %v4152_v30  ;;  %v815_v57 = vxor.u32 2147483648, %v798_v49  ;;  %v1501_v43 = vsel %vm1500_vm5, 1, %v3815_v0  ;;  %v1517_v55 = vmul.u32 %v1513_v40, %v1489_v20 }
 0x106   : > { %v1247_v12 = vand.u32 2147483647, %v1246_v58  ;;  %v1249_v4 = vcvt.s32.f32 %v1242_v15  ;;  %v1503_v46 = vadd.s32 %v1501_v43, %v1495_v61  ;;  %vm1504_vm6 = vc.u32 %v1502_v41, %v1498_v59 }
 0x107   : > { %v812_v54 = vxor.u32 2147483648, %v806_v52  ;;  %v816_v42 = vsel %vm814_vm1, %v815_v57, %v806_v52  ;;  %v1505_v9 = vsel %vm1504_vm6, 1, %v3815_v0  ;;  %vm1522_vm7 = vc.u32 %v1514_v14, %v1518_v44 }
 0x108   : > { %v1250_v47 = vmul.f32 %v1249_v4, %v1247_v12  ;;  %v1507_v40 = vadd.s32 %v1505_v9, %v1503_v46  ;;  %v1523_v20 = vsel %vm1522_vm7, 1, %v3815_v0  ;;  %v1520_v15 = vshll.u32 %v4210_v17, 16 }
 0x109   : > { %v813_v30 = vsel %vm811_vm0, %v798_v49, %v812_v54  ;;  %v1524_v60 = vadd.s32 %v1518_v44, %v1514_v14  ;;  %v1525_v49 = vadd.s32 %v1523_v20, %v1517_v55  ;;  %v1904_v45 = vand.u32 2147483647, %v4178_v50 }
 0x10a   : > { %v817_v48 = vsel %vm810_vm2, %v813_v30, %v816_v42  ;;  %v1251_v8 = vxor.u32 2147483648, %v1250_v47  ;;  %v1508_v52 = vadd.s32 %v1507_v40, %v1497_v6  ;;  %v1908_v57 = vshrl.u32 %v1907_v28, 23  ;;  %v4266_v42 = vpop.permute.xlu1 %319 }
 0x10b   : > { %v818_v43 = vsel %vm807_vm3, nan, %v817_v48  ;;  %v1256_v38 = vsel %vm4214_vm4, 0, %v4202_v33  ;;  %v1455_v61 = vshrl.u32 %v3817_v62, %v4111_v37  ;;  %v1476_v14 = vsel %vm1474_vm12, %v4156_v32, 2102212464 }
 0x10c   : > { %3455 = vst [vmem:[%s4236_s10 + $0x8] sm:$0xff] %v818_v43  ;;  %vm1526_vm8 = vc.u32 %v1524_v60, %v1520_v15  ;;  %v1252_v59 = vsel %vm1131_vm10, %v1251_v8, %v1250_v47  ;;  %v1499_v58 = vshrl.u32 %v1494_v11, 16  ;;  %v3624_v44 = vadd.s32 4294967169, %v1908_v57 }
 0x10d   : > { %v1527_v41 = vsel %vm1526_vm8, 1, %v3815_v0  ;;  %v1255_v28 = vsel %vm4214_vm4, %v3964_v51, %v1252_v59  ;;  %v1475_v37 = vsel %vm1471_vm11, %v1455_v61, %v4139_v39  ;;  %v1519_v33 = vshrl.u32 %v4205_v63, 16 }
 0x10e   : > { %v1529_v54 = vadd.s32 %v1527_v41, %v1525_v49  ;;  %v1257_v32 = vmul.f32 %v1255_v28, %v1255_v28  ;;  %v1477_v6 = vsel %vm1473_vm13, %v4141_v56, %v1476_v14  ;;  %v4263_v11 = vadd.s32 %v1508_v52, %v1499_v58 }
 0x10f   : > { %v1914_v55 = vadd.s32 1, %v3624_v44  ;;  %v1273_v12 = vadd.s32 3, %v1256_v38  ;;  %v1521_v4 = vshrl.u32 %v4210_v17, 16  ;;  %v4268_v39 = vadd.s32 %v1524_v60, %v1520_v15 }
 0x110   : > { %v1530_v35 = vadd.s32 %v1529_v54, %v1519_v33  ;;  %v1258_v46 = vmul.f32 -0.001358992, %v1257_v32  ;;  %v1265_v30 = vmul.f32 -0.00019511016, %v1257_v32  ;;  %v1478_v63 = vsel %vm1472_vm14, %v1475_v37, %v1477_v6 }
 0x111   : > { %vm1915_vm9 = vcmp.gt.s32.totalorder %v1914_v55, 0  ;;  %v1911_v56 = vand.u32 8388607, %v1904_v45  ;;  %vm1534_vm10 = vc.u32 %v4263_v11, %v4268_v39  ;;  %v1274_v20 = vand.u32 3, %v1273_v12 }
 0x112   : > { %v1531_v9 = vadd.s32 %v1530_v35, %v1521_v4  ;;  %v1916_v48 = vsel %vm1915_vm9, %v1914_v55, 0  ;;  %v1259_v47 = vadd.f32 0.041655596, %v1258_v46  ;;  %v1266_v40 = vadd.f32 0.008332121, %v1265_v30  ;;  %v354_v30 = vpop.permute.xlu1 %353 }
 0x113   : > { %v1918_v17 = vand.u32 31, %v1916_v48  ;;  %v1532_v60 = vmul.u32 %v4146_v21, %v1478_v63  ;;  %v333_v16 = vmul.f32 %v3945_v31, %v3936_v26  ;;  %v1912_v14 = vor.u32 8388608, %v1911_v56 }
 0x114   : > { %v1535_v43 = vadd.s32 1, %v1531_v9  ;;  %v1260_v49 = vmul.f32 %v1259_v47, %v1257_v32  ;;  %v1267_v15 = vmul.f32 %v1266_v40, %v1257_v32  ;;  %vm1276_vm11 = vcmp.eq.s32.totalorder %v1274_v20, 0 }
 0x115   : > { %v4277_v8 = vsub.s32 32, %v1918_v17  ;;  %v4281_v59 = vshrl.u32 %v1916_v48, 5  ;;  %vm1275_vm12 = vcmp.lt.s32.totalorder %v1274_v20, 2  ;;  %v1921_v33 = vshll.u32 %v3817_v62, %v1918_v17 }
 0x116   : > { %v1536_v52 = vsel %vm1534_vm10, %v1535_v43, %v1531_v9  ;;  %v1261_v57 = vadd.f32 -0.4999988, %v1260_v49  ;;  %v1268_v38 = vadd.f32 -0.16666654, %v1267_v15  ;;  %vm1272_vm13 = vweird.f32 %v3964_v51 }
 0x117   : > { %v1537_v61 = vadd.s32 %v1536_v52, %v1532_v60  ;;  %v1922_v58 = vshrl.u32 %v3818_v1, %v4277_v8  ;;  %v1925_v41 = vshrl.u32 %v3819_v3, %v4277_v8  ;;  %v1931_v21 = vshrl.u32 %v3821_v10, %v4277_v8 }
 0x118   : > { %v1262_v44 = vmul.f32 %v1261_v57, %v1257_v32  ;;  %v1269_v37 = vmul.f32 %v1268_v38, %v1257_v32  ;;  %v1924_v54 = vshll.u32 %v3818_v1, %v1918_v17  ;;  %v1927_v6 = vshll.u32 %v3819_v3, %v1918_v17 }
 0x119   : > { %v1538_v26 = vadd.s32 536870912, %v1537_v61  ;;  %v1928_v55 = vshrl.u32 %v3820_v5, %v4277_v8  ;;  %v1930_v12 = vshll.u32 %v3820_v5, %v1918_v17  ;;  %v1934_v32 = vshrl.u32 %v6075_v13, %v4277_v8 }
 0x11a   : > { %v1263_v4 = vadd.f32 1.0, %v1262_v44  ;;  %v1270_v35 = vadd.f32 1.0, %v1269_v37  ;;  %v1923_v63 = vor.u32 %v1922_v58, %v1921_v33  ;;  %v4300_v9 = vor.u32 %v1925_v41, %v1924_v54 }
 0x11b   : > { %v4296_v46 = vshrl.u32 %v1538_v26, 30  ;;  %v1932_v56 = vor.u32 %v1931_v21, %v1930_v12  ;;  %v1933_v48 = vshll.u32 %v3821_v10, %v1918_v17  ;;  %vm1279_vm14 = vcmp.eq.s32.totalorder %v1274_v20, 2 }
 0x11c   : > { %v1271_v47 = vmul.f32 %v1270_v35, %v1255_v28  ;;  %v1280_v40 = vxor.u32 2147483648, %v1263_v4  ;;  %v4304_v49 = vor.u32 %v1928_v55, %v1927_v6  ;;  %v4306_v60 = vshll.u32 %v1912_v14, 8 }
 0x11d   : > { %v1540_v43 = vshll.u32 %v4296_v46, 30  ;;  %v1935_v15 = vor.u32 %v1934_v32, %v1933_v48  ;;  %v429_v52 = vmul.f32 %v3943_v29, %v354_v30  ;;  %vm1936_vm15 = vcmp.lt.s32.totalorder %v4281_v59, 1 }
 0x11e   : > { %v1277_v57 = vxor.u32 2147483648, %v1271_v47  ;;  %vm1939_vm0 = vcmp.lt.s32.totalorder %v4281_v59, 4  ;;  %vm1937_vm1 = vcmp.lt.s32.totalorder %v4281_v59, 2  ;;  %vm1938_vm2 = vcmp.lt.s32.totalorder %v4281_v59, 3 }
 0x11f   : > { %v1541_v38 = vsub.s32 %v1537_v61, %v1540_v43  ;;  %v1944_v28 = vsel %vm1936_vm15, %v1923_v63, %v4300_v9  ;;  %v1945_v17 = vsel %vm1939_vm0, %v1932_v56, 920167782  ;;  %v1281_v61 = vsel %vm1279_vm14, %v1280_v40, %v1271_v47 }
 0x120   : > { %v1278_v14 = vsel %vm1276_vm11, %v1263_v4, %v1277_v57  ;;  %v1946_v21 = vsel %vm1938_vm2, %v4304_v49, %v1945_v17  ;;  %v1948_v44 = vsel %vm1936_vm15, %v4300_v9, %v4304_v49  ;;  %v1949_v37 = vsel %vm1939_vm0, %v1935_v15, 1326507024 }
 0x121   : > { %vm1542_vm3 = vcmp.lt.s32.totalorder %v1541_v38, 0  ;;  %v1543_v58 = vsub.s32 0, %v1541_v38  ;;  %v1282_v41 = vsel %vm1275_vm12, %v1278_v14, %v1281_v61  ;;  %v1947_v20 = vsel %vm1937_vm1, %v1944_v28, %v1946_v21 }
 0x122   : > { %v1283_v26 = vsel %vm1272_vm13, nan, %v1282_v41  ;;  %v448_v54 = vadd.f32 %v429_v52, %v333_v16  ;;  %v1950_v55 = vsel %vm1938_vm2, %v1932_v56, %v1949_v37  ;;  %v1978_v12 = vshrl.u32 %v1947_v20, 16 }
 0x123   : > { %v1544_v33 = vsel %vm1542_vm3, %v1543_v58, %v1541_v38  ;;  %3458 = vst [vmem:[%s4236_s10 + $0x20] sm:$0xff] %v1283_v26  ;;  %v1951_v4 = vsel %vm1937_vm1, %v1948_v44, %v1950_v55  ;;  %v1953_v35 = vand.u32 65535, %v4306_v60  ;;  %v1954_v32 = vshrl.u32 %v4306_v60, 16 }
 0x124   : > { %v1545_v6 = vclz %v1544_v33  ;;  %v1977_v51 = vand.u32 65535, %v1947_v20  ;;  %v1920_v48 = vshrl.u32 %v3817_v62, %v4277_v8  ;;  %v1955_v47 = vand.u32 65535, %v1951_v4 }
 0x125   : > { %v1956_v16 = vshrl.u32 %v1951_v4, 16  ;;  %v1533_v40 = vadd.s32 %v4268_v39, %v4263_v11  ;;  %v1563_v56 = vsub.s32 4, %v4296_v46  ;;  %v1980_v43 = vmul.u32 %v1978_v12, %v1953_v35 }
 0x126   : > { %v3616_v30 = vadd.s32 4294967294, %v1545_v6  ;;  %v471_v15 = vadd.f32 %v3951_v34, %v448_v54  ;;  %v1940_v52 = vsel %vm1936_vm15, %v1920_v48, %v1923_v63  ;;  %v1959_v28 = vmul.u32 %v1955_v47, %v1954_v32 }
 0x127   : > { %v1958_v57 = vmul.u32 %v1956_v16, %v1953_v35  ;;  %v1979_v14 = vmul.u32 %v1977_v51, %v1953_v35  ;;  %v1981_v61 = vmul.u32 %v1977_v51, %v1954_v32  ;;  %v1983_v8 = vshll.u32 %v1980_v43, 16 }
 0x128   : > { %vm3617_vm4 = vcmp.lt.s32.totalorder %v3616_v30, 0  ;;  %vm1441_vm5 = vcmp.lt.s32.totalorder %v4064_v53, 0  ;;  %v1957_v11 = vmul.u32 %v1955_v47, %v1953_v35  ;;  %v1960_v44 = vmul.u32 %v1956_v16, %v1954_v32 }
 0x129   : > { %v1548_v17 = vsel %vm3617_vm4, 0, %v3616_v30  ;;  %v1961_v39 = vshll.u32 %v1958_v57, 16  ;;  %v1963_v37 = vshll.u32 %v1959_v28, 16  ;;  %v1982_v34 = vmul.u32 %v1978_v12, %v1954_v32 }
 0x12a   : > { %v1549_v58 = vsub.s32 32, %v1548_v17  ;;  %v1553_v41 = vsub.s32 4294967266, %v1548_v17  ;;  %v1550_v21 = vshll.u32 %v1541_v38, %v1548_v17  ;;  %v1985_v54 = vshll.u32 %v1981_v61, 16 }
 0x12b   : > { %vm1965_vm6 = vc.u32 %v1957_v11, %v1961_v39  ;;  %v1967_v63 = vadd.s32 %v1961_v39, %v1957_v11  ;;  %vm1987_vm7 = vc.u32 %v1979_v14, %v1983_v8  ;;  %v1989_v6 = vadd.s32 %v1983_v8, %v1979_v14 }
 0x12c   : > { %v1551_v26 = vshrl.u32 %v1533_v40, %v1549_v58  ;;  %v1554_v33 = vadd.s32 127, %v1553_v41  ;;  %v1966_v20 = vsel %vm1965_vm6, 1, %v3815_v0  ;;  %v1941_v38 = vsel %vm1939_vm0, %v4304_v49, 2102212464  ;;  %v402_v49 = vpop.permute.xlu2 %401 }
 0x12d   : > { %v1968_v51 = vadd.s32 %v1966_v20, %v1960_v44  ;;  %vm1969_vm8 = vc.u32 %v1967_v63, %v1963_v37  ;;  %v1988_v12 = vsel %vm1987_vm7, 1, %v3815_v0  ;;  %vm1991_vm9 = vc.u32 %v1989_v6, %v1985_v54 }
 0x12e   : > { %v1552_v55 = vor.u32 %v1551_v26, %v1550_v21  ;;  %v1555_v4 = vshll.u32 %v1554_v33, 23  ;;  %v1970_v35 = vsel %vm1969_vm8, 1, %v3815_v0  ;;  %v1962_v30 = vshrl.u32 %v1958_v57, 16  ;;  %v300_v21 = vpop.permute.xlu0 %299 }
 0x12f   : > { %v1972_v48 = vadd.s32 %v1970_v35, %v1968_v51  ;;  %v1990_v47 = vadd.s32 %v1988_v12, %v1982_v34  ;;  %v1964_v16 = vshrl.u32 %v1959_v28, 16  ;;  %v1984_v40 = vshrl.u32 %v1980_v43, 16 }
 0x130   : > { %v1556_v32 = vor.u32 4788187, %v1555_v4  ;;  %v1992_v17 = vsel %vm1991_vm9, 1, %v3815_v0  ;;  %v4357_v14 = vmul.f32 30.0, %v471_v15  ;;  %v1559_v58 = vcvt.s32.f32 %v1552_v55 }
 0x131   : > { %v1973_v41 = vadd.s32 %v1972_v48, %v1962_v30  ;;  %v1994_v11 = vadd.s32 %v1992_v17, %v1990_v47  ;;  %v1564_v39 = vsel %vm1441_vm5, %v1563_v56, %v4296_v46  ;;  %v1942_v57 = vsel %vm1938_vm2, %v4300_v9, %v1941_v38 }
 0x132   : > { %v1557_v8 = vand.u32 2147483647, %v1556_v32  ;;  %v509_v28 = vand.u32 2147483647, %v4357_v14  ;;  %v512_v43 = vand.u32 2139095040, %v4357_v14  ;;  %v1986_v37 = vshrl.u32 %v1981_v61, 16 }
 0x133   : > { %v1974_v44 = vadd.s32 %v1973_v41, %v1964_v16  ;;  %v1995_v34 = vadd.s32 %v1994_v11, %v1984_v40  ;;  %v6084_v26 = vand.u32 2147483647, %v4064_v53  ;;  %v1993_v46 = vadd.s32 %v1989_v6, %v1985_v54  ;;  %v4390_v11 = vld [vmem:[%s6072_s2] ss:$0 sm:$0xff] }
 0x134   : > { %v1560_v15 = vmul.f32 %v1559_v58, %v1557_v8  ;;  %v513_v56 = vshrl.u32 %v512_v43, 23  ;;  %v441_v63 = vmul.f32 %v3943_v29, %v402_v49  ;;  %v1943_v20 = vsel %vm1937_vm1, %v1940_v52, %v1942_v57 }
 0x135   : > { %vm4369_vm10 = vcmp.le.f32.partialorder %v6084_v26, 0.7853982  ;;  %v1996_v55 = vadd.s32 %v1995_v34, %v1986_v37  ;;  %v516_v4 = vand.u32 8388607, %v509_v28  ;;  %v345_v61 = vmul.f32 %v3945_v31, %v300_v21 }
 0x136   : > { %v1561_v9 = vxor.u32 2147483648, %v1560_v15  ;;  %v1566_v51 = vsel %vm4369_vm10, 0, %v1564_v39  ;;  %vm1999_vm11 = vc.u32 %v1974_v44, %v1993_v46  ;;  %v3597_v38 = vadd.s32 4294967169, %v513_v56 }
 0x137   : > { %v2000_v6 = vadd.s32 1, %v1996_v55  ;;  %v1997_v52 = vmul.u32 %v4306_v60, %v1943_v20  ;;  %v460_v12 = vadd.f32 %v441_v63, %v345_v61  ;;  %v1583_v30 = vadd.s32 3, %v1566_v51 }
 0x138   : > { %v1562_v54 = vsel %vm1441_vm5, %v1561_v9, %v1560_v15  ;;  %v519_v35 = vadd.s32 1, %v3597_v38  ;;  %v517_v47 = vor.u32 8388608, %v516_v4  ;;  %v4399_v26 = vadd.s32 %v1993_v46, %v1974_v44 }
 0x139   : > { %v1565_v59 = vsel %vm4369_vm10, %v4064_v53, %v1562_v54  ;;  %v2001_v48 = vsel %vm1999_vm11, %v2000_v6, %v1996_v55  ;;  %v483_v60 = vadd.f32 %v4390_v11, %v460_v12  ;;  %v1584_v57 = vand.u32 3, %v1583_v30 }
 0x13a   : > { %v1567_v32 = vmul.f32 %v1565_v59, %v1565_v59  ;;  %v2002_v16 = vadd.s32 %v2001_v48, %v1997_v52  ;;  %vm520_vm12 = vcmp.gt.s32.totalorder %v519_v35, 0  ;;  %v4393_v43 = vshll.u32 %v517_v47, 8 }
 0x13b   : > { %v521_v8 = vsel %vm520_vm12, %v519_v35, 0  ;;  %v4402_v56 = vmul.f32 30.0, %v483_v60  ;;  %vm1589_vm13 = vcmp.eq.s32.totalorder %v1584_v57, 2  ;;  %vm1586_vm14 = vcmp.eq.s32.totalorder %v1584_v57, 0 }
 0x13c   : > { %v1568_v40 = vmul.f32 -0.001358992, %v1567_v32  ;;  %v1575_v17 = vmul.f32 -0.00019511016, %v1567_v32  ;;  %v2003_v58 = vadd.s32 536870912, %v2002_v16  ;;  %v523_v41 = vand.u32 31, %v521_v8 }
 0x13d   : > { %v4405_v20 = vand.u32 65535, %v4393_v43  ;;  %v4408_v55 = vshrl.u32 %v4393_v43, 16  ;;  %v4412_v61 = vshrl.u32 %v521_v8, 5  ;;  %vm1585_vm15 = vcmp.lt.s32.totalorder %v1584_v57, 2 }
 0x13e   : > { %v1569_v49 = vadd.f32 0.041655596, %v1568_v40  ;;  %v1576_v39 = vadd.f32 0.008332121, %v1575_v17  ;;  %v4395_v21 = vshrl.u32 %v2003_v58, 30  ;;  %v4397_v15 = vsub.s32 32, %v523_v41 }
 0x13f   : > { %v526_v54 = vshll.u32 %v3817_v62, %v523_v41  ;;  %vm1582_vm0 = vweird.f32 %v4064_v53  ;;  %v529_v35 = vshll.u32 %v3818_v1, %v523_v41  ;;  %vm1906_vm2 = vcmp.lt.s32.totalorder %v4178_v50, 0 }
 0x140   : > { %v1570_v37 = vmul.f32 %v1569_v49, %v1567_v32  ;;  %v1577_v34 = vmul.f32 %v1576_v39, %v1567_v32  ;;  %v2005_v33 = vshll.u32 %v4395_v21, 30  ;;  %v527_v44 = vshrl.u32 %v3818_v1, %v4397_v15 }
 0x141   : > { %v530_v46 = vshrl.u32 %v3819_v3, %v4397_v15  ;;  %v536_v6 = vshrl.u32 %v3821_v10, %v4397_v15  ;;  %v533_v12 = vshrl.u32 %v3820_v5, %v4397_v15  ;;  %v535_v47 = vshll.u32 %v3820_v5, %v523_v41 }
 0x142   : > { %v1571_v63 = vadd.f32 -0.4999988, %v1570_v37  ;;  %v1578_v9 = vadd.f32 -0.16666654, %v1577_v34  ;;  %v4410_v4 = vsub.s32 %v2002_v16, %v2005_v33  ;;  %v528_v40 = vor.u32 %v527_v44, %v526_v54 }
 0x143   : > { %v531_v17 = vor.u32 %v530_v46, %v529_v35  ;;  %v539_v8 = vshrl.u32 %v6075_v13, %v4397_v15  ;;  %v537_v39 = vor.u32 %v536_v6, %v535_v47  ;;  %v538_v34 = vshll.u32 %v3821_v10, %v523_v41 }
 0x144   : > { %v1572_v51 = vmul.f32 %v1571_v63, %v1567_v32  ;;  %v1579_v38 = vmul.f32 %v1578_v9, %v1567_v32  ;;  %vm2007_vm1 = vcmp.lt.s32.totalorder %v4410_v4, 0  ;;  %v2008_v52 = vsub.s32 0, %v4410_v4 }
 0x145   : > { %v532_v32 = vshll.u32 %v3819_v3, %v523_v41  ;;  %v2369_v33 = vand.u32 2147483647, %v4402_v56  ;;  %v2372_v63 = vand.u32 2139095040, %v4402_v56  ;;  %vm4438_vm3 = vcmp.le.f32.partialorder %v1904_v45, 0.7853982 }
 0x146   : > { %v1573_v30 = vadd.f32 1.0, %v1572_v51  ;;  %v1580_v48 = vadd.f32 1.0, %v1579_v38  ;;  %v2009_v16 = vsel %vm2007_vm1, %v2008_v52, %v4410_v4  ;;  %vm541_vm4 = vcmp.lt.s32.totalorder %v4412_v61, 1 }
 0x147   : > { %v2010_v49 = vclz %v2009_v16  ;;  %v534_v37 = vor.u32 %v533_v12, %v532_v32  ;;  %v540_v41 = vor.u32 %v539_v8, %v538_v34  ;;  %vm543_vm5 = vcmp.lt.s32.totalorder %v4412_v61, 3 }
 0x148   : > { %v1581_v58 = vmul.f32 %v1580_v48, %v1565_v59  ;;  %v1590_v60 = vxor.u32 2147483648, %v1573_v30  ;;  %v2028_v59 = vsub.s32 4, %v4395_v21  ;;  %vm544_vm6 = vcmp.lt.s32.totalorder %v4412_v61, 4 }
 0x149   : > { %v3625_v46 = vadd.s32 4294967294, %v2010_v49  ;;  %v549_v45 = vsel %vm541_vm4, %v528_v40, %v531_v17  ;;  %v550_v54 = vsel %vm544_vm6, %v537_v39, 920167782  ;;  %vm542_vm8 = vcmp.lt.s32.totalorder %v4412_v61, 2 }
 0x14a   : > { %v1587_v9 = vxor.u32 2147483648, %v1581_v58  ;;  %v1591_v51 = vsel %vm1589_vm13, %v1590_v60, %v1581_v58  ;;  %v551_v35 = vsel %vm543_vm5, %v534_v37, %v550_v54  ;;  %v553_v32 = vsel %vm541_vm4, %v531_v17, %v534_v37 }
 0x14b   : > { %vm3626_vm7 = vcmp.lt.s32.totalorder %v3625_v46, 0  ;;  %v2029_v57 = vsel %vm1906_vm2, %v2028_v59, %v4395_v21  ;;  %v552_v16 = vsel %vm542_vm8, %v549_v45, %v551_v35  ;;  %v554_v8 = vsel %vm544_vm6, %v540_v41, 1326507024 }
 0x14c   : > { %v1588_v38 = vsel %vm1586_vm14, %v1573_v30, %v1587_v9  ;;  %v2013_v52 = vsel %vm3626_vm7, 0, %v3625_v46  ;;  %v555_v60 = vsel %vm543_vm5, %v537_v39, %v554_v8  ;;  %v582_v49 = vand.u32 65535, %v552_v16 }
 0x14d   : > { %v1592_v6 = vsel %vm1585_vm15, %v1588_v38, %v1591_v51  ;;  %v2014_v48 = vsub.s32 32, %v2013_v52  ;;  %v2018_v30 = vsub.s32 4294967266, %v2013_v52  ;;  %v2015_v47 = vshll.u32 %v4410_v4, %v2013_v52 }
 0x14e   : > { %v1593_v12 = vsel %vm1582_vm0, nan, %v1592_v6  ;;  %v525_v4 = vshrl.u32 %v3817_v62, %v4397_v15  ;;  %v546_v34 = vsel %vm544_vm6, %v534_v37, 2102212464  ;;  %v556_v21 = vsel %vm542_vm8, %v553_v32, %v555_v60 }
 0x14f   : > { %3460 = vst [vmem:[%s4236_s10 + $0x30] sm:$0xff] %v1593_v12  ;;  %v2016_v53 = vshrl.u32 %v4399_v26, %v2014_v48  ;;  %v2019_v58 = vadd.s32 127, %v2018_v30  ;;  %v583_v9 = vshrl.u32 %v552_v16, 16  ;;  %v560_v51 = vand.u32 65535, %v556_v21 }
 0x150   : > { %v561_v41 = vshrl.u32 %v556_v21, 16  ;;  %v2031_v26 = vsel %vm4438_vm3, 0, %v2029_v57  ;;  %v545_v39 = vsel %vm541_vm4, %v525_v4, %v528_v40  ;;  %v586_v15 = vmul.u32 %v582_v49, %v4408_v55 }
 0x151   : > { %v2017_v46 = vor.u32 %v2016_v53, %v2015_v47  ;;  %v2020_v59 = vshll.u32 %v2019_v58, 23  ;;  %v585_v38 = vmul.u32 %v583_v9, %v4405_v20  ;;  %v547_v37 = vsel %vm543_vm5, %v531_v17, %v546_v34 }
 0x152   : > { %v563_v54 = vmul.u32 %v561_v41, %v4405_v20  ;;  %v2373_v6 = vshrl.u32 %v2372_v63, 23  ;;  %v564_v52 = vmul.u32 %v560_v51, %v4408_v55  ;;  %v584_v35 = vmul.u32 %v582_v49, %v4405_v20 }
 0x153   : > { %v2021_v45 = vor.u32 4788187, %v2020_v59  ;;  %v587_v12 = vmul.u32 %v583_v9, %v4408_v55  ;;  %v588_v48 = vshll.u32 %v585_v38, 16  ;;  %v2024_v40 = vcvt.s32.f32 %v2017_v46 }
 0x154   : > { %v562_v32 = vmul.u32 %v560_v51, %v4405_v20  ;;  %v566_v47 = vshll.u32 %v563_v54, 16  ;;  %v565_v57 = vmul.u32 %v561_v41, %v4408_v55  ;;  %v568_v16 = vshll.u32 %v564_v52, 16 }
 0x155   : > { %v2022_v30 = vand.u32 2147483647, %v2021_v45  ;;  %v590_v8 = vshll.u32 %v586_v15, 16  ;;  %vm592_vm9 = vc.u32 %v584_v35, %v588_v48  ;;  %v594_v60 = vadd.s32 %v588_v48, %v584_v35 }
 0x156   : > { %vm570_vm10 = vc.u32 %v562_v32, %v566_v47  ;;  %v572_v63 = vadd.s32 %v566_v47, %v562_v32  ;;  %v593_v53 = vsel %vm592_vm9, 1, %v3815_v0  ;;  %v3633_v4 = vadd.s32 4294967169, %v2373_v6 }
 0x157   : > { %v2025_v17 = vmul.f32 %v2024_v40, %v2022_v30  ;;  %v571_v58 = vsel %vm570_vm10, 1, %v3815_v0  ;;  %v595_v49 = vadd.s32 %v593_v53, %v587_v12  ;;  %v2048_v21 = vadd.s32 3, %v2031_v26 }
 0x158   : > { %v573_v9 = vadd.s32 %v571_v58, %v565_v57  ;;  %vm574_vm11 = vc.u32 %v572_v63, %v568_v16  ;;  %v548_v20 = vsel %vm542_vm8, %v545_v39, %v547_v37  ;;  %vm596_vm12 = vc.u32 %v594_v60, %v590_v8 }
 0x159   : > { %v2026_v34 = vxor.u32 2147483648, %v2025_v17  ;;  %v575_v55 = vsel %vm574_vm11, 1, %v3815_v0  ;;  %v2379_v46 = vadd.s32 1, %v3633_v4  ;;  %v567_v51 = vshrl.u32 %v563_v54, 16 }
 0x15a   : > { %v577_v41 = vadd.s32 %v575_v55, %v573_v9  ;;  %v597_v45 = vsel %vm596_vm12, 1, %v3815_v0  ;;  %v589_v6 = vshrl.u32 %v585_v38, 16  ;;  %v569_v39 = vshrl.u32 %v564_v52, 16 }
 0x15b   : > { %v2027_v59 = vsel %vm1906_vm2, %v2026_v34, %v2025_v17  ;;  %v599_v35 = vadd.s32 %v597_v45, %v595_v49  ;;  %vm2380_vm13 = vcmp.gt.s32.totalorder %v2379_v46, 0  ;;  %v591_v48 = vshrl.u32 %v586_v15, 16 }
 0x15c   : > { %v2030_v26 = vsel %vm4438_vm3, %v4178_v50, %v2027_v59  ;;  %v578_v37 = vadd.s32 %v577_v41, %v567_v51  ;;  %v2381_v12 = vsel %vm2380_vm13, %v2379_v46, 0  ;;  %v2376_v40 = vand.u32 8388607, %v2369_v33 }
 0x15d   : > { %v2032_v61 = vmul.f32 %v2030_v26, %v2030_v26  ;;  %v600_v30 = vadd.s32 %v599_v35, %v589_v6  ;;  %v2383_v54 = vand.u32 31, %v2381_v12  ;;  %v4507_v16 = vadd.s32 %v594_v60, %v590_v8 }
 0x15e   : > { %v4505_v57 = vadd.s32 %v578_v37, %v569_v39  ;;  %v4511_v44 = vmul.f32 %v3945_v31, %v4073_v36  ;;  %v4513_v38 = vand.u32 3, %v2048_v21  ;;  %v602_v53 = vmul.u32 %v4393_v43, %v548_v20  ;;  %v4530_v37 = vpop.permute.xlu0 %314 }
 0x15f   : > { %v2033_v32 = vmul.f32 -0.001358992, %v2032_v61  ;;  %v2040_v47 = vmul.f32 -0.00019511016, %v2032_v61  ;;  %v601_v52 = vadd.s32 %v600_v30, %v591_v48  ;;  %v2384_v17 = vsub.s32 32, %v2383_v54 }
 0x160   : > { %vm604_vm14 = vc.u32 %v4505_v57, %v4507_v16  ;;  %v2377_v49 = vor.u32 8388608, %v2376_v40  ;;  %v4518_v4 = vshrl.u32 %v2381_v12, 5  ;;  %v2386_v34 = vshll.u32 %v3817_v62, %v2383_v54 }
 0x161   : > { %v2034_v15 = vadd.f32 0.041655596, %v2033_v32  ;;  %v2041_v63 = vadd.f32 0.008332121, %v2040_v47  ;;  %v605_v58 = vadd.s32 1, %v601_v52  ;;  %v2387_v8 = vshrl.u32 %v3818_v1, %v2384_v17 }
 0x162   : > { %v2390_v21 = vshrl.u32 %v3819_v3, %v2384_v17  ;;  %v2389_v55 = vshll.u32 %v3818_v1, %v2383_v54  ;;  %v2392_v43 = vshll.u32 %v3819_v3, %v2383_v54  ;;  %v2393_v20 = vshrl.u32 %v3820_v5, %v2384_v17 }
 0x163   : > { %v2035_v60 = vmul.f32 %v2034_v15, %v2032_v61  ;;  %v2042_v36 = vmul.f32 %v2041_v63, %v2032_v61  ;;  %v606_v9 = vsel %vm604_vm14, %v605_v58, %v601_v52  ;;  %v2388_v41 = vor.u32 %v2387_v8, %v2386_v34 }
 0x164   : > { %v607_v51 = vadd.s32 %v606_v9, %v602_v53  ;;  %v2395_v45 = vshll.u32 %v3820_v5, %v2383_v54  ;;  %v2396_v6 = vshrl.u32 %v3821_v10, %v2384_v17  ;;  %v2398_v35 = vshll.u32 %v3821_v10, %v2383_v54 }
 0x165   : > { %v2036_v46 = vadd.f32 -0.4999988, %v2035_v60  ;;  %v2043_v59 = vadd.f32 -0.16666654, %v2042_v36  ;;  %v2399_v39 = vshrl.u32 %v6075_v13, %v2384_v17  ;;  %v2391_v40 = vor.u32 %v2390_v21, %v2389_v55 }
 0x166   : > { %v608_v30 = vadd.s32 536870912, %v607_v51  ;;  %vm2047_vm15 = vweird.f32 %v4178_v50  ;;  %vm2050_vm0 = vcmp.lt.s32.totalorder %v4513_v38, 2  ;;  %v2394_v32 = vor.u32 %v2393_v20, %v2392_v43 }
 0x167   : > { %v2037_v12 = vmul.f32 %v2036_v46, %v2032_v61  ;;  %v2044_v48 = vmul.f32 %v2043_v59, %v2032_v61  ;;  %v2397_v47 = vor.u32 %v2396_v6, %v2395_v45  ;;  %v2400_v52 = vor.u32 %v2399_v39, %v2398_v35 }
 0x168   : > { %v4534_v53 = vshrl.u32 %v608_v30, 30  ;;  %vm2404_vm1 = vcmp.lt.s32.totalorder %v4518_v4, 4  ;;  %vm2401_vm2 = vcmp.lt.s32.totalorder %v4518_v4, 1  ;;  %vm2403_vm3 = vcmp.lt.s32.totalorder %v4518_v4, 3 }
 0x169   : > { %v2038_v15 = vadd.f32 1.0, %v2037_v12  ;;  %v2045_v63 = vadd.f32 1.0, %v2044_v48  ;;  %v2410_v61 = vsel %vm2404_vm1, %v2397_v47, 920167782  ;;  %v4541_v54 = vshll.u32 %v2377_v49, 8  ;;  %v366_v12 = vpop.permute.xlu1 %365  ;;  %v4571_v48 = vpop.permute.xlu0 %329 }
 0x16a   : > { %v610_v60 = vshll.u32 %v4534_v53, 30  ;;  %v2409_v36 = vsel %vm2401_vm2, %v2388_v41, %v2391_v40  ;;  %vm2051_vm4 = vcmp.eq.s32.totalorder %v4513_v38, 0  ;;  %vm2054_vm5 = vcmp.eq.s32.totalorder %v4513_v38, 2 }
 0x16b   : > { %v2046_v58 = vmul.f32 %v2045_v63, %v2030_v26  ;;  %v2055_v8 = vxor.u32 2147483648, %v2038_v15  ;;  %v2411_v34 = vsel %vm2403_vm3, %v2394_v32, %v2410_v61  ;;  %v2414_v21 = vsel %vm2404_vm1, %v2400_v52, 1326507024 }
 0x16c   : > { %v4552_v49 = vsub.s32 %v607_v51, %v610_v60  ;;  %vm2402_vm6 = vcmp.lt.s32.totalorder %v4518_v4, 2  ;;  %v2413_v26 = vsel %vm2401_vm2, %v2391_v40, %v2394_v32  ;;  %v2385_v55 = vshrl.u32 %v3817_v62, %v2384_v17 }
 0x16d   : > { %v2052_v9 = vxor.u32 2147483648, %v2046_v58  ;;  %v2412_v43 = vsel %vm2402_vm6, %v2409_v36, %v2411_v34  ;;  %v2415_v20 = vsel %vm2403_vm3, %v2397_v47, %v2414_v21  ;;  %v2418_v46 = vand.u32 65535, %v4541_v54 }
 0x16e   : > { %v2056_v45 = vsel %vm2054_vm5, %v2055_v8, %v2046_v58  ;;  %vm612_vm7 = vcmp.lt.s32.totalorder %v4552_v49, 0  ;;  %v613_v51 = vsub.s32 0, %v4552_v49  ;;  %v2406_v17 = vsel %vm2404_vm1, %v2394_v32, 2102212464 }
 0x16f   : > { %v2053_v59 = vsel %vm2051_vm4, %v2038_v15, %v2052_v9  ;;  %v2416_v35 = vsel %vm2402_vm6, %v2413_v26, %v2415_v20  ;;  %v2443_v39 = vshrl.u32 %v2412_v43, 16  ;;  %v2442_v15 = vand.u32 65535, %v2412_v43 }
 0x170   : > { %v2057_v6 = vsel %vm2050_vm0, %v2053_v59, %v2056_v45  ;;  %v614_v47 = vsel %vm612_vm7, %v613_v51, %v4552_v49  ;;  %v2420_v52 = vand.u32 65535, %v2416_v35  ;;  %v2419_v63 = vshrl.u32 %v4541_v54, 16 }
 0x171   : > { %v2058_v30 = vsel %vm2047_vm15, nan, %v2057_v6  ;;  %v615_v38 = vclz %v614_v47  ;;  %v2421_v61 = vshrl.u32 %v2416_v35, 16  ;;  %v2445_v32 = vmul.u32 %v2443_v39, %v2418_v46 }
 0x172   : > { %3463 = vst [vmem:[%s4236_s10 + $0x48] sm:$0xff] %v2058_v30  ;;  %v336_v58 = vmul.f32 %v3945_v31, %v4105_v19  ;;  %v603_v8 = vadd.s32 %v4507_v16, %v4505_v57  ;;  %v2405_v50 = vsel %vm2401_vm2, %v2385_v55, %v2388_v41  ;;  %v432_v60 = vmul.f32 %v3943_v29, %v366_v12 }
 0x173   : > { %v3598_v36 = vadd.s32 4294967294, %v615_v38  ;;  %v633_v34 = vsub.s32 4, %v4534_v53  ;;  %v2423_v21 = vmul.u32 %v2421_v61, %v2418_v46  ;;  %v2424_v9 = vmul.u32 %v2420_v52, %v2419_v63 }
 0x174   : > { %vm511_vm8 = vcmp.lt.s32.totalorder %v4357_v14, 0  ;;  %v2407_v26 = vsel %vm2403_vm3, %v2391_v40, %v2406_v17  ;;  %v2444_v43 = vmul.u32 %v2442_v15, %v2418_v46  ;;  %v2446_v19 = vmul.u32 %v2442_v15, %v2419_v63 }
 0x175   : > { %v2448_v20 = vshll.u32 %v2445_v32, 16  ;;  %vm3599_vm9 = vcmp.lt.s32.totalorder %v3598_v36, 0  ;;  %v2422_v57 = vmul.u32 %v2420_v52, %v2418_v46  ;;  %v2425_v16 = vmul.u32 %v2421_v61, %v2419_v63 }
 0x176   : > { %v2426_v59 = vshll.u32 %v2423_v21, 16  ;;  %v618_v41 = vsel %vm3599_vm9, 0, %v3598_v36  ;;  %v2428_v55 = vshll.u32 %v2424_v9, 16  ;;  %v2447_v45 = vmul.u32 %v2443_v39, %v2419_v63  ;;  %v362_v39 = vpop.permute.xlu0 %361 }
 0x177   : > { %v2450_v51 = vshll.u32 %v2446_v19, 16  ;;  %v619_v6 = vsub.s32 32, %v618_v41  ;;  %v620_v35 = vshll.u32 %v4552_v49, %v618_v41  ;;  %v623_v12 = vsub.s32 4294967266, %v618_v41 }
 0x178   : > { %vm2430_vm10 = vc.u32 %v2422_v57, %v2426_v59  ;;  %v2432_v47 = vadd.s32 %v2426_v59, %v2422_v57  ;;  %vm2452_vm11 = vc.u32 %v2444_v43, %v2448_v20  ;;  %v2454_v40 = vadd.s32 %v2448_v20, %v2444_v43 }
 0x179   : > { %v2431_v30 = vsel %vm2430_vm10, 1, %v3815_v0  ;;  %v621_v17 = vshrl.u32 %v603_v8, %v619_v6  ;;  %v624_v15 = vadd.s32 127, %v623_v12  ;;  %v2453_v46 = vsel %vm2452_vm11, 1, %v3815_v0 }
 0x17a   : > { %v2433_v38 = vadd.s32 %v2431_v30, %v2425_v16  ;;  %vm2434_vm12 = vc.u32 %v2432_v47, %v2428_v55  ;;  %v2449_v52 = vshrl.u32 %v2445_v32, 16  ;;  %v2455_v61 = vadd.s32 %v2453_v46, %v2447_v45 }
 0x17b   : > { %vm2456_vm13 = vc.u32 %v2454_v40, %v2450_v51  ;;  %v622_v63 = vor.u32 %v621_v17, %v620_v35  ;;  %v625_v36 = vshll.u32 %v624_v15, 23  ;;  %v2435_v49 = vsel %vm2434_vm12, 1, %v3815_v0 }
 0x17c   : > { %v2457_v41 = vsel %vm2456_vm13, 1, %v3815_v0  ;;  %v2427_v13 = vshrl.u32 %v2423_v21, 16  ;;  %v2437_v57 = vadd.s32 %v2435_v49, %v2433_v38  ;;  %v451_v43 = vadd.f32 %v432_v60, %v336_v58 }
 0x17d   : > { %v2459_v59 = vadd.s32 %v2457_v41, %v2455_v61  ;;  %v626_v8 = vor.u32 4788187, %v625_v36  ;;  %v634_v20 = vsel %vm511_vm8, %v633_v34, %v4534_v53  ;;  %v2429_v16 = vshrl.u32 %v2424_v9, 16 }
 0x17e   : > { %v431_v32 = vmul.f32 %v3943_v29, %v362_v39  ;;  %v2438_v55 = vadd.s32 %v2437_v57, %v2427_v13  ;;  %v2451_v45 = vshrl.u32 %v2446_v19, 16  ;;  %v474_v35 = vadd.f32 %v4390_v11, %v451_v43 }
 0x17f   : > { %v2460_v6 = vadd.s32 %v2459_v59, %v2449_v52  ;;  %v627_v12 = vand.u32 2147483647, %v626_v8  ;;  %v629_v30 = vcvt.s32.f32 %v622_v63  ;;  %v2408_v21 = vsel %vm2402_vm6, %v2405_v50, %v2407_v26 }
 0x180   : > { %v450_v58 = vadd.f32 %v431_v32, %v4511_v44  ;;  %v2439_v60 = vadd.s32 %v2438_v55, %v2429_v16  ;;  %v2458_v47 = vadd.s32 %v2454_v40, %v2450_v51  ;;  %v4602_v15 = vmul.f32 30.0, %v474_v35 }
 0x181   : > { %v2461_v17 = vadd.s32 %v2460_v6, %v2451_v45  ;;  %v630_v53 = vmul.f32 %v629_v30, %v627_v12  ;;  %vm510_vm14 = vcmp.le.f32.partialorder %v509_v28, 0.7853982  ;;  %v2462_v50 = vmul.u32 %v4541_v54, %v2408_v21 }
 0x182   : > { %v473_v34 = vadd.f32 %v4390_v11, %v450_v58  ;;  %vm2464_vm15 = vc.u32 %v2439_v60, %v2458_v47  ;;  %v974_v9 = vand.u32 2147483647, %v4602_v15  ;;  %v636_v4 = vsel %vm510_vm14, 0, %v634_v20 }
 0x183   : > { %v2465_v13 = vadd.s32 1, %v2461_v17  ;;  %v631_v19 = vxor.u32 2147483648, %v630_v53  ;;  %v977_v44 = vand.u32 2139095040, %v4602_v15  ;;  %v653_v46 = vadd.s32 3, %v636_v4 }
 0x184   : > { %v4610_v51 = vmul.f32 30.0, %v473_v34  ;;  %v981_v52 = vand.u32 8388607, %v974_v9  ;;  %vm2371_vm0 = vcmp.lt.s32.totalorder %v4402_v56, 0  ;;  %vm4629_vm3 = vcmp.le.f32.partialorder %v2369_v33, 0.7853982 }
 0x185   : > { %v2466_v26 = vsel %vm2464_vm15, %v2465_v13, %v2461_v17  ;;  %v632_v40 = vsel %vm511_vm8, %v631_v19, %v630_v53  ;;  %v978_v38 = vshrl.u32 %v977_v44, 23  ;;  %v4618_v59 = vand.u32 3, %v653_v46 }
 0x186   : > { %v2467_v11 = vadd.s32 %v2466_v26, %v2462_v50  ;;  %v635_v28 = vsel %vm510_vm14, %v4357_v14, %v632_v40  ;;  %v822_v54 = vand.u32 2139095040, %v4610_v51  ;;  %v982_v43 = vor.u32 8388608, %v981_v52 }
 0x187   : > { %v637_v61 = vmul.f32 %v635_v28, %v635_v28  ;;  %v3606_v63 = vadd.s32 4294967169, %v978_v38  ;;  %v819_v45 = vand.u32 2147483647, %v4610_v51  ;;  %vm659_vm2 = vcmp.eq.s32.totalorder %v4618_v59, 2 }
 0x188   : > { %v2468_v39 = vadd.s32 536870912, %v2467_v11  ;;  %v823_v8 = vshrl.u32 %v822_v54, 23  ;;  %v4633_v53 = vshll.u32 %v982_v43, 8  ;;  %vm656_vm5 = vcmp.eq.s32.totalorder %v4618_v59, 0 }
 0x189   : > { %v638_v36 = vmul.f32 -0.001358992, %v637_v61  ;;  %v645_v49 = vmul.f32 -0.00019511016, %v637_v61  ;;  %v984_v57 = vadd.s32 1, %v3606_v63  ;;  %v2463_v4 = vadd.s32 %v2458_v47, %v2439_v60 }
 0x18a   : > { %v2469_v41 = vshrl.u32 %v2468_v39, 30  ;;  %v3603_v6 = vadd.s32 4294967169, %v823_v8  ;;  %vm655_vm6 = vcmp.lt.s32.totalorder %v4618_v59, 2  ;;  %v4644_v38 = vand.u32 8388607, %v819_v45 }
 0x18b   : > { %v639_v20 = vadd.f32 0.041655596, %v638_v36  ;;  %v646_v16 = vadd.f32 0.008332121, %v645_v49  ;;  %vm985_vm1 = vcmp.gt.s32.totalorder %v984_v57, 0  ;;  %vm652_vm7 = vweird.f32 %v4357_v14 }
 0x18c   : > { %v2470_v32 = vshll.u32 %v2469_v41, 30  ;;  %v2493_v55 = vsub.s32 4, %v2469_v41  ;;  %v986_v17 = vsel %vm985_vm1, %v984_v57, 0  ;;  %v829_v33 = vadd.s32 1, %v3603_v6 }
 0x18d   : > { %v640_v35 = vmul.f32 %v639_v20, %v637_v61  ;;  %v647_v12 = vmul.f32 %v646_v16, %v637_v61  ;;  %v988_v44 = vand.u32 31, %v986_v17  ;;  %v4648_v60 = vand.u32 65535, %v4633_v53 }
 0x18e   : > { %v4622_v30 = vsub.s32 %v2467_v11, %v2470_v32  ;;  %v2494_v21 = vsel %vm2371_vm0, %v2493_v55, %v2469_v41  ;;  %v4651_v47 = vshrl.u32 %v4633_v53, 16  ;;  %v4653_v54 = vshrl.u32 %v986_v17, 5 }
 0x18f   : > { %v641_v34 = vadd.f32 -0.4999988, %v640_v35  ;;  %v648_v13 = vadd.f32 -0.16666654, %v647_v12  ;;  %v2496_v50 = vsel %vm4629_vm3, 0, %v2494_v21  ;;  %v989_v52 = vsub.s32 32, %v988_v44 }
 0x190   : > { %vm2472_vm4 = vcmp.lt.s32.totalorder %v4622_v30, 0  ;;  %v2473_v19 = vsub.s32 0, %v4622_v30  ;;  %v2513_v63 = vadd.s32 3, %v2496_v50  ;;  %v991_v49 = vshll.u32 %v3817_v62, %v988_v44 }
 0x191   : > { %v642_v26 = vmul.f32 %v641_v34, %v637_v61  ;;  %v649_v40 = vmul.f32 %v648_v13, %v637_v61  ;;  %v994_v41 = vshll.u32 %v3818_v1, %v988_v44  ;;  %vm830_vm8 = vcmp.gt.s32.totalorder %v829_v33, 0 }
 0x192   : > { %v2474_v11 = vsel %vm2472_vm4, %v2473_v19, %v4622_v30  ;;  %v992_v8 = vshrl.u32 %v3818_v1, %v989_v52  ;;  %v997_v20 = vshll.u32 %v3819_v3, %v988_v44  ;;  %v995_v16 = vshrl.u32 %v3819_v3, %v989_v52 }
 0x193   : > { %v2475_v46 = vclz %v2474_v11  ;;  %v643_v39 = vadd.f32 1.0, %v642_v26  ;;  %v650_v61 = vadd.f32 1.0, %v649_v40  ;;  %v998_v32 = vshrl.u32 %v3820_v5, %v989_v52 }
 0x194   : > { %v1000_v55 = vshll.u32 %v3820_v5, %v988_v44  ;;  %v993_v21 = vor.u32 %v992_v8, %v991_v49  ;;  %v996_v13 = vor.u32 %v995_v16, %v994_v41  ;;  %v1001_v26 = vshrl.u32 %v3821_v10, %v989_v52 }
 0x195   : > { %v3634_v36 = vadd.s32 4294967294, %v2475_v46  ;;  %v651_v57 = vmul.f32 %v650_v61, %v635_v28  ;;  %v660_v43 = vxor.u32 2147483648, %v643_v39  ;;  %v999_v50 = vor.u32 %v998_v32, %v997_v20 }
 0x196   : > { %v1003_v40 = vshll.u32 %v3821_v10, %v988_v44  ;;  %v990_v41 = vshrl.u32 %v3817_v62, %v989_v52  ;;  %vm1006_vm10 = vcmp.lt.s32.totalorder %v4653_v54, 1  ;;  %vm1007_vm11 = vcmp.lt.s32.totalorder %v4653_v54, 2 }
 0x197   : > { %vm3635_vm9 = vcmp.lt.s32.totalorder %v3634_v36, 0  ;;  %v657_v6 = vxor.u32 2147483648, %v651_v57  ;;  %v661_v35 = vsel %vm659_vm2, %v660_v43, %v651_v57  ;;  %v1002_v57 = vor.u32 %v1001_v26, %v1000_v55 }
 0x198   : > { %v2478_v12 = vsel %vm3635_vm9, 0, %v3634_v36  ;;  %v6091_v36 = vmov 1326507024   ;;  %vm1008_vm12 = vcmp.lt.s32.totalorder %v4653_v54, 3  ;;  %vm1009_vm13 = vcmp.lt.s32.totalorder %v4653_v54, 4 }
 0x199   : > { %v2479_v17 = vsub.s32 32, %v2478_v12  ;;  %v2480_v28 = vshll.u32 %v4622_v30, %v2478_v12  ;;  %v2483_v34 = vsub.s32 4294967266, %v2478_v12  ;;  %v658_v19 = vsel %vm656_vm5, %v643_v39, %v657_v6 }
 0x19a   : > { %v662_v11 = vsel %vm655_vm6, %v658_v19, %v661_v35  ;;  %v1004_v49 = vshrl.u32 %v6091_v36, %v989_v52  ;;  %v831_v39 = vsel %vm830_vm8, %v829_v33, 0  ;;  %v1014_v59 = vsel %vm1006_vm10, %v993_v21, %v996_v13 }
 0x19b   : > { %v2481_v46 = vshrl.u32 %v2463_v4, %v2479_v17  ;;  %v2484_v61 = vadd.s32 127, %v2483_v34  ;;  %v663_v30 = vsel %vm652_vm7, nan, %v662_v11  ;;  %v1011_v4 = vsel %vm1009_vm13, %v999_v50, 2102212464 }
 0x19c   : > { %3454 = vst [vmem:[%s4236_s10] sm:$0xff] %v663_v30  ;;  %v1005_v20 = vor.u32 %v1004_v49, %v1003_v40  ;;  %v1015_v44 = vsel %vm1009_vm13, %v1002_v57, 920167782  ;;  %v1018_v52 = vsel %vm1006_vm10, %v996_v13, %v999_v50  ;;  %v1010_v32 = vsel %vm1006_vm10, %v990_v41, %v993_v21 }
 0x19d   : > { %v2482_v43 = vor.u32 %v2481_v46, %v2480_v28  ;;  %v2485_v8 = vshll.u32 %v2484_v61, 23  ;;  %v1016_v33 = vsel %vm1008_vm12, %v999_v50, %v1015_v44  ;;  %v1012_v35 = vsel %vm1008_vm12, %v996_v13, %v1011_v4 }
 0x19e   : > { %v1019_v55 = vsel %vm1009_vm13, %v1005_v20, 1326507024  ;;  %v1017_v12 = vsel %vm1007_vm11, %v1014_v59, %v1016_v33  ;;  %v827_v26 = vor.u32 8388608, %v4644_v38  ;;  %v4686_v11 = vand.u32 3, %v2513_v63 }
 0x19f   : > { %v2486_v14 = vor.u32 4788187, %v2485_v8  ;;  %v2489_v16 = vcvt.s32.f32 %v2482_v43  ;;  %v1020_v17 = vsel %vm1008_vm12, %v1002_v57, %v1019_v55  ;;  %v1047_v34 = vand.u32 65535, %v1017_v12 }
 0x1a0   : > { %v1021_v28 = vsel %vm1007_vm11, %v1018_v52, %v1020_v17  ;;  %v1048_v19 = vshrl.u32 %v1017_v12, 16  ;;  %v4690_v50 = vsel %vm1007_vm11, %v1010_v32, %v1012_v35  ;;  %v4694_v49 = vshrl.u32 %v831_v39, 5 }
 0x1a1   : > { %v2487_v6 = vand.u32 2147483647, %v2486_v14  ;;  %v1025_v46 = vand.u32 65535, %v1021_v28  ;;  %v1026_v21 = vshrl.u32 %v1021_v28, 16  ;;  %v1051_v61 = vmul.u32 %v1047_v34, %v4651_v47 }
 0x1a2   : > { %v1050_v13 = vmul.u32 %v1048_v19, %v4648_v60  ;;  %v833_v43 = vand.u32 31, %v831_v39  ;;  %v1049_v8 = vmul.u32 %v1047_v34, %v4648_v60  ;;  %v1052_v54 = vmul.u32 %v1048_v19, %v4651_v47 }
 0x1a3   : > { %v2490_v40 = vmul.f32 %v2489_v16, %v2487_v6  ;;  %v1028_v41 = vmul.u32 %v1026_v21, %v4648_v60  ;;  %v1029_v57 = vmul.u32 %v1025_v46, %v4651_v47  ;;  %v1027_v63 = vmul.u32 %v1025_v46, %v4648_v60 }
 0x1a4   : > { %v1053_v20 = vshll.u32 %v1050_v13, 16  ;;  %v1030_v14 = vmul.u32 %v1026_v21, %v4651_v47  ;;  %v1054_v44 = vshrl.u32 %v1050_v13, 16  ;;  %v1055_v39 = vshll.u32 %v1051_v61, 16 }
 0x1a5   : > { %v2491_v30 = vxor.u32 2147483648, %v2490_v40  ;;  %v1031_v4 = vshll.u32 %v1028_v41, 16  ;;  %v1033_v16 = vshll.u32 %v1029_v57, 16  ;;  %v4709_v12 = vsub.s32 32, %v833_v43 }
 0x1a6   : > { %vm1057_vm14 = vc.u32 %v1049_v8, %v1053_v20  ;;  %v1059_v6 = vadd.s32 %v1053_v20, %v1049_v8  ;;  %v1032_v58 = vshrl.u32 %v1028_v41, 16  ;;  %v1034_v34 = vshrl.u32 %v1029_v57, 16 }
 0x1a7   : > { %v2492_v59 = vsel %vm2371_vm0, %v2491_v30, %v2490_v40  ;;  %vm1035_vm15 = vc.u32 %v1027_v63, %v1031_v4  ;;  %v1037_v60 = vadd.s32 %v1031_v4, %v1027_v63  ;;  %v1058_v33 = vsel %vm1057_vm14, 1, %v3815_v0 }
 0x1a8   : > { %v2495_v52 = vsel %vm4629_vm3, %v4402_v56, %v2492_v59  ;;  %v1036_v55 = vsel %vm1035_vm15, 1, %v3815_v0  ;;  %v1060_v35 = vadd.s32 %v1058_v33, %v1052_v54  ;;  %vm1061_vm1 = vc.u32 %v1059_v6, %v1055_v39 }
 0x1a9   : > { %v2497_v32 = vmul.f32 %v2495_v52, %v2495_v52  ;;  %v1038_v28 = vadd.s32 %v1036_v55, %v1030_v14  ;;  %vm1039_vm0 = vc.u32 %v1037_v60, %v1033_v16  ;;  %v1062_v13 = vsel %vm1061_vm1, 1, %v3815_v0 }
 0x1aa   : > { %v1040_v19 = vsel %vm1039_vm0, 1, %v3815_v0  ;;  %v1056_v30 = vshrl.u32 %v1051_v61, 16  ;;  %v1064_v63 = vadd.s32 %v1062_v13, %v1060_v35  ;;  %v836_v8 = vshll.u32 %v3817_v62, %v833_v43 }
 0x1ab   : > { %v2498_v47 = vmul.f32 -0.001358992, %v2497_v32  ;;  %v2505_v17 = vmul.f32 -0.00019511016, %v2497_v32  ;;  %v1042_v21 = vadd.s32 %v1040_v19, %v1038_v28  ;;  %v837_v54 = vshrl.u32 %v3818_v1, %v4709_v12 }
 0x1ac   : > { %v840_v41 = vshrl.u32 %v3819_v3, %v4709_v12  ;;  %v4718_v57 = vadd.s32 %v1059_v6, %v1055_v39  ;;  %v1065_v4 = vadd.s32 %v1064_v63, %v1054_v44  ;;  %v839_v60 = vshll.u32 %v3818_v1, %v833_v43 }
 0x1ad   : > { %v2499_v40 = vadd.f32 0.041655596, %v2498_v47  ;;  %v2506_v46 = vadd.f32 0.008332121, %v2505_v17  ;;  %v1043_v14 = vadd.s32 %v1042_v21, %v1032_v58  ;;  %v4720_v16 = vor.u32 %v837_v54, %v836_v8 }
 0x1ae   : > { %v843_v35 = vshrl.u32 %v3820_v5, %v4709_v12  ;;  %v1066_v47 = vadd.s32 %v1065_v4, %v1056_v30  ;;  %v842_v17 = vshll.u32 %v3819_v3, %v833_v43  ;;  %v845_v28 = vshll.u32 %v3820_v5, %v833_v43 }
 0x1af   : > { %v2500_v20 = vmul.f32 %v2499_v40, %v2497_v32  ;;  %v2507_v59 = vmul.f32 %v2506_v46, %v2497_v32  ;;  %v4723_v55 = vadd.s32 %v1043_v14, %v1034_v34  ;;  %v846_v39 = vshrl.u32 %v3821_v10, %v4709_v12 }
 0x1b0   : > { %vm2515_vm2 = vcmp.lt.s32.totalorder %v4686_v11, 2  ;;  %v4734_v58 = vor.u32 %v840_v41, %v839_v60  ;;  %v1070_v34 = vadd.s32 1, %v1066_v47  ;;  %v848_v40 = vshll.u32 %v3821_v10, %v833_v43 }
 0x1b1   : > { %v2501_v61 = vadd.f32 -0.4999988, %v2500_v20  ;;  %v2508_v33 = vadd.f32 -0.16666654, %v2507_v59  ;;  %vm1069_vm3 = vc.u32 %v4723_v55, %v4718_v57  ;;  %v847_v19 = vor.u32 %v846_v39, %v845_v28 }
 0x1b2   : > { %v849_v46 = vshrl.u32 %v6091_v36, %v4709_v12  ;;  %v1067_v30 = vmul.u32 %v4633_v53, %v4690_v50  ;;  %vm2516_vm4 = vcmp.eq.s32.totalorder %v4686_v11, 0  ;;  %v1071_v63 = vsel %vm1069_vm3, %v1070_v34, %v1066_v47 }
 0x1b3   : > { %v2502_v44 = vmul.f32 %v2501_v61, %v2497_v32  ;;  %v2509_v6 = vmul.f32 %v2508_v33, %v2497_v32  ;;  %v844_v32 = vor.u32 %v843_v35, %v842_v17  ;;  %vm851_vm5 = vcmp.lt.s32.totalorder %v4694_v49, 1 }
 0x1b4   : > { %v850_v8 = vor.u32 %v849_v46, %v848_v40  ;;  %v1072_v59 = vadd.s32 %v1071_v63, %v1067_v30  ;;  %vm854_vm6 = vcmp.lt.s32.totalorder %v4694_v49, 4  ;;  %vm2519_vm7 = vcmp.eq.s32.totalorder %v4686_v11, 2 }
 0x1b5   : > { %v2503_v21 = vadd.f32 1.0, %v2502_v44  ;;  %v2510_v13 = vadd.f32 1.0, %v2509_v6  ;;  %vm852_vm8 = vcmp.lt.s32.totalorder %v4694_v49, 2  ;;  %v859_v53 = vsel %vm851_vm5, %v4720_v16, %v4734_v58 }
 0x1b6   : > { %v860_v50 = vsel %vm854_vm6, %v847_v19, 920167782  ;;  %v1073_v14 = vadd.s32 536870912, %v1072_v59  ;;  %vm853_vm9 = vcmp.lt.s32.totalorder %v4694_v49, 3  ;;  %v864_v60 = vsel %vm854_vm6, %v850_v8, 1326507024 }
 0x1b7   : > { %v2511_v54 = vmul.f32 %v2510_v13, %v2495_v52  ;;  %v2520_v20 = vxor.u32 2147483648, %v2503_v21  ;;  %v863_v52 = vsel %vm851_vm5, %v4734_v58, %v844_v32  ;;  %v861_v4 = vsel %vm853_vm9, %v844_v32, %v860_v50 }
 0x1b8   : > { %v4762_v61 = vshll.u32 %v827_v26, 8  ;;  %v4766_v35 = vshrl.u32 %v1073_v14, 30  ;;  %v862_v47 = vsel %vm852_vm8, %v859_v53, %v861_v4  ;;  %v865_v17 = vsel %vm853_vm9, %v847_v19, %v864_v60 }
 0x1b9   : > { %v2517_v43 = vxor.u32 2147483648, %v2511_v54  ;;  %v2521_v41 = vsel %vm2519_vm7, %v2520_v20, %v2511_v54  ;;  %vm2512_vm10 = vweird.f32 %v4402_v56  ;;  %v866_v38 = vsel %vm852_vm8, %v863_v52, %v865_v17 }
 0x1ba   : > { %v1075_v39 = vshll.u32 %v4766_v35, 30  ;;  %v869_v44 = vshrl.u32 %v4762_v61, 16  ;;  %v870_v6 = vand.u32 65535, %v866_v38  ;;  %v868_v34 = vand.u32 65535, %v4762_v61 }
 0x1bb   : > { %v2518_v33 = vsel %vm2516_vm4, %v2503_v21, %v2517_v43  ;;  %v871_v40 = vshrl.u32 %v866_v38, 16  ;;  %v893_v46 = vshrl.u32 %v862_v47, 16  ;;  %v338_v56 = vmul.f32 %v3945_v31, %v3928_v22 }
 0x1bc   : > { %v2522_v28 = vsel %vm2515_vm2, %v2518_v33, %v2521_v41  ;;  %v1076_v19 = vsub.s32 %v1072_v59, %v1075_v39  ;;  %v874_v21 = vmul.u32 %v870_v6, %v869_v44  ;;  %v348_v13 = vmul.f32 %v3945_v31, %v4530_v37 }
 0x1bd   : > { %v2523_v26 = vsel %vm2512_vm10, nan, %v2522_v28  ;;  %v873_v11 = vmul.u32 %v871_v40, %v868_v34  ;;  %v892_v63 = vand.u32 65535, %v862_v47  ;;  %v835_v8 = vshrl.u32 %v3817_v62, %v4709_v12 }
 0x1be   : > { %3466 = vst [vmem:[%s4236_s10 + $0x60] sm:$0xff] %v2523_v26  ;;  %vm1077_vm11 = vcmp.lt.s32.totalorder %v1076_v19, 0  ;;  %v1078_v30 = vsub.s32 0, %v1076_v19  ;;  %v872_v54 = vmul.u32 %v870_v6, %v868_v34  ;;  %v895_v53 = vmul.u32 %v893_v46, %v868_v34  ;;  %v374_v6 = vpop.permute.xlu1 %373 }
 0x1bf   : > { %v876_v20 = vshll.u32 %v873_v11, 16  ;;  %v1068_v59 = vadd.s32 %v4718_v57, %v4723_v55  ;;  %v875_v43 = vmul.u32 %v871_v40, %v869_v44  ;;  %v878_v14 = vshll.u32 %v874_v21, 16  ;;  %v414_v55 = vpop.permute.xlu2 %413 }
 0x1c0   : > { %v1079_v50 = vsel %vm1077_vm11, %v1078_v30, %v1076_v19  ;;  %v898_v41 = vshll.u32 %v895_v53, 16  ;;  %v855_v37 = vsel %vm851_vm5, %v835_v8, %v4720_v16  ;;  %v894_v12 = vmul.u32 %v892_v63, %v868_v34 }
 0x1c1   : > { %v1080_v22 = vclz %v1079_v50  ;;  %vm880_vm12 = vc.u32 %v872_v54, %v876_v20  ;;  %v882_v52 = vadd.s32 %v876_v20, %v872_v54  ;;  %v896_v60 = vmul.u32 %v892_v63, %v869_v44 }
 0x1c2   : > { %v881_v4 = vsel %vm880_vm12, 1, %v3815_v0  ;;  %v856_v47 = vsel %vm854_vm6, %v844_v32, 2102212464  ;;  %v877_v17 = vshrl.u32 %v873_v11, 16  ;;  %v897_v38 = vmul.u32 %v893_v46, %v869_v44 }
 0x1c3   : > { %v3607_v33 = vadd.s32 4294967294, %v1080_v22  ;;  %v883_v57 = vadd.s32 %v881_v4, %v875_v43  ;;  %vm884_vm13 = vc.u32 %v882_v52, %v878_v14  ;;  %vm902_vm14 = vc.u32 %v894_v12, %v898_v41  ;;  %v4806_v4 = vld [vmem:[%s6072_s2] ss:$0 sm:$0xff] }
 0x1c4   : > { %v885_v28 = vsel %vm884_vm13, 1, %v3815_v0  ;;  %v903_v16 = vsel %vm902_vm14, 1, %v3815_v0  ;;  %v904_v39 = vadd.s32 %v898_v41, %v894_v12  ;;  %v900_v40 = vshll.u32 %v896_v60, 16 }
 0x1c5   : > { %vm3608_vm15 = vcmp.lt.s32.totalorder %v3607_v33, 0  ;;  %v887_v26 = vadd.s32 %v885_v28, %v883_v57  ;;  %v905_v30 = vadd.s32 %v903_v16, %v897_v38  ;;  %v444_v63 = vmul.f32 %v3943_v29, %v414_v55 }
 0x1c6   : > { %v1083_v34 = vsel %vm3608_vm15, 0, %v3607_v33  ;;  %v857_v11 = vsel %vm853_vm9, %v4734_v58, %v856_v47  ;;  %v879_v44 = vshrl.u32 %v874_v21, 16  ;;  %vm906_vm0 = vc.u32 %v904_v39, %v900_v40 }
 0x1c7   : > { %v1084_v32 = vsub.s32 32, %v1083_v34  ;;  %v1088_v8 = vsub.s32 4294967266, %v1083_v34  ;;  %v888_v54 = vadd.s32 %v887_v26, %v877_v17  ;;  %v463_v46 = vadd.f32 %v444_v63, %v348_v13 }
 0x1c8   : > { %v434_v20 = vmul.f32 %v3943_v29, %v374_v6  ;;  %v1085_v50 = vshll.u32 %v1076_v19, %v1083_v34  ;;  %v907_v22 = vsel %vm906_vm0, 1, %v3815_v0  ;;  %v899_v52 = vshrl.u32 %v895_v53, 16 }
 0x1c9   : > { %v1086_v43 = vshrl.u32 %v1068_v59, %v1084_v32  ;;  %v1089_v14 = vadd.s32 127, %v1088_v8  ;;  %v909_v41 = vadd.s32 %v907_v22, %v905_v30  ;;  %v486_v58 = vadd.f32 %v4806_v4, %v463_v46 }
 0x1ca   : > { %v453_v12 = vadd.f32 %v434_v20, %v338_v56  ;;  %v1098_v13 = vsub.s32 4, %v4766_v35  ;;  %v889_v47 = vadd.s32 %v888_v54, %v879_v44  ;;  %v901_v19 = vshrl.u32 %v896_v60, 16 }
 0x1cb   : > { %v1087_v21 = vor.u32 %v1086_v43, %v1085_v50  ;;  %v1090_v33 = vshll.u32 %v1089_v14, 23  ;;  %v910_v59 = vadd.s32 %v909_v41, %v899_v52  ;;  %v4810_v57 = vmul.f32 30.0, %v486_v58 }
 0x1cc   : > { %v476_v53 = vadd.f32 %v4806_v4, %v453_v12  ;;  %vm976_vm1 = vcmp.lt.s32.totalorder %v4602_v15, 0  ;;  %v908_v17 = vadd.s32 %v904_v39, %v900_v40  ;;  %v858_v28 = vsel %vm852_vm8, %v855_v37, %v857_v11 }
 0x1cd   : > { %v1091_v55 = vor.u32 4788187, %v1090_v33  ;;  %v911_v38 = vadd.s32 %v910_v59, %v901_v19  ;;  %v2834_v56 = vand.u32 2147483647, %v4810_v57  ;;  %v2837_v26 = vand.u32 2139095040, %v4810_v57 }
 0x1ce   : > { %v1094_v6 = vcvt.s32.f32 %v1087_v21  ;;  %vm914_vm2 = vc.u32 %v889_v47, %v908_v17  ;;  %v4818_v60 = vmul.f32 30.0, %v476_v53  ;;  %v1099_v34 = vsel %vm976_vm1, %v1098_v13, %v4766_v35 }
 0x1cf   : > { %v1092_v16 = vand.u32 2147483647, %v1091_v55  ;;  %v915_v30 = vadd.s32 1, %v911_v38  ;;  %v2838_v63 = vshrl.u32 %v2837_v26, 23  ;;  %v2841_v49 = vand.u32 8388607, %v2834_v56 }
 0x1d0   : > { %v912_v39 = vmul.u32 %v4762_v61, %v858_v28  ;;  %vm975_vm3 = vcmp.le.f32.partialorder %v974_v9, 0.7853982  ;;  %v1287_v44 = vand.u32 2139095040, %v4818_v60  ;;  %v6077_v20 = vand.u32 2147483647, %v4818_v60 }
 0x1d1   : > { %v1095_v37 = vmul.f32 %v1094_v6, %v1092_v16  ;;  %v916_v40 = vsel %vm914_vm2, %v915_v30, %v911_v38  ;;  %v3642_v32 = vadd.s32 4294967169, %v2838_v63  ;;  %v1101_v11 = vsel %vm975_vm3, 0, %v1099_v34 }
 0x1d2   : > { %v917_v54 = vadd.s32 %v916_v40, %v912_v39  ;;  %v2842_v46 = vor.u32 8388608, %v2841_v49  ;;  %v1118_v14 = vadd.s32 3, %v1101_v11  ;;  %v1288_v41 = vshrl.u32 %v1287_v44, 23 }
 0x1d3   : > { %v1096_v8 = vxor.u32 2147483648, %v1095_v37  ;;  %v2844_v35 = vadd.s32 1, %v3642_v32  ;;  %vm4839_vm5 = vcmp.le.f32.partialorder %v819_v45, 0.7853982  ;;  %v4847_v33 = vand.u32 8388607, %v6077_v20 }
 0x1d4   : > { %v918_v43 = vadd.s32 536870912, %v917_v54  ;;  %v4843_v21 = vshll.u32 %v2842_v46, 8  ;;  %vm821_vm6 = vcmp.lt.s32.totalorder %v4610_v51, 0  ;;  %v4850_v53 = vand.u32 3, %v1118_v14 }
 0x1d5   : > { %v1097_v50 = vsel %vm976_vm1, %v1096_v8, %v1095_v37  ;;  %vm2845_vm4 = vcmp.gt.s32.totalorder %v2844_v35, 0  ;;  %v913_v55 = vadd.s32 %v908_v17, %v889_v47  ;;  %v4854_v6 = vadd.s32 4294967169, %v1288_v41 }
 0x1d6   : > { %v4833_v61 = vsel %vm975_vm3, %v4602_v15, %v1097_v50  ;;  %v919_v22 = vshrl.u32 %v918_v43, 30  ;;  %v2846_v52 = vsel %vm2845_vm4, %v2844_v35, 0  ;;  %v4859_v30 = vand.u32 65535, %v4843_v21 }
 0x1d7   : > { %v1102_v9 = vmul.f32 %v4833_v61, %v4833_v61  ;;  %v2848_v12 = vand.u32 31, %v2846_v52  ;;  %v4856_v34 = vshrl.u32 %v2846_v52, 5  ;;  %v4862_v63 = vshrl.u32 %v4843_v21, 16 }
 0x1d8   : > { %v920_v59 = vshll.u32 %v919_v22, 30  ;;  %v943_v28 = vsub.s32 4, %v919_v22  ;;  %v1292_v49 = vor.u32 8388608, %v4847_v33  ;;  %vm1124_vm8 = vcmp.eq.s32.totalorder %v4850_v53, 2 }
 0x1d9   : > { %v1103_v13 = vmul.f32 -0.001358992, %v1102_v9  ;;  %v1110_v19 = vmul.f32 -0.00019511016, %v1102_v9  ;;  %v2849_v45 = vsub.s32 32, %v2848_v12  ;;  %v2851_v40 = vshll.u32 %v3817_v62, %v2848_v12 }
 0x1da   : > { %v4852_v16 = vsub.s32 %v917_v54, %v920_v59  ;;  %v4869_v39 = vsel %vm821_vm6, %v943_v28, %v919_v22  ;;  %v2854_v8 = vshll.u32 %v3818_v1, %v2848_v12  ;;  %vm1121_vm9 = vcmp.eq.s32.totalorder %v4850_v53, 0 }
 0x1db   : > { %v1104_v38 = vadd.f32 0.041655596, %v1103_v13  ;;  %v1111_v26 = vadd.f32 0.008332121, %v1110_v19  ;;  %v2852_v32 = vshrl.u32 %v3818_v1, %v2849_v45  ;;  %v2855_v46 = vshrl.u32 %v3819_v3, %v2849_v45 }
 0x1dc   : > { %vm922_vm7 = vcmp.lt.s32.totalorder %v4852_v16, 0  ;;  %v923_v17 = vsub.s32 0, %v4852_v16  ;;  %v2857_v50 = vshll.u32 %v3819_v3, %v2848_v12  ;;  %v2858_v43 = vshrl.u32 %v3820_v5, %v2849_v45 }
 0x1dd   : > { %v1105_v37 = vmul.f32 %v1104_v38, %v1102_v9  ;;  %v1112_v47 = vmul.f32 %v1111_v26, %v1102_v9  ;;  %v2861_v14 = vshrl.u32 %v3821_v10, %v2849_v45  ;;  %vm1120_vm10 = vcmp.lt.s32.totalorder %v4850_v53, 2 }
 0x1de   : > { %v924_v44 = vsel %vm922_vm7, %v923_v17, %v4852_v16  ;;  %v946_v41 = vsel %vm4839_vm5, 0, %v4869_v39  ;;  %v2864_v13 = vshrl.u32 %v6091_v36, %v2849_v45  ;;  %vm1117_vm11 = vweird.f32 %v4602_v15 }
 0x1df   : > { %v1106_v11 = vadd.f32 -0.4999988, %v1105_v37  ;;  %v1113_v54 = vadd.f32 -0.16666654, %v1112_v47  ;;  %v925_v35 = vclz %v924_v44  ;;  %v2850_v59 = vshrl.u32 %v3817_v62, %v2849_v45 }
 0x1e0   : > { %v2860_v28 = vshll.u32 %v3820_v5, %v2848_v12  ;;  %v2863_v38 = vshll.u32 %v3821_v10, %v2848_v12  ;;  %v2856_v47 = vor.u32 %v2855_v46, %v2854_v8  ;;  %v2859_v17 = vor.u32 %v2858_v43, %v2857_v50 }
 0x1e1   : > { %v1107_v22 = vmul.f32 %v1106_v11, %v1102_v9  ;;  %v1114_v52 = vmul.f32 %v1113_v54, %v1102_v9  ;;  %v3604_v19 = vadd.s32 4294967294, %v925_v35  ;;  %v2853_v9 = vor.u32 %v2852_v32, %v2851_v40 }
 0x1e2   : > { %v2862_v11 = vor.u32 %v2861_v14, %v2860_v28  ;;  %v2865_v54 = vor.u32 %v2864_v13, %v2863_v38  ;;  %vm2866_vm13 = vcmp.lt.s32.totalorder %v4856_v34, 1  ;;  %vm2867_vm14 = vcmp.lt.s32.totalorder %v4856_v34, 2 }
 0x1e3   : > { %v1108_v26 = vadd.f32 1.0, %v1107_v22  ;;  %v1115_v37 = vadd.f32 1.0, %v1114_v52  ;;  %vm3605_vm12 = vcmp.lt.s32.totalorder %v3604_v19, 0  ;;  %vm2868_vm15 = vcmp.lt.s32.totalorder %v4856_v34, 3 }
 0x1e4   : > { %v928_v20 = vsel %vm3605_vm12, 0, %v3604_v19  ;;  %vm2869_vm0 = vcmp.lt.s32.totalorder %v4856_v34, 4  ;;  %v2874_v32 = vsel %vm2866_vm13, %v2853_v9, %v2856_v47 }
 0x1e5   : > { %v1116_v39 = vmul.f32 %v1115_v37, %v4833_v61  ;;  %v1125_v44 = vxor.u32 2147483648, %v1108_v26  ;;  %v929_v35 = vsub.s32 32, %v928_v20  ;;  %v933_v45 = vsub.s32 4294967266, %v928_v20 }
 0x1e6   : > { %v930_v40 = vshll.u32 %v4852_v16, %v928_v20  ;;  %v2875_v50 = vsel %vm2869_vm0, %v2862_v11, 920167782  ;;  %v2871_v14 = vsel %vm2869_vm0, %v2859_v17, 2102212464  ;;  %v2878_v20 = vsel %vm2866_vm13, %v2856_v47, %v2859_v17 }
 0x1e7   : > { %v1122_v12 = vxor.u32 2147483648, %v1116_v39  ;;  %v1126_v61 = vsel %vm1124_vm8, %v1125_v44, %v1116_v39  ;;  %v931_v8 = vshrl.u32 %v913_v55, %v929_v35  ;;  %v934_v46 = vadd.s32 127, %v933_v45 }
 0x1e8   : > { %v2876_v22 = vsel %vm2868_vm15, %v2859_v17, %v2875_v50  ;;  %v2879_v28 = vsel %vm2869_vm0, %v2865_v54, 1326507024  ;;  %v2870_v39 = vsel %vm2866_vm13, %v2850_v59, %v2853_v9  ;;  %v2872_v53 = vsel %vm2868_vm15, %v2856_v47, %v2871_v14 }
 0x1e9   : > { %v1123_v43 = vsel %vm1121_vm9, %v1108_v26, %v1122_v12  ;;  %v932_v52 = vor.u32 %v931_v8, %v930_v40  ;;  %v935_v13 = vshll.u32 %v934_v46, 23  ;;  %v2877_v55 = vsel %vm2867_vm14, %v2874_v32, %v2876_v22 }
 0x1ea   : > { %v1127_v16 = vsel %vm1120_vm10, %v1123_v43, %v1126_v61  ;;  %v2907_v38 = vand.u32 65535, %v2877_v55  ;;  %v2908_v26 = vshrl.u32 %v2877_v55, 16  ;;  %v2880_v17 = vsel %vm2868_vm15, %v2862_v11, %v2879_v28 }
 0x1eb   : > { %v1128_v19 = vsel %vm1117_vm11, nan, %v1127_v16  ;;  %v936_v37 = vor.u32 4788187, %v935_v13  ;;  %v2881_v44 = vsel %vm2867_vm14, %v2878_v20, %v2880_v17  ;;  %v1294_v35 = vadd.s32 1, %v4854_v6 }
 0x1ec   : > { %3457 = vst [vmem:[%s4236_s10 + $0x18] sm:$0xff] %v1128_v19  ;;  %v2910_v15 = vmul.u32 %v2908_v26, %v4859_v30  ;;  %v2911_v54 = vmul.u32 %v2907_v38, %v4862_v63  ;;  %v939_v12 = vcvt.s32.f32 %v932_v52  ;;  %v2885_v40 = vand.u32 65535, %v2881_v44 }
 0x1ed   : > { %v937_v45 = vand.u32 2147483647, %v936_v37  ;;  %v2886_v32 = vshrl.u32 %v2881_v44, 16  ;;  %v4924_v59 = vadd.s32 3, %v946_v41  ;;  %v4928_v9 = vsel %vm2867_vm14, %v2870_v39, %v2872_v53 }
 0x1ee   : > { %v2909_v47 = vmul.u32 %v2907_v38, %v4859_v30  ;;  %v2913_v11 = vshll.u32 %v2910_v15, 16  ;;  %v2889_v46 = vmul.u32 %v2885_v40, %v4862_v63  ;;  %v2912_v6 = vmul.u32 %v2908_v26, %v4862_v63 }
 0x1ef   : > { %v940_v61 = vmul.f32 %v939_v12, %v937_v45  ;;  %v2888_v8 = vmul.u32 %v2886_v32, %v4859_v30  ;;  %v2914_v50 = vshrl.u32 %v2910_v15, 16  ;;  %v2915_v43 = vshll.u32 %v2911_v54, 16 }
 0x1f0   : > { %vm2917_vm1 = vc.u32 %v2909_v47, %v2913_v11  ;;  %v2919_v14 = vadd.s32 %v2913_v11, %v2909_v47  ;;  %v2887_v22 = vmul.u32 %v2885_v40, %v4859_v30  ;;  %vm1295_vm2 = vcmp.gt.s32.totalorder %v1294_v35, 0 }
 0x1f1   : > { %v941_v41 = vxor.u32 2147483648, %v940_v61  ;;  %v2891_v34 = vshll.u32 %v2888_v8, 16  ;;  %v2890_v20 = vmul.u32 %v2886_v32, %v4862_v63  ;;  %v2893_v16 = vshll.u32 %v2889_v46, 16 }
 0x1f2   : > { %v2918_v52 = vsel %vm2917_vm1, 1, %v3815_v0  ;;  %vm2921_vm3 = vc.u32 %v2919_v14, %v2915_v43  ;;  %v1296_v26 = vsel %vm1295_vm2, %v1294_v35, 0  ;;  %v2892_v53 = vshrl.u32 %v2888_v8, 16 }
 0x1f3   : > { %v942_v13 = vsel %vm821_vm6, %v941_v41, %v940_v61  ;;  %vm2895_vm4 = vc.u32 %v2887_v22, %v2891_v34  ;;  %v2897_v55 = vadd.s32 %v2891_v34, %v2887_v22  ;;  %v2920_v19 = vadd.s32 %v2918_v52, %v2912_v6 }
 0x1f4   : > { %v945_v28 = vsel %vm4839_vm5, %v4610_v51, %v942_v13  ;;  %v2896_v30 = vsel %vm2895_vm4, 1, %v3815_v0  ;;  %v2922_v38 = vsel %vm2921_vm3, 1, %v3815_v0  ;;  %v2916_v44 = vshrl.u32 %v2911_v54, 16 }
 0x1f5   : > { %v947_v63 = vmul.f32 %v945_v28, %v945_v28  ;;  %v2898_v37 = vadd.s32 %v2896_v30, %v2890_v20  ;;  %vm2899_vm7 = vc.u32 %v2897_v55, %v2893_v16  ;;  %v2924_v39 = vadd.s32 %v2922_v38, %v2920_v19 }
 0x1f6   : > { %v2900_v17 = vsel %vm2899_vm7, 1, %v3815_v0  ;;  %v1298_v15 = vand.u32 31, %v1296_v26  ;;  %v2894_v58 = vshrl.u32 %v2889_v46, 16  ;;  %v4945_v47 = vadd.s32 %v2919_v14, %v2915_v43 }
 0x1f7   : > { %v948_v45 = vmul.f32 -0.001358992, %v947_v63  ;;  %v955_v12 = vmul.f32 -0.00019511016, %v947_v63  ;;  %v2902_v40 = vadd.s32 %v2900_v17, %v2898_v37  ;;  %v2925_v32 = vadd.s32 %v2924_v39, %v2914_v50 }
 0x1f8   : > { %v2927_v11 = vmul.u32 %v4843_v21, %v4928_v9  ;;  %v4949_v35 = vsub.s32 32, %v1298_v15  ;;  %v4951_v22 = vshrl.u32 %v1296_v26, 5  ;;  %v1301_v54 = vshll.u32 %v3817_v62, %v1298_v15 }
 0x1f9   : > { %v949_v61 = vadd.f32 0.041655596, %v948_v45  ;;  %v956_v6 = vadd.f32 0.008332121, %v955_v12  ;;  %v2903_v41 = vadd.s32 %v2902_v40, %v2892_v53  ;;  %v2926_v8 = vadd.s32 %v2925_v32, %v2916_v44 }
 0x1fa   : > { %v1302_v34 = vshrl.u32 %v3818_v1, %v4949_v35  ;;  %v1305_v46 = vshrl.u32 %v3819_v3, %v4949_v35  ;;  %v1304_v20 = vshll.u32 %v3818_v1, %v1298_v15  ;;  %v1307_v16 = vshll.u32 %v3819_v3, %v1298_v15 }
 0x1fb   : > { %v950_v50 = vmul.f32 %v949_v61, %v947_v63  ;;  %v957_v43 = vmul.f32 %v956_v6, %v947_v63  ;;  %v4958_v14 = vadd.s32 %v2903_v41, %v2894_v58  ;;  %v2930_v21 = vadd.s32 1, %v2926_v8 }
 0x1fc   : > { %v4960_v9 = vor.u32 %v1302_v34, %v1301_v54  ;;  %v1308_v52 = vshrl.u32 %v3820_v5, %v4949_v35  ;;  %v1310_v19 = vshll.u32 %v3820_v5, %v1298_v15  ;;  %v1311_v38 = vshrl.u32 %v3821_v10, %v4949_v35 }
 0x1fd   : > { %v951_v13 = vadd.f32 -0.4999988, %v950_v50  ;;  %v958_v55 = vadd.f32 -0.16666654, %v957_v43  ;;  %vm2929_vm5 = vc.u32 %v4958_v14, %v4945_v47  ;;  %v1313_v26 = vshll.u32 %v3821_v10, %v1298_v15 }
 0x1fe   : > { %v2931_v30 = vsel %vm2929_vm5, %v2930_v21, %v2926_v8  ;;  %v1314_v37 = vshrl.u32 %v6091_v36, %v4949_v35  ;;  %v4974_v44 = vor.u32 %v1305_v46, %v1304_v20  ;;  %vm962_vm6 = vweird.f32 %v4610_v51 }
 0x1ff   : > { %v952_v39 = vmul.f32 %v951_v13, %v947_v63  ;;  %v959_v53 = vmul.f32 %v958_v55, %v947_v63  ;;  %v2932_v17 = vadd.s32 %v2931_v30, %v2927_v11  ;;  %v964_v45 = vand.u32 3, %v4924_v59 }
 0x200   : > { %v4978_v12 = vor.u32 %v1308_v52, %v1307_v16  ;;  %v1312_v40 = vor.u32 %v1311_v38, %v1310_v19  ;;  %v1315_v32 = vor.u32 %v1314_v37, %v1313_v26  ;;  %vm1319_vm8 = vcmp.lt.s32.totalorder %v4951_v22, 4 }
 0x201   : > { %v953_v58 = vadd.f32 1.0, %v952_v39  ;;  %v960_v61 = vadd.f32 1.0, %v959_v53  ;;  %v2933_v6 = vadd.s32 536870912, %v2932_v17  ;;  %vm1316_vm9 = vcmp.lt.s32.totalorder %v4951_v22, 1 }
 0x202   : > { %vm1318_vm10 = vcmp.lt.s32.totalorder %v4951_v22, 3  ;;  %v1325_v63 = vsel %vm1319_vm8, %v1312_v40, 920167782  ;;  %v4987_v15 = vshll.u32 %v1292_v49, 8  ;;  %v1324_v8 = vsel %vm1316_vm9, %v4960_v9, %v4974_v44 }
 0x203   : > { %v961_v59 = vmul.f32 %v960_v61, %v945_v28  ;;  %v970_v11 = vxor.u32 2147483648, %v953_v58  ;;  %v4989_v41 = vshrl.u32 %v2933_v6, 30  ;;  %vm965_vm11 = vcmp.lt.s32.totalorder %v964_v45, 2 }
 0x204   : > { %v1326_v54 = vsel %vm1318_vm10, %v4978_v12, %v1325_v63  ;;  %v1328_v33 = vsel %vm1316_vm9, %v4974_v44, %v4978_v12  ;;  %v1329_v49 = vsel %vm1319_vm8, %v1315_v32, 1326507024  ;;  %vm969_vm12 = vcmp.eq.s32.totalorder %v964_v45, 2 }
 0x205   : > { %v967_v28 = vxor.u32 2147483648, %v961_v59  ;;  %v2935_v34 = vshll.u32 %v4989_v41, 30  ;;  %vm1317_vm13 = vcmp.lt.s32.totalorder %v4951_v22, 2  ;;  %vm966_vm14 = vcmp.eq.s32.totalorder %v964_v45, 0 }
 0x206   : > { %v971_v46 = vsel %vm969_vm12, %v970_v11, %v961_v59  ;;  %v1327_v50 = vsel %vm1317_vm13, %v1324_v8, %v1326_v54  ;;  %v1330_v43 = vsel %vm1318_vm10, %v1312_v40, %v1329_v49  ;;  %v1333_v52 = vand.u32 65535, %v4987_v15 }
 0x207   : > { %v968_v21 = vsel %vm966_vm14, %v953_v58, %v967_v28  ;;  %v2936_v20 = vsub.s32 %v2932_v17, %v2935_v34  ;;  %v1331_v16 = vsel %vm1317_vm13, %v1328_v33, %v1330_v43  ;;  %v1334_v55 = vshrl.u32 %v4987_v15, 16 }
 0x208   : > { %v972_v13 = vsel %vm965_vm11, %v968_v21, %v971_v46  ;;  %v1335_v19 = vand.u32 65535, %v1331_v16  ;;  %v1336_v30 = vshrl.u32 %v1331_v16, 16  ;;  %v1357_v17 = vand.u32 65535, %v1327_v50 }
 0x209   : > { %v973_v38 = vsel %vm962_vm6, nan, %v972_v13  ;;  %vm2937_vm15 = vcmp.lt.s32.totalorder %v2936_v20, 0  ;;  %v2938_v26 = vsub.s32 0, %v2936_v20  ;;  %v1358_v40 = vshrl.u32 %v1327_v50, 16 }
 0x20a   : > { %3456 = vst [vmem:[%s4236_s10 + $0x10] sm:$0xff] %v973_v38  ;;  %v1338_v37 = vmul.u32 %v1336_v30, %v1333_v52  ;;  %v1339_v39 = vmul.u32 %v1335_v19, %v1334_v55  ;;  %v1337_v58 = vmul.u32 %v1335_v19, %v1333_v52  ;;  %v340_v45 = vmul.f32 %v3945_v31, %v4135_v18 }
 0x20b   : > { %v2939_v53 = vsel %vm2937_vm15, %v2938_v26, %v2936_v20  ;;  %v351_v6 = vmul.f32 %v3945_v31, %v4571_v48  ;;  %v1300_v51 = vshrl.u32 %v3817_v62, %v4949_v35  ;;  %v1340_v63 = vmul.u32 %v1336_v30, %v1334_v55 }
 0x20c   : > { %v2940_v32 = vclz %v2939_v53  ;;  %v1341_v61 = vshll.u32 %v1338_v37, 16  ;;  %v1343_v11 = vshll.u32 %v1339_v39, 16  ;;  %v2928_v54 = vadd.s32 %v4945_v47, %v4958_v14  ;;  %v382_v53 = vpop.permute.xlu0 %381 }
 0x20d   : > { %v1360_v49 = vmul.u32 %v1358_v40, %v1333_v52  ;;  %v1361_v28 = vmul.u32 %v1357_v17, %v1334_v55  ;;  %v1342_v18 = vshrl.u32 %v1338_v37, 16  ;;  %v1359_v35 = vmul.u32 %v1357_v17, %v1333_v52 }
 0x20e   : > { %v3643_v59 = vadd.s32 4294967294, %v2940_v32  ;;  %vm1345_vm0 = vc.u32 %v1337_v58, %v1341_v61  ;;  %v1347_v8 = vadd.s32 %v1341_v61, %v1337_v58  ;;  %v1362_v13 = vmul.u32 %v1358_v40, %v1334_v55  ;;  %v426_v32 = vpop.permute.xlu2 %425 }
 0x20f   : > { %v1346_v33 = vsel %vm1345_vm0, 1, %v3815_v0  ;;  %v1363_v50 = vshll.u32 %v1360_v49, 16  ;;  %v1365_v30 = vshll.u32 %v1361_v28, 16  ;;  %v1320_v52 = vsel %vm1316_vm9, %v1300_v51, %v4960_v9 }
 0x210   : > { %vm3644_vm1 = vcmp.lt.s32.totalorder %v3643_v59, 0  ;;  %v1348_v34 = vadd.s32 %v1346_v33, %v1340_v63  ;;  %vm1349_vm2 = vc.u32 %v1347_v8, %v1343_v11  ;;  %v1321_v17 = vsel %vm1319_vm8, %v4978_v12, 2102212464 }
 0x211   : > { %v2943_v48 = vsel %vm3644_vm1, 0, %v3643_v59  ;;  %v1350_v46 = vsel %vm1349_vm2, 1, %v3815_v0  ;;  %vm1367_vm3 = vc.u32 %v1359_v35, %v1363_v50  ;;  %v1369_v47 = vadd.s32 %v1363_v50, %v1359_v35 }
 0x212   : > { %v2944_v43 = vsub.s32 32, %v2943_v48  ;;  %v2948_v21 = vsub.s32 4294967266, %v2943_v48  ;;  %v1352_v16 = vadd.s32 %v1350_v46, %v1348_v34  ;;  %v2945_v19 = vshll.u32 %v2936_v20, %v2943_v48 }
 0x213   : > { %v1368_v37 = vsel %vm1367_vm3, 1, %v3815_v0  ;;  %vm1371_vm4 = vc.u32 %v1369_v47, %v1365_v30  ;;  %v1344_v58 = vshrl.u32 %v1339_v39, 16  ;;  %v1364_v63 = vshrl.u32 %v1360_v49, 16 }
 0x214   : > { %v2946_v14 = vshrl.u32 %v2928_v54, %v2944_v43  ;;  %v2949_v38 = vadd.s32 127, %v2948_v21  ;;  %v1353_v26 = vadd.s32 %v1352_v16, %v1342_v18  ;;  %v1370_v55 = vadd.s32 %v1368_v37, %v1362_v13 }
 0x215   : > { %v1372_v61 = vsel %vm1371_vm4, 1, %v3815_v0  ;;  %v436_v11 = vmul.f32 %v3943_v29, %v382_v53  ;;  %v447_v8 = vmul.f32 %v3943_v29, %v426_v32  ;;  %v2958_v9 = vsub.s32 4, %v4989_v41 }
 0x216   : > { %v2947_v20 = vor.u32 %v2946_v14, %v2945_v19  ;;  %v2950_v40 = vshll.u32 %v2949_v38, 23  ;;  %v1374_v59 = vadd.s32 %v1372_v61, %v1370_v55  ;;  %v1322_v12 = vsel %vm1318_vm10, %v4974_v44, %v1321_v17 }
 0x217   : > { %v5042_v51 = vadd.s32 %v1353_v26, %v1344_v58  ;;  %v1366_v33 = vshrl.u32 %v1361_v28, 16  ;;  %v455_v39 = vadd.f32 %v436_v11, %v340_v45  ;;  %v466_v34 = vadd.f32 %v447_v8, %v351_v6 }
 0x218   : > { %v2951_v54 = vor.u32 4788187, %v2950_v40  ;;  %v1375_v18 = vadd.s32 %v1374_v59, %v1364_v63  ;;  %v2954_v49 = vcvt.s32.f32 %v2947_v20  ;;  %v5044_v46 = vadd.s32 %v1369_v47, %v1365_v30 }
 0x219   : > { %v1323_v35 = vsel %vm1317_vm13, %v1320_v52, %v1322_v12  ;;  %v478_v43 = vadd.f32 %v4806_v4, %v455_v39  ;;  %v489_v21 = vadd.f32 %v4806_v4, %v466_v34  ;;  %vm2836_vm7 = vcmp.lt.s32.totalorder %v4810_v57, 0 }
 0x21a   : > { %v2952_v48 = vand.u32 2147483647, %v2951_v54  ;;  %v1376_v50 = vadd.s32 %v1375_v18, %v1366_v33  ;;  %vm1379_vm5 = vc.u32 %v5042_v51, %v5044_v46  ;;  %v2959_v45 = vsel %vm2836_vm7, %v2958_v9, %v4989_v41 }
 0x21b   : > { %v5054_v28 = vmul.f32 30.0, %v478_v43  ;;  %vm2835_vm6 = vcmp.le.f32.partialorder %v2834_v56, 0.7853982  ;;  %v1377_v16 = vmul.u32 %v4987_v15, %v1323_v35  ;;  %v5061_v30 = vmul.f32 30.0, %v489_v21 }
 0x21c   : > { %v2955_v44 = vmul.f32 %v2954_v49, %v2952_v48  ;;  %v1380_v6 = vadd.s32 1, %v1376_v50  ;;  %v2961_v14 = vsel %vm2835_vm6, 0, %v2959_v45  ;;  %vm1286_vm8 = vcmp.lt.s32.totalorder %v4818_v60, 0 }
 0x21d   : > { %v1594_v4 = vand.u32 2147483647, %v5054_v28  ;;  %v1597_v19 = vand.u32 2139095040, %v5054_v28  ;;  %v2978_v32 = vadd.s32 3, %v2961_v14  ;;  %v3302_v52 = vand.u32 2139095040, %v5061_v30 }
 0x21e   : > { %v2956_v22 = vxor.u32 2147483648, %v2955_v44  ;;  %v1381_v13 = vsel %vm1379_vm5, %v1380_v6, %v1376_v50  ;;  %v3299_v61 = vand.u32 2147483647, %v5061_v30  ;;  %v6094_v48 = vand.u32 2147483647, %v4818_v60 }
 0x21f   : > { %v1382_v38 = vadd.s32 %v1381_v13, %v1377_v16  ;;  %v1598_v26 = vshrl.u32 %v1597_v19, 23  ;;  %v1601_v37 = vand.u32 8388607, %v1594_v4  ;;  %v3303_v63 = vshrl.u32 %v3302_v52, 23 }
 0x220   : > { %v2957_v47 = vsel %vm2836_vm7, %v2956_v22, %v2955_v44  ;;  %v2979_v9 = vand.u32 3, %v2978_v32  ;;  %vm5075_vm10 = vcmp.le.f32.partialorder %v6094_v48, 0.7853982  ;;  %v5083_v43 = vand.u32 8388607, %v3299_v61 }
 0x221   : > { %v2960_v41 = vsel %vm2835_vm6, %v4810_v57, %v2957_v47  ;;  %v1383_v53 = vadd.s32 536870912, %v1382_v38  ;;  %v3618_v15 = vadd.s32 4294967169, %v1598_v26  ;;  %v1602_v40 = vor.u32 8388608, %v1601_v37 }
 0x222   : > { %v2962_v56 = vmul.f32 %v2960_v41, %v2960_v41  ;;  %v3651_v12 = vadd.s32 4294967169, %v3303_v63  ;;  %vm2981_vm12 = vcmp.eq.s32.totalorder %v2979_v9, 0  ;;  %vm2984_vm13 = vcmp.eq.s32.totalorder %v2979_v9, 2 }
 0x223   : > { %v1384_v20 = vshrl.u32 %v1383_v53, 30  ;;  %v1604_v58 = vadd.s32 1, %v3618_v15  ;;  %v5079_v50 = vshll.u32 %v1602_v40, 8  ;;  %vm2980_vm14 = vcmp.lt.s32.totalorder %v2979_v9, 2 }
 0x224   : > { %v2963_v17 = vmul.f32 -0.001358992, %v2962_v56  ;;  %v2970_v55 = vmul.f32 -0.00019511016, %v2962_v56  ;;  %v3309_v16 = vadd.s32 1, %v3651_v12  ;;  %v1378_v47 = vadd.s32 %v5044_v46, %v5042_v51 }
 0x225   : > { %v1385_v8 = vshll.u32 %v1384_v20, 30  ;;  %v1408_v54 = vsub.s32 4, %v1384_v20  ;;  %vm1605_vm9 = vcmp.gt.s32.totalorder %v1604_v58, 0  ;;  %vm2977_vm15 = vweird.f32 %v4810_v57 }
 0x226   : > { %v2964_v59 = vadd.f32 0.041655596, %v2963_v17  ;;  %v2971_v11 = vadd.f32 0.008332121, %v2970_v55  ;;  %v1606_v35 = vsel %vm1605_vm9, %v1604_v58, 0  ;;  %v5094_v37 = vand.u32 65535, %v5079_v50 }
 0x227   : > { %v5069_v39 = vsub.s32 %v1382_v38, %v1385_v8  ;;  %v1409_v34 = vsel %vm1286_vm8, %v1408_v54, %v1384_v20  ;;  %v1608_v22 = vand.u32 31, %v1606_v35  ;;  %v3307_v53 = vor.u32 8388608, %v5083_v43 }
 0x228   : > { %v2965_v33 = vmul.f32 %v2964_v59, %v2962_v56  ;;  %v2972_v18 = vmul.f32 %v2971_v11, %v2962_v56  ;;  %v1411_v6 = vsel %vm5075_vm10, 0, %v1409_v34  ;;  %v5097_v17 = vshrl.u32 %v1606_v35, 5 }
 0x229   : > { %vm1387_vm11 = vcmp.lt.s32.totalorder %v5069_v39, 0  ;;  %v1388_v45 = vsub.s32 0, %v5069_v39  ;;  %v1609_v26 = vsub.s32 32, %v1608_v22  ;;  %v1428_v52 = vadd.s32 3, %v1411_v6 }
 0x22a   : > { %v2966_v21 = vadd.f32 -0.4999988, %v2965_v33  ;;  %v2973_v44 = vadd.f32 -0.16666654, %v2972_v18  ;;  %v1611_v55 = vshll.u32 %v3817_v62, %v1608_v22  ;;  %v1614_v51 = vshll.u32 %v3818_v1, %v1608_v22 }
 0x22b   : > { %v1389_v14 = vsel %vm1387_vm11, %v1388_v45, %v5069_v39  ;;  %vm3310_vm0 = vcmp.gt.s32.totalorder %v3309_v16, 0  ;;  %v1612_v40 = vshrl.u32 %v3818_v1, %v1609_v26  ;;  %v1617_v58 = vshll.u32 %v3819_v3, %v1608_v22 }
 0x22c   : > { %v2967_v13 = vmul.f32 %v2966_v21, %v2962_v56  ;;  %v2974_v19 = vmul.f32 %v2973_v44, %v2962_v56  ;;  %v1390_v38 = vclz %v1389_v14  ;;  %v1615_v63 = vshrl.u32 %v3819_v3, %v1609_v26 }
 0x22d   : > { %v1618_v59 = vshrl.u32 %v3820_v5, %v1609_v26  ;;  %v1620_v11 = vshll.u32 %v3820_v5, %v1608_v22  ;;  %v1613_v33 = vor.u32 %v1612_v40, %v1611_v55  ;;  %v1621_v44 = vshrl.u32 %v3821_v10, %v1609_v26 }
 0x22e   : > { %v2968_v32 = vadd.f32 1.0, %v2967_v13  ;;  %v2975_v15 = vadd.f32 1.0, %v2974_v19  ;;  %v3613_v56 = vadd.s32 4294967294, %v1390_v38  ;;  %v1616_v48 = vor.u32 %v1615_v63, %v1614_v51 }
 0x22f   : > { %v1619_v21 = vor.u32 %v1618_v59, %v1617_v58  ;;  %v1623_v45 = vshll.u32 %v3821_v10, %v1608_v22  ;;  %v1624_v14 = vshrl.u32 %v6091_v36, %v1609_v26  ;;  %vm1626_vm2 = vcmp.lt.s32.totalorder %v5097_v17, 1 }
 0x230   : > { %v2976_v46 = vmul.f32 %v2975_v15, %v2960_v41  ;;  %v2985_v20 = vxor.u32 2147483648, %v2968_v32  ;;  %vm3614_vm1 = vcmp.lt.s32.totalorder %v3613_v56, 0  ;;  %v1622_v15 = vor.u32 %v1621_v44, %v1620_v11 }
 0x231   : > { %v1393_v12 = vsel %vm3614_vm1, 0, %v3613_v56  ;;  %v3311_v56 = vsel %vm3310_vm0, %v3309_v16, 0  ;;  %v1625_v51 = vor.u32 %v1624_v14, %v1623_v45  ;;  %vm1627_vm3 = vcmp.lt.s32.totalorder %v5097_v17, 2 }
 0x232   : > { %v2982_v8 = vxor.u32 2147483648, %v2976_v46  ;;  %v2986_v54 = vsel %vm2984_vm13, %v2985_v20, %v2976_v46  ;;  %v1394_v18 = vsub.s32 32, %v1393_v12  ;;  %v1395_v41 = vshll.u32 %v5069_v39, %v1393_v12 }
 0x233   : > { %v1398_v34 = vsub.s32 4294967266, %v1393_v12  ;;  %v1610_v39 = vshrl.u32 %v3817_v62, %v1609_v26  ;;  %vm1628_vm4 = vcmp.lt.s32.totalorder %v5097_v17, 3  ;;  %vm1629_vm7 = vcmp.lt.s32.totalorder %v5097_v17, 4 }
 0x234   : > { %v2983_v35 = vsel %vm2981_vm12, %v2968_v32, %v2982_v8  ;;  %v1396_v13 = vshrl.u32 %v1378_v47, %v1394_v18  ;;  %v1634_v9 = vsel %vm1626_vm2, %v1613_v33, %v1616_v48  ;;  %v1631_v22 = vsel %vm1629_vm7, %v1619_v21, 2102212464 }
 0x235   : > { %v2987_v6 = vsel %vm2980_vm14, %v2983_v35, %v2986_v54  ;;  %v1399_v19 = vadd.s32 127, %v1398_v34  ;;  %v1635_v47 = vsel %vm1629_vm7, %v1622_v15, 920167782  ;;  %v1638_v26 = vsel %vm1626_vm2, %v1616_v48, %v1619_v21 }
 0x236   : > { %v2988_v38 = vsel %vm2977_vm15, nan, %v2987_v6  ;;  %v1397_v32 = vor.u32 %v1396_v13, %v1395_v41  ;;  %v1630_v20 = vsel %vm1626_vm2, %v1610_v39, %v1613_v33  ;;  %v1636_v16 = vsel %vm1628_vm4, %v1619_v21, %v1635_v47 }
 0x237   : > { %3469 = vst [vmem:[%s4236_s10 + $0x78] sm:$0xff] %v2988_v38  ;;  %v1400_v55 = vshll.u32 %v1399_v19, 23  ;;  %v1639_v40 = vsel %vm1629_vm7, %v1625_v51, 1326507024  ;;  %v1632_v63 = vsel %vm1628_vm4, %v1616_v48, %v1631_v22  ;;  %v1637_v59 = vsel %vm1627_vm3, %v1634_v9, %v1636_v16 }
 0x238   : > { %v1404_v46 = vcvt.s32.f32 %v1397_v32  ;;  %v1640_v11 = vsel %vm1628_vm4, %v1622_v15, %v1639_v40  ;;  %v1644_v54 = vshrl.u32 %v5079_v50, 16  ;;  %v1667_v12 = vand.u32 65535, %v1637_v59 }
 0x239   : > { %v1401_v57 = vor.u32 4788187, %v1400_v55  ;;  %v1641_v8 = vsel %vm1627_vm3, %v1638_v26, %v1640_v11  ;;  %v1668_v18 = vshrl.u32 %v1637_v59, 16  ;;  %v5127_v34 = vand.u32 3, %v1428_v52 }
 0x23a   : > { %v1645_v35 = vand.u32 65535, %v1641_v8  ;;  %v1646_v33 = vshrl.u32 %v1641_v8, 16  ;;  %v5131_v21 = vsel %vm1627_vm3, %v1630_v20, %v1632_v63  ;;  %v1671_v44 = vmul.u32 %v1667_v12, %v1644_v54 }
 0x23b   : > { %v1402_v58 = vand.u32 2147483647, %v1401_v57  ;;  %v1670_v48 = vmul.u32 %v1668_v18, %v5094_v37  ;;  %v5134_v45 = vshrl.u32 %v3311_v56, 5  ;;  %v3313_v14 = vand.u32 31, %v3311_v56 }
 0x23c   : > { %v1648_v13 = vmul.u32 %v1646_v33, %v5094_v37  ;;  %v1649_v19 = vmul.u32 %v1645_v35, %v1644_v54  ;;  %v1647_v38 = vmul.u32 %v1645_v35, %v5094_v37  ;;  %v1669_v52 = vmul.u32 %v1667_v12, %v5094_v37 }
 0x23d   : > { %v1405_v41 = vmul.f32 %v1404_v46, %v1402_v58  ;;  %v1672_v39 = vmul.u32 %v1668_v18, %v1644_v54  ;;  %v1673_v15 = vshll.u32 %v1670_v48, 16  ;;  %v1650_v32 = vmul.u32 %v1646_v33, %v1644_v54 }
 0x23e   : > { %v1651_v55 = vshll.u32 %v1648_v13, 16  ;;  %v1674_v51 = vshrl.u32 %v1670_v48, 16  ;;  %v1653_v57 = vshll.u32 %v1649_v19, 16  ;;  %v1675_v22 = vshll.u32 %v1671_v44, 16 }
 0x23f   : > { %v1406_v6 = vxor.u32 2147483648, %v1405_v41  ;;  %vm1677_vm5 = vc.u32 %v1669_v52, %v1673_v15  ;;  %v1679_v46 = vadd.s32 %v1673_v15, %v1669_v52  ;;  %v5146_v16 = vsub.s32 32, %v3313_v14 }
 0x240   : > { %vm1655_vm6 = vc.u32 %v1647_v38, %v1651_v55  ;;  %v1657_v47 = vadd.s32 %v1651_v55, %v1647_v38  ;;  %v1678_v37 = vsel %vm1677_vm5, 1, %v3815_v0  ;;  %v1652_v49 = vshrl.u32 %v1648_v13, 16 }
 0x241   : > { %v1407_v17 = vsel %vm1286_vm8, %v1406_v6, %v1405_v41  ;;  %v1656_v26 = vsel %vm1655_vm6, 1, %v3815_v0  ;;  %v1680_v20 = vadd.s32 %v1678_v37, %v1672_v39  ;;  %v1654_v59 = vshrl.u32 %v1649_v19, 16 }
 0x242   : > { %v1410_v9 = vsel %vm5075_vm10, %v4818_v60, %v1407_v17  ;;  %v1658_v63 = vadd.s32 %v1656_v26, %v1650_v32  ;;  %vm1659_vm8 = vc.u32 %v1657_v47, %v1653_v57  ;;  %vm1681_vm9 = vc.u32 %v1679_v46, %v1675_v22 }
 0x243   : > { %v1412_v56 = vmul.f32 %v1410_v9, %v1410_v9  ;;  %v1660_v11 = vsel %vm1659_vm8, 1, %v3815_v0  ;;  %v1682_v18 = vsel %vm1681_vm9, 1, %v3815_v0  ;;  %v1676_v41 = vshrl.u32 %v1671_v44, 16 }
 0x244   : > { %v1662_v12 = vadd.s32 %v1660_v11, %v1658_v63  ;;  %v1684_v35 = vadd.s32 %v1682_v18, %v1680_v20  ;;  %v3316_v33 = vshll.u32 %v3817_v62, %v3313_v14  ;;  %v3317_v48 = vshrl.u32 %v3818_v1, %v5146_v16 }
 0x245   : > { %v1413_v40 = vmul.f32 -0.001358992, %v1412_v56  ;;  %v1420_v58 = vmul.f32 -0.00019511016, %v1412_v56  ;;  %v3320_v13 = vshrl.u32 %v3819_v3, %v5146_v16  ;;  %v5155_v19 = vadd.s32 %v1679_v46, %v1675_v22 }
 0x246   : > { %v1663_v52 = vadd.s32 %v1662_v12, %v1652_v49  ;;  %v1685_v39 = vadd.s32 %v1684_v35, %v1674_v51  ;;  %v5157_v15 = vor.u32 %v3317_v48, %v3316_v33  ;;  %v3319_v17 = vshll.u32 %v3818_v1, %v3313_v14 }
 0x247   : > { %v1414_v8 = vadd.f32 0.041655596, %v1413_v40  ;;  %v1421_v54 = vadd.f32 0.008332121, %v1420_v58  ;;  %v3323_v57 = vshrl.u32 %v3820_v5, %v5146_v16  ;;  %v3322_v37 = vshll.u32 %v3819_v3, %v3313_v14 }
 0x248   : > { %v5160_v55 = vadd.s32 %v1663_v52, %v1654_v59  ;;  %v1686_v47 = vadd.s32 %v1685_v39, %v1676_v41  ;;  %v3325_v26 = vshll.u32 %v3820_v5, %v3313_v14  ;;  %v3326_v22 = vshrl.u32 %v3821_v10, %v5146_v16 }
 0x249   : > { %v1415_v6 = vmul.f32 %v1414_v8, %v1412_v56  ;;  %v1422_v38 = vmul.f32 %v1421_v54, %v1412_v56  ;;  %vm1430_vm10 = vcmp.lt.s32.totalorder %v5127_v34, 2  ;;  %v5171_v20 = vor.u32 %v3320_v13, %v3319_v17 }
 0x24a   : > { %vm1689_vm11 = vc.u32 %v5160_v55, %v5155_v19  ;;  %v1690_v40 = vadd.s32 1, %v1686_v47  ;;  %v3327_v58 = vor.u32 %v3326_v22, %v3325_v26  ;;  %v3328_v63 = vshll.u32 %v3821_v10, %v3313_v14 }
 0x24b   : > { %v1416_v44 = vadd.f32 -0.4999988, %v1415_v6  ;;  %v1423_v32 = vadd.f32 -0.16666654, %v1422_v38  ;;  %v3329_v49 = vshrl.u32 %v6091_v36, %v5146_v16  ;;  %v1687_v8 = vmul.u32 %v5079_v50, %v5131_v21 }
 0x24c   : > { %vm1431_vm12 = vcmp.eq.s32.totalorder %v5127_v34, 0  ;;  %v1691_v54 = vsel %vm1689_vm11, %v1690_v40, %v1686_v47  ;;  %vm3331_vm13 = vcmp.lt.s32.totalorder %v5134_v45, 1  ;;  %vm3334_vm14 = vcmp.lt.s32.totalorder %v5134_v45, 4 }
 0x24d   : > { %v1417_v51 = vmul.f32 %v1416_v44, %v1412_v56  ;;  %v1424_v46 = vmul.f32 %v1423_v32, %v1412_v56  ;;  %v3324_v56 = vor.u32 %v3323_v57, %v3322_v37  ;;  %v3330_v12 = vor.u32 %v3329_v49, %v3328_v63 }
 0x24e   : > { %v1692_v35 = vadd.s32 %v1691_v54, %v1687_v8  ;;  %vm1434_vm15 = vcmp.eq.s32.totalorder %v5127_v34, 2  ;;  %vm3332_vm0 = vcmp.lt.s32.totalorder %v5134_v45, 2  ;;  %v3339_v50 = vsel %vm3331_vm13, %v5157_v15, %v5171_v20 }
 0x24f   : > { %v1418_v59 = vadd.f32 1.0, %v1417_v51  ;;  %v1425_v11 = vadd.f32 1.0, %v1424_v46  ;;  %v3340_v21 = vsel %vm3334_vm14, %v3327_v58, 920167782  ;;  %vm3333_vm1 = vcmp.lt.s32.totalorder %v5134_v45, 3 }
 0x250   : > { %v1693_v33 = vadd.s32 536870912, %v1692_v35  ;;  %v3341_v6 = vsel %vm3333_vm1, %v3324_v56, %v3340_v21  ;;  %v3344_v38 = vsel %vm3334_vm14, %v3330_v12, 1326507024  ;;  %v5199_v52 = vshll.u32 %v3307_v53, 8 }
 0x251   : > { %v1426_v18 = vmul.f32 %v1425_v11, %v1410_v9  ;;  %v1435_v41 = vxor.u32 2147483648, %v1418_v59  ;;  %v3343_v9 = vsel %vm3331_vm13, %v5171_v20, %v3324_v56  ;;  %v3342_v17 = vsel %vm3332_vm0, %v3339_v50, %v3341_v6 }
 0x252   : > { %v5203_v39 = vshrl.u32 %v1693_v33, 30  ;;  %v3345_v44 = vsel %vm3333_vm1, %v3327_v58, %v3344_v38  ;;  %vm1427_vm2 = vweird.f32 %v4818_v60  ;;  %v3349_v47 = vshrl.u32 %v5199_v52, 16 }
 0x253   : > { %v1432_v14 = vxor.u32 2147483648, %v1426_v18  ;;  %v1436_v48 = vsel %vm1434_vm15, %v1435_v41, %v1426_v18  ;;  %v3346_v43 = vsel %vm3332_vm0, %v3343_v9, %v3345_v44  ;;  %v3348_v26 = vand.u32 65535, %v5199_v52 }
 0x254   : > { %v1695_v57 = vshll.u32 %v5203_v39, 30  ;;  %v3350_v37 = vand.u32 65535, %v3346_v43  ;;  %v3351_v22 = vshrl.u32 %v3346_v43, 16  ;;  %v3373_v51 = vshrl.u32 %v3342_v17, 16 }
 0x255   : > { %v1433_v13 = vsel %vm1431_vm12, %v1418_v59, %v1432_v14  ;;  %v341_v60 = vmul.f32 %v3945_v31, %v3930_v23  ;;  %v343_v58 = vmul.f32 %v3945_v31, %v4191_v7  ;;  %v3372_v49 = vand.u32 65535, %v3342_v17 }
 0x256   : > { %v1437_v32 = vsel %vm1430_vm10, %v1433_v13, %v1436_v48  ;;  %v1696_v46 = vsub.s32 %v1692_v35, %v1695_v57  ;;  %v3354_v40 = vmul.u32 %v3350_v37, %v3349_v47  ;;  %v3353_v34 = vmul.u32 %v3351_v22, %v3348_v26 }
 0x257   : > { %v1438_v53 = vsel %vm1427_vm2, nan, %v1437_v32  ;;  %v3315_v59 = vshrl.u32 %v3817_v62, %v5146_v16  ;;  %v3352_v11 = vmul.u32 %v3350_v37, %v3348_v26  ;;  %v3375_v54 = vmul.u32 %v3373_v51, %v3348_v26  ;;  %v394_v32 = vpop.permute.xlu0 %393 }
 0x258   : > { %3459 = vst [vmem:[%s4236_s10 + $0x28] sm:$0xff] %v1438_v53  ;;  %vm1697_vm3 = vcmp.lt.s32.totalorder %v1696_v46, 0  ;;  %v1698_v63 = vsub.s32 0, %v1696_v46  ;;  %v3356_v8 = vshll.u32 %v3353_v34, 16  ;;  %v1688_v12 = vadd.s32 %v5155_v19, %v5160_v55  ;;  %v386_v55 = vpop.permute.xlu1 %385 }
 0x259   : > { %v3355_v41 = vmul.u32 %v3351_v22, %v3349_v47  ;;  %v3358_v35 = vshll.u32 %v3354_v40, 16  ;;  %v3378_v21 = vshll.u32 %v3375_v54, 16  ;;  %v3335_v7 = vsel %vm3331_vm13, %v3315_v59, %v5157_v15 }
 0x25a   : > { %v1699_v18 = vsel %vm1697_vm3, %v1698_v63, %v1696_v46  ;;  %vm3360_vm4 = vc.u32 %v3352_v11, %v3356_v8  ;;  %v3362_v50 = vadd.s32 %v3356_v8, %v3352_v11  ;;  %v3374_v16 = vmul.u32 %v3372_v49, %v3348_v26 }
 0x25b   : > { %v1700_v23 = vclz %v1699_v18  ;;  %v3361_v14 = vsel %vm3360_vm4, 1, %v3815_v0  ;;  %v3376_v33 = vmul.u32 %v3372_v49, %v3349_v47  ;;  %v3336_v48 = vsel %vm3334_vm14, %v3324_v56, 2102212464 }
 0x25c   : > { %v3363_v19 = vadd.s32 %v3361_v14, %v3355_v41  ;;  %vm3364_vm7 = vc.u32 %v3362_v50, %v3358_v35  ;;  %v3357_v6 = vshrl.u32 %v3353_v34, 16  ;;  %v3377_v13 = vmul.u32 %v3373_v51, %v3349_v47  ;;  %v5243_v35 = vld [vmem:[%s6072_s2] ss:$0 sm:$0xff] }
 0x25d   : > { %v3619_v9 = vadd.s32 4294967294, %v1700_v23  ;;  %v3365_v38 = vsel %vm3364_vm7, 1, %v3815_v0  ;;  %vm3382_vm5 = vc.u32 %v3374_v16, %v3378_v21  ;;  %v3384_v44 = vadd.s32 %v3378_v21, %v3374_v16 }
 0x25e   : > { %v3367_v17 = vadd.s32 %v3365_v38, %v3363_v19  ;;  %v3383_v15 = vsel %vm3382_vm5, 1, %v3815_v0  ;;  %v3380_v53 = vshll.u32 %v3376_v33, 16  ;;  %v437_v37 = vmul.f32 %v3943_v29, %v386_v55 }
 0x25f   : > { %vm3620_vm6 = vcmp.lt.s32.totalorder %v3619_v9, 0  ;;  %v3385_v57 = vadd.s32 %v3383_v15, %v3377_v13  ;;  %v3337_v22 = vsel %vm3333_vm1, %v5171_v20, %v3336_v48  ;;  %v3359_v47 = vshrl.u32 %v3354_v40, 16 }
 0x260   : > { %v1703_v43 = vsel %vm3620_vm6, 0, %v3619_v9  ;;  %v3368_v34 = vadd.s32 %v3367_v17, %v3357_v6  ;;  %vm3386_vm8 = vc.u32 %v3384_v44, %v3380_v53  ;;  %v456_v51 = vadd.f32 %v437_v37, %v341_v60 }
 0x261   : > { %v1704_v56 = vsub.s32 32, %v1703_v43  ;;  %v1708_v26 = vsub.s32 4294967266, %v1703_v43  ;;  %v439_v63 = vmul.f32 %v3943_v29, %v394_v32  ;;  %v1705_v49 = vshll.u32 %v1696_v46, %v1703_v43 }
 0x262   : > { %v3387_v8 = vsel %vm3386_vm8, 1, %v3815_v0  ;;  %v3379_v18 = vshrl.u32 %v3375_v54, 16  ;;  %v479_v20 = vadd.f32 %v5243_v35, %v456_v51  ;;  %v1718_v60 = vsub.s32 4, %v5203_v39 }
 0x263   : > { %v1706_v59 = vshrl.u32 %v1688_v12, %v1704_v56  ;;  %v1709_v11 = vadd.s32 127, %v1708_v26  ;;  %v3389_v41 = vadd.s32 %v3387_v8, %v3385_v57  ;;  %v458_v23 = vadd.f32 %v439_v63, %v343_v58 }
 0x264   : > { %v3369_v21 = vadd.s32 %v3368_v34, %v3359_v47  ;;  %v3381_v46 = vshrl.u32 %v3376_v33, 16  ;;  %v5247_v14 = vmul.f32 30.0, %v479_v20  ;;  %vm1596_vm9 = vcmp.lt.s32.totalorder %v5054_v28, 0 }
 0x265   : > { %v1707_v40 = vor.u32 %v1706_v59, %v1705_v49  ;;  %v1710_v50 = vshll.u32 %v1709_v11, 23  ;;  %v3390_v12 = vadd.s32 %v3389_v41, %v3379_v18  ;;  %v481_v54 = vadd.f32 %v5243_v35, %v458_v23 }
 0x266   : > { %v3388_v9 = vadd.s32 %v3384_v44, %v3380_v53  ;;  %v3338_v48 = vsel %vm3332_vm0, %v3335_v7, %v3337_v22  ;;  %v1749_v58 = vand.u32 2147483647, %v5247_v14  ;;  %v1752_v55 = vand.u32 2139095040, %v5247_v14 }
 0x267   : > { %v1711_v16 = vor.u32 4788187, %v1710_v50  ;;  %v3391_v19 = vadd.s32 %v3390_v12, %v3381_v46  ;;  %v1714_v38 = vcvt.s32.f32 %v1707_v40  ;;  %v5255_v33 = vmul.f32 30.0, %v481_v54 }
 0x268   : > { %vm3394_vm10 = vc.u32 %v3369_v21, %v3388_v9  ;;  %v1719_v13 = vsel %vm1596_vm9, %v1718_v60, %v5203_v39  ;;  %v1753_v15 = vshrl.u32 %v1752_v55, 23  ;;  %v1756_v45 = vand.u32 8388607, %v1749_v58 }
 0x269   : > { %v1712_v6 = vand.u32 2147483647, %v1711_v16  ;;  %v3395_v17 = vadd.s32 1, %v3391_v19  ;;  %v3392_v44 = vmul.u32 %v5199_v52, %v3338_v48  ;;  %vm1595_vm11 = vcmp.le.f32.partialorder %v1594_v4, 0.7853982 }
 0x26a   : > { %v3621_v43 = vadd.s32 4294967169, %v1753_v15  ;;  %v1721_v57 = vsel %vm1595_vm11, 0, %v1719_v13  ;;  %v2062_v56 = vand.u32 2139095040, %v5255_v33  ;;  %v1757_v26 = vor.u32 8388608, %v1756_v45 }
 0x26b   : > { %v1715_v7 = vmul.f32 %v1714_v38, %v1712_v6  ;;  %v3396_v32 = vsel %vm3394_vm10, %v3395_v17, %v3391_v19  ;;  %v2059_v22 = vand.u32 2147483647, %v5255_v33  ;;  %v1738_v51 = vadd.s32 3, %v1721_v57 }
 0x26c   : > { %v3397_v37 = vadd.s32 %v3396_v32, %v3392_v44  ;;  %v1759_v39 = vadd.s32 1, %v3621_v43  ;;  %v2063_v59 = vshrl.u32 %v2062_v56, 23  ;;  %vm5276_vm13 = vcmp.le.f32.partialorder %v3299_v61, 0.7853982 }
 0x26d   : > { %v1716_v53 = vxor.u32 2147483648, %v1715_v7  ;;  %v5280_v18 = vshll.u32 %v1757_v26, 8  ;;  %v5284_v41 = vand.u32 8388607, %v2059_v22  ;;  %vm3301_vm14 = vcmp.lt.s32.totalorder %v5061_v30, 0 }
 0x26e   : > { %v3398_v47 = vadd.s32 536870912, %v3397_v37  ;;  %vm1760_vm12 = vcmp.gt.s32.totalorder %v1759_v39, 0  ;;  %v5287_v50 = vand.u32 3, %v1738_v51  ;;  %v3393_v60 = vadd.s32 %v3388_v9, %v3369_v21 }
 0x26f   : > { %v1717_v34 = vsel %vm1596_vm9, %v1716_v53, %v1715_v7  ;;  %v1761_v49 = vsel %vm1760_vm12, %v1759_v39, 0  ;;  %v5291_v48 = vadd.s32 4294967169, %v2063_v59  ;;  %v5296_v55 = vand.u32 65535, %v5280_v18 }
 0x270   : > { %v5270_v52 = vsel %vm1595_vm11, %v5054_v28, %v1717_v34  ;;  %v3399_v63 = vshrl.u32 %v3398_v47, 30  ;;  %v1763_v8 = vand.u32 31, %v1761_v49  ;;  %v5293_v19 = vshrl.u32 %v1761_v49, 5 }
 0x271   : > { %v1722_v4 = vmul.f32 %v5270_v52, %v5270_v52  ;;  %v5299_v6 = vshrl.u32 %v5280_v18, 16  ;;  %v2067_v38 = vor.u32 8388608, %v5284_v41  ;;  %vm1744_vm0 = vcmp.eq.s32.totalorder %v5287_v50, 2 }
 0x272   : > { %v3400_v40 = vshll.u32 %v3399_v63, 30  ;;  %v3423_v46 = vsub.s32 4, %v3399_v63  ;;  %v1764_v61 = vsub.s32 32, %v1763_v8  ;;  %v1766_v15 = vshll.u32 %v3817_v62, %v1763_v8 }
 0x273   : > { %v1723_v20 = vmul.f32 -0.001358992, %v1722_v4  ;;  %v1730_v23 = vmul.f32 -0.00019511016, %v1722_v4  ;;  %v1769_v7 = vshll.u32 %v3818_v1, %v1763_v8  ;;  %vm1741_vm1 = vcmp.eq.s32.totalorder %v5287_v50, 0 }
 0x274   : > { %v5289_v16 = vsub.s32 %v3397_v37, %v3400_v40  ;;  %v5306_v17 = vsel %vm3301_vm14, %v3423_v46, %v3399_v63  ;;  %v1767_v45 = vshrl.u32 %v3818_v1, %v1764_v61  ;;  %v1770_v53 = vshrl.u32 %v3819_v3, %v1764_v61 }
 0x275   : > { %v1724_v12 = vadd.f32 0.041655596, %v1723_v20  ;;  %v1731_v54 = vadd.f32 0.008332121, %v1730_v23  ;;  %v1772_v37 = vshll.u32 %v3819_v3, %v1763_v8  ;;  %v1773_v56 = vshrl.u32 %v3820_v5, %v1764_v61 }
 0x276   : > { %vm3402_vm15 = vcmp.lt.s32.totalorder %v5289_v16, 0  ;;  %v3403_v9 = vsub.s32 0, %v5289_v16  ;;  %v1776_v26 = vshrl.u32 %v3821_v10, %v1764_v61  ;;  %vm1740_vm2 = vcmp.lt.s32.totalorder %v5287_v50, 2 }
 0x277   : > { %v1725_v13 = vmul.f32 %v1724_v12, %v1722_v4  ;;  %v1732_v21 = vmul.f32 %v1731_v54, %v1722_v4  ;;  %v3426_v47 = vsel %vm5276_vm13, 0, %v5306_v17  ;;  %v1779_v51 = vshrl.u32 %v6091_v36, %v1764_v61 }
 0x278   : > { %v3404_v43 = vsel %vm3402_vm15, %v3403_v9, %v5289_v16  ;;  %vm1737_vm3 = vweird.f32 %v5054_v28  ;;  %v1765_v49 = vshrl.u32 %v3817_v62, %v1764_v61  ;;  %v1775_v59 = vshll.u32 %v3820_v5, %v1763_v8 }
 0x279   : > { %v1726_v44 = vadd.f32 -0.4999988, %v1725_v13  ;;  %v1733_v32 = vadd.f32 -0.16666654, %v1732_v21  ;;  %v3405_v57 = vclz %v3404_v43  ;;  %v1778_v20 = vshll.u32 %v3821_v10, %v1763_v8 }
 0x27a   : > { %v1771_v46 = vor.u32 %v1770_v53, %v1769_v7  ;;  %v1774_v12 = vor.u32 %v1773_v56, %v1772_v37  ;;  %v1777_v54 = vor.u32 %v1776_v26, %v1775_v59  ;;  %vm1781_vm7 = vcmp.lt.s32.totalorder %v5293_v19, 1 }
 0x27b   : > { %v1727_v39 = vmul.f32 %v1726_v44, %v1722_v4  ;;  %v1734_v34 = vmul.f32 %v1733_v32, %v1722_v4  ;;  %v3652_v63 = vadd.s32 4294967294, %v3405_v57  ;;  %v1768_v4 = vor.u32 %v1767_v45, %v1766_v15 }
 0x27c   : > { %v1780_v13 = vor.u32 %v1779_v51, %v1778_v20  ;;  %vm1782_vm5 = vcmp.lt.s32.totalorder %v5293_v19, 2  ;;  %vm1783_vm6 = vcmp.lt.s32.totalorder %v5293_v19, 3  ;;  %vm1784_vm8 = vcmp.lt.s32.totalorder %v5293_v19, 4 }
 0x27d   : > { %v1728_v23 = vadd.f32 1.0, %v1727_v39  ;;  %v1735_v40 = vadd.f32 1.0, %v1734_v34  ;;  %vm3653_vm4 = vcmp.lt.s32.totalorder %v3652_v63, 0  ;;  %v1789_v45 = vsel %vm1781_vm7, %v1768_v4, %v1771_v46 }
 0x27e   : > { %v3408_v17 = vsel %vm3653_vm4, 0, %v3652_v63  ;;  %v1790_v43 = vsel %vm1784_vm8, %v1777_v54, 920167782  ;;  %v1786_v57 = vsel %vm1784_vm8, %v1774_v12, 2102212464 }
 0x27f   : > { %v1736_v21 = vmul.f32 %v1735_v40, %v5270_v52  ;;  %v1745_v9 = vxor.u32 2147483648, %v1728_v23  ;;  %v3409_v44 = vsub.s32 32, %v3408_v17  ;;  %v3413_v61 = vsub.s32 4294967266, %v3408_v17 }
 0x280   : > { %v3410_v15 = vshll.u32 %v5289_v16, %v3408_v17  ;;  %v1791_v37 = vsel %vm1783_vm6, %v1774_v12, %v1790_v43  ;;  %v1793_v16 = vsel %vm1781_vm7, %v1771_v46, %v1774_v12  ;;  %v1794_v51 = vsel %vm1784_vm8, %v1780_v13, 1326507024 }
 0x281   : > { %v1742_v8 = vxor.u32 2147483648, %v1736_v21  ;;  %v1746_v52 = vsel %vm1744_vm0, %v1745_v9, %v1736_v21  ;;  %v3411_v7 = vshrl.u32 %v3393_v60, %v3409_v44  ;;  %v3414_v32 = vadd.s32 127, %v3413_v61 }
 0x282   : > { %v1792_v60 = vsel %vm1782_vm5, %v1789_v45, %v1791_v37  ;;  %v1787_v50 = vsel %vm1783_vm6, %v1771_v46, %v1786_v57  ;;  %v1795_v40 = vsel %vm1783_vm6, %v1777_v54, %v1794_v51  ;;  %v2069_v21 = vadd.s32 1, %v5291_v48 }
 0x283   : > { %v1743_v53 = vsel %vm1741_vm1, %v1728_v23, %v1742_v8  ;;  %v3412_v26 = vor.u32 %v3411_v7, %v3410_v15  ;;  %v3415_v39 = vshll.u32 %v3414_v32, 23  ;;  %v1822_v63 = vand.u32 65535, %v1792_v60 }
 0x284   : > { %v1747_v56 = vsel %vm1740_vm2, %v1743_v53, %v1746_v52  ;;  %v1823_v59 = vshrl.u32 %v1792_v60, 16  ;;  %v1785_v23 = vsel %vm1781_vm7, %v1765_v49, %v1768_v4  ;;  %v1796_v12 = vsel %vm1782_vm5, %v1793_v16, %v1795_v40 }
 0x285   : > { %v1748_v34 = vsel %vm1737_vm3, nan, %v1747_v56  ;;  %v3416_v20 = vor.u32 4788187, %v3415_v39  ;;  %v1826_v13 = vmul.u32 %v1822_v63, %v5299_v6  ;;  %v3419_v17 = vcvt.s32.f32 %v3412_v26 }
 0x286   : > { %3461 = vst [vmem:[%s4236_s10 + $0x38] sm:$0xff] %v1748_v34  ;;  %v1825_v28 = vmul.u32 %v1823_v59, %v5296_v55  ;;  %v1800_v44 = vand.u32 65535, %v1796_v12  ;;  %v1801_v61 = vshrl.u32 %v1796_v12, 16  ;;  %v5361_v49 = vadd.s32 3, %v3426_v47 }
 0x287   : > { %v3417_v9 = vand.u32 2147483647, %v3416_v20  ;;  %v5365_v4 = vsel %vm1782_vm5, %v1785_v23, %v1787_v50  ;;  %v1824_v46 = vmul.u32 %v1822_v63, %v5296_v55  ;;  %v1827_v48 = vmul.u32 %v1823_v59, %v5299_v6 }
 0x288   : > { %v1828_v54 = vshll.u32 %v1825_v28, 16  ;;  %v1803_v15 = vmul.u32 %v1801_v61, %v5296_v55  ;;  %v1804_v45 = vmul.u32 %v1800_v44, %v5299_v6  ;;  %v1829_v52 = vshrl.u32 %v1825_v28, 16 }
 0x289   : > { %v3420_v8 = vmul.f32 %v3419_v17, %v3417_v9  ;;  %v1830_v7 = vshll.u32 %v1826_v13, 16  ;;  %v1802_v43 = vmul.u32 %v1800_v44, %v5296_v55  ;;  %vm2070_vm10 = vcmp.gt.s32.totalorder %v2069_v21, 0 }
 0x28a   : > { %vm1832_vm9 = vc.u32 %v1824_v46, %v1828_v54  ;;  %v1834_v32 = vadd.s32 %v1828_v54, %v1824_v46  ;;  %v1806_v19 = vshll.u32 %v1803_v15, 16  ;;  %v1805_v53 = vmul.u32 %v1801_v61, %v5299_v6 }
 0x28b   : > { %v3421_v47 = vxor.u32 2147483648, %v3420_v8  ;;  %v1808_v57 = vshll.u32 %v1804_v45, 16  ;;  %v1833_v37 = vsel %vm1832_vm9, 1, %v3815_v0  ;;  %v2071_v34 = vsel %vm2070_vm10, %v2069_v21, 0 }
 0x28c   : > { %vm1836_vm11 = vc.u32 %v1834_v32, %v1830_v7  ;;  %vm1810_vm12 = vc.u32 %v1802_v43, %v1806_v19  ;;  %v1812_v56 = vadd.s32 %v1806_v19, %v1802_v43  ;;  %v1835_v26 = vadd.s32 %v1833_v37, %v1827_v48 }
 0x28d   : > { %v3422_v16 = vsel %vm3301_vm14, %v3421_v47, %v3420_v8  ;;  %v1811_v55 = vsel %vm1810_vm12, 1, %v3815_v0  ;;  %v1837_v60 = vsel %vm1836_vm11, 1, %v3815_v0  ;;  %v1807_v59 = vshrl.u32 %v1803_v15, 16 }
 0x28e   : > { %v3425_v39 = vsel %vm5276_vm13, %v5061_v30, %v3422_v16  ;;  %v1813_v51 = vadd.s32 %v1811_v55, %v1805_v53  ;;  %vm1814_vm15 = vc.u32 %v1812_v56, %v1808_v57  ;;  %v1839_v63 = vadd.s32 %v1837_v60, %v1835_v26 }
 0x28f   : > { %v3427_v6 = vmul.f32 %v3425_v39, %v3425_v39  ;;  %v1815_v20 = vsel %vm1814_vm15, 1, %v3815_v0  ;;  %v1831_v23 = vshrl.u32 %v1826_v13, 16  ;;  %v2073_v50 = vand.u32 31, %v2071_v34 }
 0x290   : > { %v1817_v28 = vadd.s32 %v1815_v20, %v1813_v51  ;;  %v1840_v9 = vadd.s32 %v1839_v63, %v1829_v52  ;;  %v1809_v11 = vshrl.u32 %v1804_v45, 16  ;;  %v5382_v17 = vadd.s32 %v1834_v32, %v1830_v7 }
 0x291   : > { %v3428_v40 = vmul.f32 -0.001358992, %v3427_v6  ;;  %v3435_v12 = vmul.f32 -0.00019511016, %v3427_v6  ;;  %v1842_v44 = vmul.u32 %v5280_v18, %v5365_v4  ;;  %v5386_v21 = vsub.s32 32, %v2073_v50 }
 0x292   : > { %v1818_v54 = vadd.s32 %v1817_v28, %v1807_v59  ;;  %v1841_v8 = vadd.s32 %v1840_v9, %v1831_v23  ;;  %v5388_v15 = vshrl.u32 %v2071_v34, 5  ;;  %v2076_v13 = vshll.u32 %v3817_v62, %v2073_v50 }
 0x293   : > { %v3429_v61 = vadd.f32 0.041655596, %v3428_v40  ;;  %v3436_v46 = vadd.f32 0.008332121, %v3435_v12  ;;  %v2077_v48 = vshrl.u32 %v3818_v1, %v5386_v21  ;;  %v2080_v45 = vshrl.u32 %v3819_v3, %v5386_v21 }
 0x294   : > { %v5395_v32 = vadd.s32 %v1818_v54, %v1809_v11  ;;  %v1845_v18 = vadd.s32 1, %v1841_v8  ;;  %v2079_v47 = vshll.u32 %v3818_v1, %v2073_v50  ;;  %v2082_v43 = vshll.u32 %v3819_v3, %v2073_v50 }
 0x295   : > { %v3430_v52 = vmul.f32 %v3429_v61, %v3427_v6  ;;  %v3437_v7 = vmul.f32 %v3436_v46, %v3427_v6  ;;  %v5397_v4 = vor.u32 %v2077_v48, %v2076_v13  ;;  %v2083_v19 = vshrl.u32 %v3820_v5, %v5386_v21 }
 0x296   : > { %vm1844_vm13 = vc.u32 %v5395_v32, %v5382_v17  ;;  %v2085_v37 = vshll.u32 %v3820_v5, %v2073_v50  ;;  %v2086_v56 = vshrl.u32 %v3821_v10, %v5386_v21  ;;  %v2088_v26 = vshll.u32 %v3821_v10, %v2073_v50 }
 0x297   : > { %v3431_v53 = vadd.f32 -0.4999988, %v3430_v52  ;;  %v3438_v57 = vadd.f32 -0.16666654, %v3437_v7  ;;  %v1846_v16 = vsel %vm1844_vm13, %v1845_v18, %v1841_v8  ;;  %v2089_v55 = vshrl.u32 %v6091_v36, %v5386_v21 }
 0x298   : > { %v1847_v51 = vadd.s32 %v1846_v16, %v1842_v44  ;;  %v5411_v63 = vor.u32 %v2080_v45, %v2079_v47  ;;  %vm3442_vm14 = vweird.f32 %v5061_v30  ;;  %v3444_v59 = vand.u32 3, %v5361_v49 }
 0x299   : > { %v3432_v60 = vmul.f32 %v3431_v53, %v3427_v6  ;;  %v3439_v34 = vmul.f32 %v3438_v57, %v3427_v6  ;;  %v5415_v20 = vor.u32 %v2083_v19, %v2082_v43  ;;  %v2087_v23 = vor.u32 %v2086_v56, %v2085_v37 }
 0x29a   : > { %v2090_v40 = vor.u32 %v2089_v55, %v2088_v26  ;;  %v1848_v9 = vadd.s32 536870912, %v1847_v51  ;;  %vm2094_vm0 = vcmp.lt.s32.totalorder %v5388_v15, 4  ;;  %vm2091_vm1 = vcmp.lt.s32.totalorder %v5388_v15, 1 }
 0x29b   : > { %v3433_v12 = vadd.f32 1.0, %v3432_v60  ;;  %v3440_v28 = vadd.f32 1.0, %v3439_v34  ;;  %vm2093_vm2 = vcmp.lt.s32.totalorder %v5388_v15, 3  ;;  %v2100_v6 = vsel %vm2094_vm0, %v2087_v23, 920167782 }
 0x29c   : > { %v5424_v50 = vshll.u32 %v2067_v38, 8  ;;  %v5426_v44 = vshrl.u32 %v1848_v9, 30  ;;  %v2099_v61 = vsel %vm2091_vm1, %v5397_v4, %v5411_v63  ;;  %vm3445_vm3 = vcmp.lt.s32.totalorder %v3444_v59, 2 }
 0x29d   : > { %v3441_v49 = vmul.f32 %v3440_v28, %v3425_v39  ;;  %v3450_v11 = vxor.u32 2147483648, %v3433_v12  ;;  %v2101_v46 = vsel %vm2093_vm2, %v5415_v20, %v2100_v6  ;;  %v2103_v41 = vsel %vm2091_vm1, %v5411_v63, %v5415_v20 }
 0x29e   : > { %v2104_v38 = vsel %vm2094_vm0, %v2090_v40, 1326507024  ;;  %vm3449_vm4 = vcmp.eq.s32.totalorder %v3444_v59, 2  ;;  %v1850_v54 = vshll.u32 %v5426_v44, 30  ;;  %vm2092_vm7 = vcmp.lt.s32.totalorder %v5388_v15, 2 }
 0x29f   : > { %v3447_v39 = vxor.u32 2147483648, %v3441_v49  ;;  %vm3446_vm5 = vcmp.eq.s32.totalorder %v3444_v59, 0  ;;  %v3451_v8 = vsel %vm3449_vm4, %v3450_v11, %v3441_v49  ;;  %v2102_v13 = vsel %vm2092_vm7, %v2099_v61, %v2101_v46 }
 0x2a0   : > { %v2105_v48 = vsel %vm2093_vm2, %v2087_v23, %v2104_v38  ;;  %v1851_v52 = vsub.s32 %v1847_v51, %v1850_v54  ;;  %v2108_v18 = vand.u32 65535, %v5424_v50  ;;  %v2109_v43 = vshrl.u32 %v5424_v50, 16 }
 0x2a1   : > { %v3448_v45 = vsel %vm3446_vm5, %v3433_v12, %v3447_v39  ;;  %v2106_v7 = vsel %vm2092_vm7, %v2103_v41, %v2105_v48  ;;  %v2132_v55 = vand.u32 65535, %v2102_v13  ;;  %v2133_v60 = vshrl.u32 %v2102_v13, 16 }
 0x2a2   : > { %v3452_v47 = vsel %vm3445_vm3, %v3448_v45, %v3451_v8  ;;  %v2110_v19 = vand.u32 65535, %v2106_v7  ;;  %v2111_v53 = vshrl.u32 %v2106_v7, 16  ;;  %vm1852_vm6 = vcmp.lt.s32.totalorder %v1851_v52, 0 }
 0x2a3   : > { %v3453_v57 = vsel %vm3442_vm14, nan, %v3452_v47  ;;  %v1853_v37 = vsub.s32 0, %v1851_v52  ;;  %v344_v59 = vmul.f32 %v3945_v31, %v3932_v24  ;;  %v346_v40 = vmul.f32 %v3945_v31, %v4223_v2 }
 0x2a4   : > { %3472 = vst [vmem:[%s4236_s10 + $0x90] sm:$0xff] %v3453_v57  ;;  %v2113_v16 = vmul.u32 %v2111_v53, %v2108_v18  ;;  %v2114_v56 = vmul.u32 %v2110_v19, %v2109_v43  ;;  %v2112_v51 = vmul.u32 %v2110_v19, %v2108_v18  ;;  %v2075_v30 = vshrl.u32 %v3817_v62, %v5386_v21  ;;  %v398_v57 = vpop.permute.xlu1 %397 }
 0x2a5   : > { %v1854_v26 = vsel %vm1852_vm6, %v1853_v37, %v1851_v52  ;;  %v2115_v12 = vmul.u32 %v2111_v53, %v2109_v43  ;;  %v1843_v49 = vadd.s32 %v5382_v17, %v5395_v32  ;;  %v2135_v61 = vmul.u32 %v2133_v60, %v2108_v18  ;;  %v406_v37 = vpop.permute.xlu0 %405 }
 0x2a6   : > { %v1855_v34 = vclz %v1854_v26  ;;  %v2116_v23 = vshll.u32 %v2113_v16, 16  ;;  %v2118_v9 = vshll.u32 %v2114_v56, 16  ;;  %v2136_v46 = vmul.u32 %v2132_v55, %v2109_v43 }
 0x2a7   : > { %v2117_v24 = vshrl.u32 %v2113_v16, 16  ;;  %v2134_v21 = vmul.u32 %v2132_v55, %v2108_v18  ;;  %v2138_v39 = vshll.u32 %v2135_v61, 16  ;;  %v2137_v48 = vmul.u32 %v2133_v60, %v2109_v43 }
 0x2a8   : > { %v3622_v28 = vadd.s32 4294967294, %v1855_v34  ;;  %vm2120_vm8 = vc.u32 %v2112_v51, %v2116_v23  ;;  %v2122_v6 = vadd.s32 %v2116_v23, %v2112_v51  ;;  %v2140_v7 = vshll.u32 %v2136_v46, 16 }
 0x2a9   : > { %v2121_v11 = vsel %vm2120_vm8, 1, %v3815_v0  ;;  %vm2142_vm11 = vc.u32 %v2134_v21, %v2138_v39  ;;  %v2144_v17 = vadd.s32 %v2138_v39, %v2134_v21  ;;  %v2095_v18 = vsel %vm2091_vm1, %v2075_v30, %v5397_v4 }
 0x2aa   : > { %vm3623_vm9 = vcmp.lt.s32.totalorder %v3622_v28, 0  ;;  %v2123_v41 = vadd.s32 %v2121_v11, %v2115_v12  ;;  %vm2124_vm10 = vc.u32 %v2122_v6, %v2118_v9  ;;  %v2143_v53 = vsel %vm2142_vm11, 1, %v3815_v0 }
 0x2ab   : > { %v1858_v2 = vsel %vm3623_vm9, 0, %v3622_v28  ;;  %v2125_v38 = vsel %vm2124_vm10, 1, %v3815_v0  ;;  %v2096_v16 = vsel %vm2094_vm0, %v5415_v20, 2102212464  ;;  %v2145_v43 = vadd.s32 %v2143_v53, %v2137_v48 }
 0x2ac   : > { %v1859_v54 = vsub.s32 32, %v1858_v2  ;;  %v1863_v8 = vsub.s32 4294967266, %v1858_v2  ;;  %v2127_v13 = vadd.s32 %v2125_v38, %v2123_v41  ;;  %v1860_v45 = vshll.u32 %v1851_v52, %v1858_v2 }
 0x2ad   : > { %vm2146_vm12 = vc.u32 %v2144_v17, %v2140_v7  ;;  %v2119_v55 = vshrl.u32 %v2114_v56, 16  ;;  %v2139_v34 = vshrl.u32 %v2135_v61, 16  ;;  %v440_v23 = vmul.f32 %v3943_v29, %v398_v57 }
 0x2ae   : > { %v1861_v32 = vshrl.u32 %v1843_v49, %v1859_v54  ;;  %v1864_v47 = vadd.s32 127, %v1863_v8  ;;  %v2128_v19 = vadd.s32 %v2127_v13, %v2117_v24  ;;  %v2147_v60 = vsel %vm2146_vm12, 1, %v3815_v0 }
 0x2af   : > { %v2149_v51 = vadd.s32 %v2147_v60, %v2145_v43  ;;  %v442_v12 = vmul.f32 %v3943_v29, %v406_v37  ;;  %v1873_v4 = vsub.s32 4, %v5426_v44  ;;  %v2097_v20 = vsel %vm2093_vm2, %v5411_v63, %v2096_v16 }
 0x2b0   : > { %v1862_v52 = vor.u32 %v1861_v32, %v1860_v45  ;;  %v1865_v26 = vshll.u32 %v1864_v47, 23  ;;  %v5479_v30 = vadd.s32 %v2128_v19, %v2119_v55  ;;  %v2141_v9 = vshrl.u32 %v2136_v46, 16 }
 0x2b1   : > { %v2150_v6 = vadd.s32 %v2149_v51, %v2139_v34  ;;  %v459_v56 = vadd.f32 %v440_v23, %v344_v59  ;;  %v461_v49 = vadd.f32 %v442_v12, %v346_v40  ;;  %v5481_v24 = vadd.s32 %v2144_v17, %v2140_v7 }
 0x2b2   : > { %v1866_v28 = vor.u32 4788187, %v1865_v26  ;;  %v1869_v61 = vcvt.s32.f32 %v1862_v52  ;;  %v2098_v41 = vsel %vm2092_vm7, %v2095_v18, %v2097_v20  ;;  %vm1751_vm15 = vcmp.lt.s32.totalorder %v5247_v14, 0 }
 0x2b3   : > { %v2151_v2 = vadd.s32 %v2150_v6, %v2141_v9  ;;  %v482_v38 = vadd.f32 %v5243_v35, %v459_v56  ;;  %v484_v21 = vadd.f32 %v5243_v35, %v461_v49  ;;  %vm2154_vm13 = vc.u32 %v5479_v30, %v5481_v24 }
 0x2b4   : > { %v1867_v11 = vand.u32 2147483647, %v1866_v28  ;;  %v1874_v59 = vsel %vm1751_vm15, %v1873_v4, %v5426_v44  ;;  %vm1750_vm14 = vcmp.le.f32.partialorder %v1749_v58, 0.7853982  ;;  %v2152_v39 = vmul.u32 %v5424_v50, %v2098_v41 }
 0x2b5   : > { %v2155_v40 = vadd.s32 1, %v2151_v2  ;;  %v5491_v46 = vmul.f32 30.0, %v482_v38  ;;  %v5498_v13 = vmul.f32 30.0, %v484_v21  ;;  %v1876_v45 = vsel %vm1750_vm14, 0, %v1874_v59 }
 0x2b6   : > { %v1870_v63 = vmul.f32 %v1869_v61, %v1867_v11  ;;  %v1893_v19 = vadd.s32 3, %v1876_v45  ;;  %vm2061_vm0 = vcmp.lt.s32.totalorder %v5255_v33, 0  ;;  %vm5512_vm2 = vcmp.le.f32.partialorder %v2059_v22, 0.7853982 }
 0x2b7   : > { %v2156_v54 = vsel %vm2154_vm13, %v2155_v40, %v2151_v2  ;;  %v2214_v35 = vand.u32 2147483647, %v5491_v46  ;;  %v2217_v8 = vand.u32 2139095040, %v5491_v46  ;;  %v2527_v53 = vand.u32 2139095040, %v5498_v13 }
 0x2b8   : > { %v1871_v15 = vxor.u32 2147483648, %v1870_v63  ;;  %v2157_v7 = vadd.s32 %v2156_v54, %v2152_v39  ;;  %v2524_v52 = vand.u32 2147483647, %v5498_v13  ;;  %v1894_v23 = vand.u32 3, %v1893_v19 }
 0x2b9   : > { %v2218_v17 = vshrl.u32 %v2217_v8, 23  ;;  %v2221_v32 = vand.u32 8388607, %v2214_v35  ;;  %v2528_v26 = vshrl.u32 %v2527_v53, 23  ;;  %v2153_v40 = vadd.s32 %v5481_v24, %v5479_v30 }
 0x2ba   : > { %v1872_v48 = vsel %vm1751_vm15, %v1871_v15, %v1870_v63  ;;  %v2158_v47 = vadd.s32 536870912, %v2157_v7  ;;  %v5520_v11 = vand.u32 8388607, %v2524_v52  ;;  %vm1896_vm4 = vcmp.eq.s32.totalorder %v1894_v23, 0 }
 0x2bb   : > { %v1875_v44 = vsel %vm1750_vm14, %v5247_v14, %v1872_v48  ;;  %v3630_v50 = vadd.s32 4294967169, %v2218_v17  ;;  %v2222_v16 = vor.u32 8388608, %v2221_v32  ;;  %v3636_v12 = vadd.s32 4294967169, %v2528_v26 }
 0x2bc   : > { %v1877_v58 = vmul.f32 %v1875_v44, %v1875_v44  ;;  %v2159_v18 = vshrl.u32 %v2158_v47, 30  ;;  %vm1899_vm7 = vcmp.eq.s32.totalorder %v1894_v23, 2  ;;  %vm1895_vm5 = vcmp.lt.s32.totalorder %v1894_v23, 2 }
 0x2bd   : > { %v2224_v43 = vadd.s32 1, %v3630_v50  ;;  %v5516_v49 = vshll.u32 %v2222_v16, 8  ;;  %v2534_v21 = vadd.s32 1, %v3636_v12  ;;  %vm1892_vm6 = vweird.f32 %v5247_v14 }
 0x2be   : > { %v1878_v57 = vmul.f32 -0.001358992, %v1877_v58  ;;  %v1885_v37 = vmul.f32 -0.00019511016, %v1877_v58  ;;  %v2160_v34 = vshll.u32 %v2159_v18, 30  ;;  %v2183_v51 = vsub.s32 4, %v2159_v18 }
 0x2bf   : > { %vm2225_vm1 = vcmp.gt.s32.totalorder %v2224_v43, 0  ;;  %v5531_v8 = vand.u32 65535, %v5516_v49  ;;  %v2532_v48 = vor.u32 8388608, %v5520_v11  ;;  %vm2535_vm8 = vcmp.gt.s32.totalorder %v2534_v21, 0 }
 0x2c0   : > { %v1879_v55 = vadd.f32 0.041655596, %v1878_v57  ;;  %v1886_v60 = vadd.f32 0.008332121, %v1885_v37  ;;  %v5506_v20 = vsub.s32 %v2157_v7, %v2160_v34  ;;  %v2184_v9 = vsel %vm2061_vm0, %v2183_v51, %v2159_v18 }
 0x2c1   : > { %v2226_v56 = vsel %vm2225_vm1, %v2224_v43, 0  ;;  %v2186_v22 = vsel %vm5512_vm2, 0, %v2184_v9 }
 0x2c2   : > { %v1880_v28 = vmul.f32 %v1879_v55, %v1877_v58  ;;  %v1887_v4 = vmul.f32 %v1886_v60, %v1877_v58  ;;  %vm2162_vm3 = vcmp.lt.s32.totalorder %v5506_v20, 0  ;;  %v2163_v2 = vsub.s32 0, %v5506_v20 }
 0x2c3   : > { %v2228_v38 = vand.u32 31, %v2226_v56  ;;  %v2203_v17 = vadd.s32 3, %v2186_v22  ;;  %v5534_v32 = vshrl.u32 %v2226_v56, 5 }
 0x2c4   : > { %v1881_v61 = vadd.f32 -0.4999988, %v1880_v28  ;;  %v1888_v41 = vadd.f32 -0.16666654, %v1887_v4  ;;  %v2164_v15 = vsel %vm2162_vm3, %v2163_v2, %v5506_v20 }
 0x2c5   : > { %v2165_v39 = vclz %v2164_v15  ;;  %v2229_v54 = vsub.s32 32, %v2228_v38  ;;  %v2231_v47 = vshll.u32 %v3817_v62, %v2228_v38  ;;  %v2234_v30 = vshll.u32 %v3818_v1, %v2228_v38 }
 0x2c6   : > { %v1882_v63 = vmul.f32 %v1881_v61, %v1877_v58  ;;  %v1889_v59 = vmul.f32 %v1888_v41, %v1877_v58  ;;  %v2237_v53 = vshll.u32 %v3819_v3, %v2228_v38  ;;  %v2240_v18 = vshll.u32 %v3820_v5, %v2228_v38 }
 0x2c7   : > { %v3628_v58 = vadd.s32 4294967294, %v2165_v39  ;;  %v2232_v50 = vshrl.u32 %v3818_v1, %v2229_v54  ;;  %v2235_v57 = vshrl.u32 %v3819_v3, %v2229_v54  ;;  %v2238_v37 = vshrl.u32 %v3820_v5, %v2229_v54 }
 0x2c8   : > { %v1883_v45 = vadd.f32 1.0, %v1882_v63  ;;  %v1890_v7 = vadd.f32 1.0, %v1889_v59  ;;  %v2241_v4 = vshrl.u32 %v3821_v10, %v2229_v54  ;;  %v2243_v9 = vshll.u32 %v3821_v10, %v2228_v38 }
 0x2c9   : > { %vm3629_vm9 = vcmp.lt.s32.totalorder %v3628_v58, 0  ;;  %v2233_v55 = vor.u32 %v2232_v50, %v2231_v47  ;;  %v2236_v51 = vor.u32 %v2235_v57, %v2234_v30  ;;  %v2239_v28 = vor.u32 %v2238_v37, %v2237_v53 }
 0x2ca   : > { %v1891_v24 = vmul.f32 %v1890_v7, %v1875_v44  ;;  %v1900_v19 = vxor.u32 2147483648, %v1883_v45  ;;  %v2168_v26 = vsel %vm3629_vm9, 0, %v3628_v58  ;;  %v2244_v2 = vshrl.u32 %v6091_v36, %v2229_v54 }
 0x2cb   : > { %v2169_v60 = vsub.s32 32, %v2168_v26  ;;  %v2170_v44 = vshll.u32 %v5506_v20, %v2168_v26  ;;  %v2173_v34 = vsub.s32 4294967266, %v2168_v26  ;;  %v2230_v20 = vshrl.u32 %v3817_v62, %v2229_v54 }
 0x2cc   : > { %v1897_v16 = vxor.u32 2147483648, %v1891_v24  ;;  %v1901_v43 = vsel %vm1899_vm7, %v1900_v19, %v1891_v24  ;;  %v2242_v63 = vor.u32 %v2241_v4, %v2240_v18  ;;  %v2536_v59 = vsel %vm2535_vm8, %v2534_v21, 0 }
 0x2cd   : > { %v2171_v61 = vshrl.u32 %v2153_v40, %v2169_v60  ;;  %v2174_v41 = vadd.s32 127, %v2173_v34  ;;  %vm2246_vm10 = vcmp.lt.s32.totalorder %v5534_v32, 1  ;;  %vm2247_vm11 = vcmp.lt.s32.totalorder %v5534_v32, 2 }
 0x2ce   : > { %v1898_v12 = vsel %vm1896_vm4, %v1883_v45, %v1897_v16  ;;  %v2245_v45 = vor.u32 %v2244_v2, %v2243_v9  ;;  %vm2248_vm12 = vcmp.lt.s32.totalorder %v5534_v32, 3  ;;  %vm2249_vm15 = vcmp.lt.s32.totalorder %v5534_v32, 4 }
 0x2cf   : > { %v1902_v56 = vsel %vm1895_vm5, %v1898_v12, %v1901_v43  ;;  %v2172_v15 = vor.u32 %v2171_v61, %v2170_v44  ;;  %v2175_v39 = vshll.u32 %v2174_v41, 23  ;;  %v2254_v23 = vsel %vm2246_vm10, %v2233_v55, %v2236_v51 }
 0x2d0   : > { %v1903_v22 = vsel %vm1892_vm6, nan, %v1902_v56  ;;  %v2251_v38 = vsel %vm2249_vm15, %v2239_v28, 2102212464  ;;  %v2255_v40 = vsel %vm2249_vm15, %v2242_v63, 920167782  ;;  %v2258_v54 = vsel %vm2246_vm10, %v2236_v51, %v2239_v28 }
 0x2d1   : > { %3462 = vst [vmem:[%s4236_s10 + $0x40] sm:$0xff] %v1903_v22  ;;  %v2176_v14 = vor.u32 4788187, %v2175_v39  ;;  %v2179_v7 = vcvt.s32.f32 %v2172_v15  ;;  %v2250_v58 = vsel %vm2246_vm10, %v2230_v20, %v2233_v55  ;;  %v2256_v21 = vsel %vm2248_vm12, %v2239_v28, %v2255_v40 }
 0x2d2   : > { %v2259_v47 = vsel %vm2249_vm15, %v2245_v45, 1326507024  ;;  %v2252_v24 = vsel %vm2248_vm12, %v2236_v51, %v2251_v38  ;;  %v2257_v19 = vsel %vm2247_vm11, %v2254_v23, %v2256_v21  ;;  %v2264_v57 = vshrl.u32 %v5516_v49, 16 }
 0x2d3   : > { %v2177_v30 = vand.u32 2147483647, %v2176_v14  ;;  %v2260_v50 = vsel %vm2248_vm12, %v2242_v63, %v2259_v47  ;;  %v2287_v37 = vand.u32 65535, %v2257_v19  ;;  %v2288_v18 = vshrl.u32 %v2257_v19, 16 }
 0x2d4   : > { %v2261_v53 = vsel %vm2247_vm11, %v2258_v54, %v2260_v50  ;;  %v5564_v43 = vand.u32 3, %v2203_v17  ;;  %v5568_v60 = vsel %vm2247_vm11, %v2250_v58, %v2252_v24  ;;  %v5571_v51 = vshrl.u32 %v2536_v59, 5 }
 0x2d5   : > { %v2180_v16 = vmul.f32 %v2179_v7, %v2177_v30  ;;  %v2265_v26 = vand.u32 65535, %v2261_v53  ;;  %v2266_v55 = vshrl.u32 %v2261_v53, 16  ;;  %v2290_v44 = vmul.u32 %v2288_v18, %v5531_v8 }
 0x2d6   : > { %v2291_v34 = vmul.u32 %v2287_v37, %v2264_v57  ;;  %v2538_v9 = vand.u32 31, %v2536_v59  ;;  %v2289_v17 = vmul.u32 %v2287_v37, %v5531_v8  ;;  %v2292_v61 = vmul.u32 %v2288_v18, %v2264_v57 }
 0x2d7   : > { %v2181_v12 = vxor.u32 2147483648, %v2180_v16  ;;  %v2268_v28 = vmul.u32 %v2266_v55, %v5531_v8  ;;  %v2269_v4 = vmul.u32 %v2265_v26, %v2264_v57  ;;  %v2267_v56 = vmul.u32 %v2265_v26, %v5531_v8 }
 0x2d8   : > { %v2293_v41 = vshll.u32 %v2290_v44, 16  ;;  %v2270_v2 = vmul.u32 %v2266_v55, %v2264_v57  ;;  %v2294_v20 = vshrl.u32 %v2290_v44, 16  ;;  %v2295_v39 = vshll.u32 %v2291_v34, 16 }
 0x2d9   : > { %v2182_v32 = vsel %vm2061_vm0, %v2181_v12, %v2180_v16  ;;  %v2271_v22 = vshll.u32 %v2268_v28, 16  ;;  %v2273_v15 = vshll.u32 %v2269_v4, 16  ;;  %v5583_v40 = vsub.s32 32, %v2538_v9 }
 0x2da   : > { %v2185_v63 = vsel %vm5512_vm2, %v5255_v33, %v2182_v32  ;;  %vm2297_vm13 = vc.u32 %v2289_v17, %v2293_v41  ;;  %v2299_v14 = vadd.s32 %v2293_v41, %v2289_v17  ;;  %v2272_v6 = vshrl.u32 %v2268_v28, 16 }
 0x2db   : > { %v2187_v59 = vmul.f32 %v2185_v63, %v2185_v63  ;;  %vm2275_vm14 = vc.u32 %v2267_v56, %v2271_v22  ;;  %v2277_v45 = vadd.s32 %v2271_v22, %v2267_v56  ;;  %v2298_v8 = vsel %vm2297_vm13, 1, %v3815_v0 }
 0x2dc   : > { %v2276_v23 = vsel %vm2275_vm14, 1, %v3815_v0  ;;  %v2300_v38 = vadd.s32 %v2298_v8, %v2292_v61  ;;  %v2274_v21 = vshrl.u32 %v2269_v4, 16  ;;  %vm2301_vm1 = vc.u32 %v2299_v14, %v2295_v39 }
 0x2dd   : > { %v2188_v54 = vmul.f32 -0.001358992, %v2187_v59  ;;  %v2195_v7 = vmul.f32 -0.00019511016, %v2187_v59  ;;  %v2278_v58 = vadd.s32 %v2276_v23, %v2270_v2  ;;  %vm2279_vm0 = vc.u32 %v2277_v45, %v2273_v15 }
 0x2de   : > { %v2280_v47 = vsel %vm2279_vm0, 1, %v3815_v0  ;;  %v2302_v50 = vsel %vm2301_vm1, 1, %v3815_v0  ;;  %v2296_v53 = vshrl.u32 %v2291_v34, 16  ;;  %v2541_v37 = vshll.u32 %v3817_v62, %v2538_v9 }
 0x2df   : > { %v2189_v30 = vadd.f32 0.041655596, %v2188_v54  ;;  %v2196_v24 = vadd.f32 0.008332121, %v2195_v7  ;;  %v2282_v19 = vadd.s32 %v2280_v47, %v2278_v58  ;;  %v2304_v57 = vadd.s32 %v2302_v50, %v2300_v38 }
 0x2e0   : > { %v2542_v18 = vshrl.u32 %v3818_v1, %v5583_v40  ;;  %v2545_v44 = vshrl.u32 %v3819_v3, %v5583_v40  ;;  %v5592_v12 = vadd.s32 %v2299_v14, %v2295_v39  ;;  %v2544_v56 = vshll.u32 %v3818_v1, %v2538_v9 }
 0x2e1   : > { %v2190_v16 = vmul.f32 %v2189_v30, %v2187_v59  ;;  %v2197_v26 = vmul.f32 %v2196_v24, %v2187_v59  ;;  %v2283_v55 = vadd.s32 %v2282_v19, %v2272_v6  ;;  %v2305_v28 = vadd.s32 %v2304_v57, %v2294_v20 }
 0x2e2   : > { %v5594_v4 = vor.u32 %v2542_v18, %v2541_v37  ;;  %v2548_v41 = vshrl.u32 %v3820_v5, %v5583_v40  ;;  %v2547_v2 = vshll.u32 %v3819_v3, %v2538_v9  ;;  %v2550_v22 = vshll.u32 %v3820_v5, %v2538_v9 }
 0x2e3   : > { %v2191_v34 = vadd.f32 -0.4999988, %v2190_v16  ;;  %v2198_v17 = vadd.f32 -0.16666654, %v2197_v26  ;;  %v5597_v61 = vadd.s32 %v2283_v55, %v2274_v21  ;;  %v2306_v32 = vadd.s32 %v2305_v28, %v2296_v53 }
 0x2e4   : > { %v2551_v15 = vshrl.u32 %v3821_v10, %v5583_v40  ;;  %vm2205_vm2 = vcmp.lt.s32.totalorder %v5564_v43, 2  ;;  %v5608_v45 = vor.u32 %v2545_v44, %v2544_v56  ;;  %v2553_v14 = vshll.u32 %v3821_v10, %v2538_v9 }
 0x2e5   : > { %v2192_v20 = vmul.f32 %v2191_v34, %v2187_v59  ;;  %v2199_v39 = vmul.f32 %v2198_v17, %v2187_v59  ;;  %vm2309_vm3 = vc.u32 %v5597_v61, %v5592_v12  ;;  %v2310_v8 = vadd.s32 1, %v2306_v32 }
 0x2e6   : > { %v2552_v23 = vor.u32 %v2551_v15, %v2550_v22  ;;  %v2554_v38 = vshrl.u32 %v6091_v36, %v5583_v40  ;;  %v2307_v58 = vmul.u32 %v5516_v49, %v5568_v60  ;;  %v2549_v59 = vor.u32 %v2548_v41, %v2547_v2 }
 0x2e7   : > { %v2193_v54 = vadd.f32 1.0, %v2192_v20  ;;  %v2200_v7 = vadd.f32 1.0, %v2199_v39  ;;  %vm2206_vm4 = vcmp.eq.s32.totalorder %v5564_v43, 0  ;;  %v2311_v6 = vsel %vm2309_vm3, %v2310_v8, %v2306_v32 }
 0x2e8   : > { %v2555_v21 = vor.u32 %v2554_v38, %v2553_v14  ;;  %vm2556_vm7 = vcmp.lt.s32.totalorder %v5571_v51, 1  ;;  %v2312_v24 = vadd.s32 %v2311_v6, %v2307_v58  ;;  %vm2559_vm5 = vcmp.lt.s32.totalorder %v5571_v51, 4 }
 0x2e9   : > { %v2201_v47 = vmul.f32 %v2200_v7, %v2185_v63  ;;  %v2210_v30 = vxor.u32 2147483648, %v2193_v54  ;;  %vm2209_vm6 = vcmp.eq.s32.totalorder %v5564_v43, 2  ;;  %vm2557_vm8 = vcmp.lt.s32.totalorder %v5571_v51, 2 }
 0x2ea   : > { %v2564_v49 = vsel %vm2556_vm7, %v5594_v4, %v5608_v45  ;;  %v2565_v60 = vsel %vm2559_vm5, %v2552_v23, 920167782  ;;  %v2313_v19 = vadd.s32 536870912, %v2312_v24  ;;  %vm2558_vm9 = vcmp.lt.s32.totalorder %v5571_v51, 3 }
 0x2eb   : > { %v2207_v9 = vxor.u32 2147483648, %v2201_v47  ;;  %v2568_v63 = vsel %vm2556_vm7, %v5608_v45, %v2549_v59  ;;  %v2211_v50 = vsel %vm2209_vm6, %v2210_v30, %v2201_v47  ;;  %v2566_v53 = vsel %vm2558_vm9, %v2549_v59, %v2565_v60 }
 0x2ec   : > { %v2569_v57 = vsel %vm2559_vm5, %v2555_v21, 1326507024  ;;  %v5636_v37 = vshll.u32 %v2532_v48, 8  ;;  %v5640_v16 = vshrl.u32 %v2313_v19, 30  ;;  %v2567_v26 = vsel %vm2557_vm8, %v2564_v49, %v2566_v53 }
 0x2ed   : > { %v2208_v18 = vsel %vm2206_vm4, %v2193_v54, %v2207_v9  ;;  %v2570_v55 = vsel %vm2558_vm9, %v2552_v23, %v2569_v57  ;;  %vm2202_vm10 = vweird.f32 %v5255_v33  ;;  %v2598_v32 = vshrl.u32 %v2567_v26, 16  ;;  %v418_v57 = vpop.permute.xlu0 %417 }
 0x2ee   : > { %v2212_v44 = vsel %vm2205_vm2, %v2208_v18, %v2211_v50  ;;  %v2571_v11 = vsel %vm2557_vm8, %v2568_v63, %v2570_v55  ;;  %v2315_v28 = vshll.u32 %v5640_v16, 30  ;;  %v2574_v56 = vshrl.u32 %v5636_v37, 16 }
 0x2ef   : > { %v2213_v48 = vsel %vm2202_vm10, nan, %v2212_v44  ;;  %v2575_v34 = vand.u32 65535, %v2571_v11  ;;  %v2573_v17 = vand.u32 65535, %v5636_v37  ;;  %v2576_v41 = vshrl.u32 %v2571_v11, 16 }
 0x2f0   : > { %3464 = vst [vmem:[%s4236_s10 + $0x50] sm:$0xff] %v2213_v48  ;;  %v2316_v2 = vsub.s32 %v2312_v24, %v2315_v28  ;;  %v347_v33 = vmul.f32 %v3945_v31, %v3934_v25  ;;  %v349_v15 = vmul.f32 %v3945_v31, %v4266_v42  ;;  %v2597_v39 = vand.u32 65535, %v2567_v26 }
 0x2f1   : > { %v2579_v22 = vmul.u32 %v2575_v34, %v2574_v56  ;;  %v2578_v43 = vmul.u32 %v2576_v41, %v2573_v17  ;;  %v2540_v8 = vshrl.u32 %v3817_v62, %v5583_v40  ;;  %v2577_v23 = vmul.u32 %v2575_v34, %v2573_v17 }
 0x2f2   : > { %vm2317_vm11 = vcmp.lt.s32.totalorder %v2316_v2, 0  ;;  %v2318_v20 = vsub.s32 0, %v2316_v2  ;;  %v2600_v38 = vmul.u32 %v2598_v32, %v2573_v17  ;;  %v2308_v54 = vadd.s32 %v5592_v12, %v5597_v61  ;;  %v410_v61 = vpop.permute.xlu1 %409 }
 0x2f3   : > { %v2581_v14 = vshll.u32 %v2578_v43, 16  ;;  %v2580_v58 = vmul.u32 %v2576_v41, %v2574_v56  ;;  %v2583_v6 = vshll.u32 %v2579_v22, 16  ;;  %v2560_v42 = vsel %vm2556_vm7, %v2540_v8, %v5594_v4 }
 0x2f4   : > { %v2319_v7 = vsel %vm2317_vm11, %v2318_v20, %v2316_v2  ;;  %v2603_v47 = vshll.u32 %v2600_v38, 16  ;;  %v2599_v40 = vmul.u32 %v2597_v39, %v2573_v17  ;;  %v2601_v24 = vmul.u32 %v2597_v39, %v2574_v56 }
 0x2f5   : > { %v2320_v25 = vclz %v2319_v7  ;;  %vm2585_vm12 = vc.u32 %v2577_v23, %v2581_v14  ;;  %v2587_v21 = vadd.s32 %v2581_v14, %v2577_v23  ;;  %v2561_v60 = vsel %vm2559_vm5, %v2549_v59, 2102212464  ;;  %v5680_v23 = vld [vmem:[%s6072_s2] ss:$0 sm:$0xff] }
 0x2f6   : > { %v2586_v30 = vsel %vm2585_vm12, 1, %v3815_v0  ;;  %v2582_v9 = vshrl.u32 %v2578_v43, 16  ;;  %v2602_v63 = vmul.u32 %v2598_v32, %v2574_v56  ;;  %vm2607_vm13 = vc.u32 %v2599_v40, %v2603_v47 }
 0x2f7   : > { %v3631_v49 = vadd.s32 4294967294, %v2320_v25  ;;  %v2588_v12 = vadd.s32 %v2586_v30, %v2580_v58  ;;  %vm2589_vm15 = vc.u32 %v2587_v21, %v2583_v6  ;;  %v2608_v4 = vsel %vm2607_vm13, 1, %v3815_v0 }
 0x2f8   : > { %v2590_v19 = vsel %vm2589_vm15, 1, %v3815_v0  ;;  %v2609_v53 = vadd.s32 %v2603_v47, %v2599_v40  ;;  %v2605_v26 = vshll.u32 %v2601_v24, 16  ;;  %v2610_v55 = vadd.s32 %v2608_v4, %v2602_v63 }
 0x2f9   : > { %vm3632_vm14 = vcmp.lt.s32.totalorder %v3631_v49, 0  ;;  %v2592_v50 = vadd.s32 %v2590_v19, %v2588_v12  ;;  %v443_v44 = vmul.f32 %v3943_v29, %v410_v61  ;;  %v2562_v48 = vsel %vm2558_vm9, %v5608_v45, %v2561_v60 }
 0x2fa   : > { %v2323_v18 = vsel %vm3632_vm14, 0, %v3631_v49  ;;  %v2584_v56 = vshrl.u32 %v2579_v22, 16  ;;  %vm2611_vm0 = vc.u32 %v2609_v53, %v2605_v26  ;;  %v445_v17 = vmul.f32 %v3943_v29, %v418_v57 }
 0x2fb   : > { %v2324_v59 = vsub.s32 32, %v2323_v18  ;;  %v2328_v11 = vsub.s32 4294967266, %v2323_v18  ;;  %v2593_v28 = vadd.s32 %v2592_v50, %v2582_v9  ;;  %v462_v34 = vadd.f32 %v443_v44, %v347_v33 }
 0x2fc   : > { %v2325_v41 = vshll.u32 %v2316_v2, %v2323_v18  ;;  %v2612_v20 = vsel %vm2611_vm0, 1, %v3815_v0  ;;  %v2604_v39 = vshrl.u32 %v2600_v38, 16  ;;  %v464_v14 = vadd.f32 %v445_v17, %v349_v15 }
 0x2fd   : > { %v2326_v32 = vshrl.u32 %v2308_v54, %v2324_v59  ;;  %v2329_v43 = vadd.s32 127, %v2328_v11  ;;  %v2614_v8 = vadd.s32 %v2612_v20, %v2610_v55  ;;  %v485_v45 = vadd.f32 %v5680_v23, %v462_v34 }
 0x2fe   : > { %v2338_v33 = vsub.s32 4, %v5640_v16  ;;  %v2594_v58 = vadd.s32 %v2593_v28, %v2584_v56  ;;  %v2606_v2 = vshrl.u32 %v2601_v24, 16  ;;  %v487_v38 = vadd.f32 %v5680_v23, %v464_v14 }
 0x2ff   : > { %v2327_v22 = vor.u32 %v2326_v32, %v2325_v41  ;;  %v2330_v7 = vshll.u32 %v2329_v43, 23  ;;  %v2615_v54 = vadd.s32 %v2614_v8, %v2604_v39  ;;  %v5684_v6 = vmul.f32 30.0, %v485_v45 }
 0x300   : > { %vm2216_vm1 = vcmp.lt.s32.totalorder %v5491_v46, 0  ;;  %v2613_v21 = vadd.s32 %v2609_v53, %v2605_v26  ;;  %v2563_v47 = vsel %vm2557_vm8, %v2560_v42, %v2562_v48  ;;  %v5692_v24 = vmul.f32 30.0, %v487_v38 }
 0x301   : > { %v2331_v25 = vor.u32 4788187, %v2330_v7  ;;  %v2616_v30 = vadd.s32 %v2615_v54, %v2606_v2  ;;  %v2679_v15 = vand.u32 2147483647, %v5684_v6  ;;  %v2682_v40 = vand.u32 2139095040, %v5684_v6 }
 0x302   : > { %v2334_v60 = vcvt.s32.f32 %v2327_v22  ;;  %vm2619_vm2 = vc.u32 %v2594_v58, %v2613_v21  ;;  %v2339_v12 = vsel %vm2216_vm1, %v2338_v33, %v5640_v16  ;;  %v2617_v19 = vmul.u32 %v5636_v37, %v2563_v47 }
 0x303   : > { %v2332_v49 = vand.u32 2147483647, %v2331_v25  ;;  %v2620_v61 = vadd.s32 1, %v2616_v30  ;;  %v2683_v9 = vshrl.u32 %v2682_v40, 23  ;;  %v2686_v51 = vand.u32 8388607, %v2679_v15 }
 0x304   : > { %vm2215_vm3 = vcmp.le.f32.partialorder %v2214_v35, 0.7853982  ;;  %v2992_v18 = vand.u32 2139095040, %v5692_v24  ;;  %v2989_v55 = vand.u32 2147483647, %v5692_v24  ;;  %vm2526_vm5 = vcmp.lt.s32.totalorder %v5498_v13, 0 }
 0x305   : > { %v2335_v42 = vmul.f32 %v2334_v60, %v2332_v49  ;;  %v2621_v63 = vsel %vm2619_vm2, %v2620_v61, %v2616_v30  ;;  %v3639_v50 = vadd.s32 4294967169, %v2683_v9  ;;  %v2341_v53 = vsel %vm2215_vm3, 0, %v2339_v12 }
 0x306   : > { %v2622_v57 = vadd.s32 %v2621_v63, %v2617_v19  ;;  %v2687_v26 = vor.u32 8388608, %v2686_v51  ;;  %v2358_v11 = vadd.s32 3, %v2341_v53  ;;  %v2993_v56 = vshrl.u32 %v2992_v18, 23 }
 0x307   : > { %v2336_v4 = vxor.u32 2147483648, %v2335_v42  ;;  %v2689_v16 = vadd.s32 1, %v3639_v50  ;;  %vm5713_vm7 = vcmp.le.f32.partialorder %v2524_v52, 0.7853982  ;;  %v5721_v32 = vand.u32 8388607, %v2989_v55 }
 0x308   : > { %v2623_v59 = vadd.s32 536870912, %v2622_v57  ;;  %v5717_v41 = vshll.u32 %v2687_v26, 8  ;;  %v5724_v8 = vand.u32 3, %v2358_v11  ;;  %v2618_v45 = vadd.s32 %v2613_v21, %v2594_v58 }
 0x309   : > { %v2337_v44 = vsel %vm2216_vm1, %v2336_v4, %v2335_v42  ;;  %vm2690_vm4 = vcmp.gt.s32.totalorder %v2689_v16, 0  ;;  %v5728_v2 = vadd.s32 4294967169, %v2993_v56  ;;  %v2997_v47 = vor.u32 8388608, %v5721_v32 }
 0x30a   : > { %v5707_v37 = vsel %vm2215_vm3, %v5491_v46, %v2337_v44  ;;  %v2624_v48 = vshrl.u32 %v2623_v59, 30  ;;  %v2691_v28 = vsel %vm2690_vm4, %v2689_v16, 0  ;;  %v5733_v38 = vand.u32 65535, %v5717_v41 }
 0x30b   : > { %v2342_v35 = vmul.f32 %v5707_v37, %v5707_v37  ;;  %v2693_v17 = vand.u32 31, %v2691_v28  ;;  %v5730_v54 = vshrl.u32 %v2691_v28, 5  ;;  %v5736_v25 = vshrl.u32 %v5717_v41, 16 }
 0x30c   : > { %v2625_v39 = vshll.u32 %v2624_v48, 30  ;;  %v2648_v14 = vsub.s32 4, %v2624_v48  ;;  %vm2364_vm8 = vcmp.eq.s32.totalorder %v5724_v8, 2  ;;  %vm2361_vm9 = vcmp.eq.s32.totalorder %v5724_v8, 0 }
 0x30d   : > { %v2343_v43 = vmul.f32 -0.001358992, %v2342_v35  ;;  %v2350_v20 = vmul.f32 -0.00019511016, %v2342_v35  ;;  %v2694_v52 = vsub.s32 32, %v2693_v17  ;;  %v2696_v49 = vshll.u32 %v3817_v62, %v2693_v17 }
 0x30e   : > { %v5726_v33 = vsub.s32 %v2622_v57, %v2625_v39  ;;  %v5743_v40 = vsel %vm2526_vm5, %v2648_v14, %v2624_v48  ;;  %v2699_v12 = vshll.u32 %v3818_v1, %v2693_v17  ;;  %v2702_v63 = vshll.u32 %v3819_v3, %v2693_v17 }
 0x30f   : > { %v2344_v22 = vadd.f32 0.041655596, %v2343_v43  ;;  %v2351_v7 = vadd.f32 0.008332121, %v2350_v20  ;;  %v2697_v60 = vshrl.u32 %v3818_v1, %v2694_v52  ;;  %v2700_v42 = vshrl.u32 %v3819_v3, %v2694_v52 }
 0x310   : > { %vm2627_vm6 = vcmp.lt.s32.totalorder %v5726_v33, 0  ;;  %v2628_v21 = vsub.s32 0, %v5726_v33  ;;  %v2703_v50 = vshrl.u32 %v3820_v5, %v2694_v52  ;;  %v2706_v4 = vshrl.u32 %v3821_v10, %v2694_v52 }
 0x311   : > { %v2345_v30 = vmul.f32 %v2344_v22, %v2342_v35  ;;  %v2352_v58 = vmul.f32 %v2351_v7, %v2342_v35  ;;  %vm2360_vm10 = vcmp.lt.s32.totalorder %v5724_v8, 2  ;;  %v2651_v18 = vsel %vm5713_vm7, 0, %v5743_v40 }
 0x312   : > { %v2629_v51 = vsel %vm2627_vm6, %v2628_v21, %v5726_v33  ;;  %v2709_v26 = vshrl.u32 %v6091_v36, %v2694_v52  ;;  %vm2357_vm11 = vweird.f32 %v5491_v46  ;;  %v2695_v44 = vshrl.u32 %v3817_v62, %v2694_v52 }
 0x313   : > { %v2346_v61 = vadd.f32 -0.4999988, %v2345_v30  ;;  %v2353_v9 = vadd.f32 -0.16666654, %v2352_v58  ;;  %v2630_v19 = vclz %v2629_v51  ;;  %v2705_v59 = vshll.u32 %v3820_v5, %v2693_v17 }
 0x314   : > { %v2708_v11 = vshll.u32 %v3821_v10, %v2693_v17  ;;  %v2701_v56 = vor.u32 %v2700_v42, %v2699_v12  ;;  %v2704_v43 = vor.u32 %v2703_v50, %v2702_v63  ;;  %vm2711_vm15 = vcmp.lt.s32.totalorder %v5730_v54, 1 }
 0x315   : > { %v2347_v53 = vmul.f32 %v2346_v61, %v2342_v35  ;;  %v2354_v57 = vmul.f32 %v2353_v9, %v2342_v35  ;;  %v3637_v16 = vadd.s32 4294967294, %v2630_v19  ;;  %v2698_v35 = vor.u32 %v2697_v60, %v2696_v49 }
 0x316   : > { %v2707_v20 = vor.u32 %v2706_v4, %v2705_v59  ;;  %v2710_v39 = vor.u32 %v2709_v26, %v2708_v11  ;;  %vm2712_vm13 = vcmp.lt.s32.totalorder %v5730_v54, 2  ;;  %vm2713_vm14 = vcmp.lt.s32.totalorder %v5730_v54, 3 }
 0x317   : > { %v2348_v48 = vadd.f32 1.0, %v2347_v53  ;;  %v2355_v28 = vadd.f32 1.0, %v2354_v57  ;;  %vm3638_vm12 = vcmp.lt.s32.totalorder %v3637_v16, 0  ;;  %vm2714_vm0 = vcmp.lt.s32.totalorder %v5730_v54, 4 }
 0x318   : > { %v2633_v7 = vsel %vm3638_vm12, 0, %v3637_v16  ;;  %v2719_v21 = vsel %vm2711_vm15, %v2698_v35, %v2701_v56  ;;  %v2720_v60 = vsel %vm2714_vm0, %v2707_v20, 920167782  ;;  %v2716_v61 = vsel %vm2714_vm0, %v2704_v43, 2102212464 }
 0x319   : > { %v2356_v14 = vmul.f32 %v2355_v28, %v5707_v37  ;;  %v2365_v22 = vxor.u32 2147483648, %v2348_v48  ;;  %v2634_v30 = vsub.s32 32, %v2633_v7  ;;  %v2638_v52 = vsub.s32 4294967266, %v2633_v7 }
 0x31a   : > { %v2635_v58 = vshll.u32 %v5726_v33, %v2633_v7  ;;  %v2721_v9 = vsel %vm2713_vm14, %v2704_v43, %v2720_v60  ;;  %v2723_v33 = vsel %vm2711_vm15, %v2701_v56, %v2704_v43  ;;  %v2724_v50 = vsel %vm2714_vm0, %v2710_v39, 1326507024 }
 0x31b   : > { %v2362_v17 = vxor.u32 2147483648, %v2356_v14  ;;  %v2366_v37 = vsel %vm2364_vm8, %v2365_v22, %v2356_v14  ;;  %v2636_v40 = vshrl.u32 %v2618_v45, %v2634_v30  ;;  %v2639_v49 = vadd.s32 127, %v2638_v52 }
 0x31c   : > { %v2722_v45 = vsel %vm2712_vm13, %v2719_v21, %v2721_v9  ;;  %v2715_v26 = vsel %vm2711_vm15, %v2695_v44, %v2698_v35  ;;  %v2717_v8 = vsel %vm2713_vm14, %v2701_v56, %v2716_v61  ;;  %v2725_v16 = vsel %vm2713_vm14, %v2707_v20, %v2724_v50 }
 0x31d   : > { %v2363_v12 = vsel %vm2361_vm9, %v2348_v48, %v2362_v17  ;;  %v2637_v42 = vor.u32 %v2636_v40, %v2635_v58  ;;  %v2640_v19 = vshll.u32 %v2639_v49, 23  ;;  %v2752_v4 = vand.u32 65535, %v2722_v45 }
 0x31e   : > { %v2367_v51 = vsel %vm2360_vm10, %v2363_v12, %v2366_v37  ;;  %v2753_v53 = vshrl.u32 %v2722_v45, 16  ;;  %v2726_v59 = vsel %vm2712_vm13, %v2723_v33, %v2725_v16  ;;  %v2999_v48 = vadd.s32 1, %v5728_v2 }
 0x31f   : > { %v2368_v63 = vsel %vm2357_vm11, nan, %v2367_v51  ;;  %v2641_v57 = vor.u32 4788187, %v2640_v19  ;;  %v2756_v11 = vmul.u32 %v2752_v4, %v5736_v25  ;;  %v2644_v43 = vcvt.s32.f32 %v2637_v42 }
 0x320   : > { %3465 = vst [vmem:[%s4236_s10 + $0x58] sm:$0xff] %v2368_v63  ;;  %v2755_v46 = vmul.u32 %v2753_v53, %v5733_v38  ;;  %v2730_v39 = vand.u32 65535, %v2726_v59  ;;  %v2731_v14 = vshrl.u32 %v2726_v59, 16  ;;  %v5798_v44 = vadd.s32 3, %v2651_v18 }
 0x321   : > { %v2642_v28 = vand.u32 2147483647, %v2641_v57  ;;  %v5802_v35 = vsel %vm2712_vm13, %v2715_v26, %v2717_v8  ;;  %v2754_v56 = vmul.u32 %v2752_v4, %v5733_v38  ;;  %v2757_v2 = vmul.u32 %v2753_v53, %v5736_v25 }
 0x322   : > { %v2758_v20 = vshll.u32 %v2755_v46, 16  ;;  %v2733_v7 = vmul.u32 %v2731_v14, %v5733_v38  ;;  %v2734_v30 = vmul.u32 %v2730_v39, %v5736_v25  ;;  %v2759_v52 = vshrl.u32 %v2755_v46, 16 }
 0x323   : > { %v2645_v22 = vmul.f32 %v2644_v43, %v2642_v28  ;;  %v2760_v17 = vshll.u32 %v2756_v11, 16  ;;  %v2732_v21 = vmul.u32 %v2730_v39, %v5733_v38  ;;  %vm3000_vm2 = vcmp.gt.s32.totalorder %v2999_v48, 0 }
 0x324   : > { %vm2762_vm1 = vc.u32 %v2754_v56, %v2758_v20  ;;  %v2764_v58 = vadd.s32 %v2758_v20, %v2754_v56  ;;  %v2736_v54 = vshll.u32 %v2733_v7, 16  ;;  %v2735_v37 = vmul.u32 %v2731_v14, %v5736_v25 }
 0x325   : > { %v2646_v18 = vxor.u32 2147483648, %v2645_v22  ;;  %v2738_v40 = vshll.u32 %v2734_v30, 16  ;;  %v2763_v49 = vsel %vm2762_vm1, 1, %v3815_v0  ;;  %v3001_v51 = vsel %vm3000_vm2, %v2999_v48, 0 }
 0x326   : > { %vm2766_vm3 = vc.u32 %v2764_v58, %v2760_v17  ;;  %vm2740_vm4 = vc.u32 %v2732_v21, %v2736_v54  ;;  %v2742_v12 = vadd.s32 %v2736_v54, %v2732_v21  ;;  %v2765_v61 = vadd.s32 %v2763_v49, %v2757_v2 }
 0x327   : > { %v2647_v60 = vsel %vm2526_vm5, %v2646_v18, %v2645_v22  ;;  %v2741_v38 = vsel %vm2740_vm4, 1, %v3815_v0  ;;  %v2767_v33 = vsel %vm2766_vm3, 1, %v3815_v0  ;;  %v2737_v45 = vshrl.u32 %v2733_v7, 16 }
 0x328   : > { %v2650_v9 = vsel %vm5713_vm7, %v5498_v13, %v2647_v60  ;;  %v2743_v42 = vadd.s32 %v2741_v38, %v2735_v37  ;;  %vm2744_vm6 = vc.u32 %v2742_v12, %v2738_v40  ;;  %v2769_v19 = vadd.s32 %v2767_v33, %v2765_v61 }
 0x329   : > { %v2652_v25 = vmul.f32 %v2650_v9, %v2650_v9  ;;  %v2745_v63 = vsel %vm2744_vm6, 1, %v3815_v0  ;;  %v2761_v50 = vshrl.u32 %v2756_v11, 16  ;;  %v3003_v4 = vand.u32 31, %v3001_v51 }
 0x32a   : > { %v2747_v26 = vadd.s32 %v2745_v63, %v2743_v42  ;;  %v2770_v8 = vadd.s32 %v2769_v19, %v2759_v52  ;;  %v2739_v34 = vshrl.u32 %v2734_v30, 16  ;;  %v5819_v16 = vadd.s32 %v2764_v58, %v2760_v17 }
 0x32b   : > { %v2653_v53 = vmul.f32 -0.001358992, %v2652_v25  ;;  %v2660_v57 = vmul.f32 -0.00019511016, %v2652_v25  ;;  %v2772_v59 = vmul.u32 %v5717_v41, %v5802_v35  ;;  %v5823_v46 = vsub.s32 32, %v3003_v4 }
 0x32c   : > { %v2748_v43 = vadd.s32 %v2747_v26, %v2737_v45  ;;  %v2771_v39 = vadd.s32 %v2770_v8, %v2761_v50  ;;  %v5825_v14 = vshrl.u32 %v3001_v51, 5  ;;  %v3006_v11 = vshll.u32 %v3817_v62, %v3003_v4 }
 0x32d   : > { %v2654_v48 = vadd.f32 0.041655596, %v2653_v53  ;;  %v2661_v28 = vadd.f32 0.008332121, %v2660_v57  ;;  %v3007_v56 = vshrl.u32 %v3818_v1, %v5823_v46  ;;  %v3010_v20 = vshrl.u32 %v3819_v3, %v5823_v46 }
 0x32e   : > { %v5832_v30 = vadd.s32 %v2748_v43, %v2739_v34  ;;  %v2775_v41 = vadd.s32 1, %v2771_v39  ;;  %v3009_v2 = vshll.u32 %v3818_v1, %v3003_v4  ;;  %v3012_v52 = vshll.u32 %v3819_v3, %v3003_v4 }
 0x32f   : > { %v2655_v22 = vmul.f32 %v2654_v48, %v2652_v25  ;;  %v2662_v7 = vmul.f32 %v2661_v28, %v2652_v25  ;;  %v5834_v35 = vor.u32 %v3007_v56, %v3006_v11  ;;  %v3013_v17 = vshrl.u32 %v3820_v5, %v5823_v46 }
 0x330   : > { %vm2774_vm7 = vc.u32 %v5832_v30, %v5819_v16  ;;  %v3015_v21 = vshll.u32 %v3820_v5, %v3003_v4  ;;  %v3016_v37 = vshrl.u32 %v3821_v10, %v5823_v46  ;;  %v3018_v40 = vshll.u32 %v3821_v10, %v3003_v4 }
 0x331   : > { %v2656_v58 = vadd.f32 -0.4999988, %v2655_v22  ;;  %v2663_v18 = vadd.f32 -0.16666654, %v2662_v7  ;;  %v2776_v54 = vsel %vm2774_vm7, %v2775_v41, %v2771_v39  ;;  %v3019_v49 = vshrl.u32 %v6091_v36, %v5823_v46 }
 0x332   : > { %v2777_v61 = vadd.s32 %v2776_v54, %v2772_v59  ;;  %v5848_v38 = vor.u32 %v3010_v20, %v3009_v2  ;;  %vm2667_vm5 = vweird.f32 %v5498_v13  ;;  %v2669_v33 = vand.u32 3, %v5798_v44 }
 0x333   : > { %v2657_v60 = vmul.f32 %v2656_v58, %v2652_v25  ;;  %v2664_v12 = vmul.f32 %v2663_v18, %v2652_v25  ;;  %v5852_v51 = vor.u32 %v3013_v17, %v3012_v52  ;;  %v3017_v42 = vor.u32 %v3016_v37, %v3015_v21 }
 0x334   : > { %v3020_v19 = vor.u32 %v3019_v49, %v3018_v40  ;;  %v2778_v50 = vadd.s32 536870912, %v2777_v61  ;;  %vm3024_vm8 = vcmp.lt.s32.totalorder %v5825_v14, 4  ;;  %vm3021_vm9 = vcmp.lt.s32.totalorder %v5825_v14, 1 }
 0x335   : > { %v2658_v45 = vadd.f32 1.0, %v2657_v60  ;;  %v2665_v63 = vadd.f32 1.0, %v2664_v12  ;;  %vm3023_vm10 = vcmp.lt.s32.totalorder %v5825_v14, 3  ;;  %v3030_v25 = vsel %vm3024_vm8, %v3017_v42, 920167782 }
 0x336   : > { %v5861_v4 = vshll.u32 %v2997_v47, 8  ;;  %v5863_v57 = vshrl.u32 %v2778_v50, 30  ;;  %v3029_v26 = vsel %vm3021_vm9, %v5834_v35, %v5848_v38  ;;  %vm2670_vm11 = vcmp.lt.s32.totalorder %v2669_v33, 2 }
 0x337   : > { %v2666_v44 = vmul.f32 %v2665_v63, %v2650_v9  ;;  %v2675_v53 = vxor.u32 2147483648, %v2658_v45  ;;  %v3031_v8 = vsel %vm3023_vm10, %v5852_v51, %v3030_v25  ;;  %v3033_v32 = vsel %vm3021_vm9, %v5848_v38, %v5852_v51 }
 0x338   : > { %v3034_v47 = vsel %vm3024_vm8, %v3020_v19, 1326507024  ;;  %vm2674_vm12 = vcmp.eq.s32.totalorder %v2669_v33, 2  ;;  %v2780_v34 = vshll.u32 %v5863_v57, 30  ;;  %vm3022_vm15 = vcmp.lt.s32.totalorder %v5825_v14, 2 }
 0x339   : > { %v2672_v9 = vxor.u32 2147483648, %v2666_v44  ;;  %vm2671_vm13 = vcmp.eq.s32.totalorder %v2669_v33, 0  ;;  %v2676_v59 = vsel %vm2674_vm12, %v2675_v53, %v2666_v44  ;;  %v3032_v48 = vsel %vm3022_vm15, %v3029_v26, %v3031_v8 }
 0x33a   : > { %v3035_v28 = vsel %vm3023_vm10, %v3017_v42, %v3034_v47  ;;  %v2781_v39 = vsub.s32 %v2777_v61, %v2780_v34  ;;  %v3038_v56 = vand.u32 65535, %v5861_v4  ;;  %v3039_v22 = vshrl.u32 %v5861_v4, 16 }
 0x33b   : > { %v2673_v43 = vsel %vm2671_vm13, %v2658_v45, %v2672_v9  ;;  %v3036_v11 = vsel %vm3022_vm15, %v3033_v32, %v3035_v28  ;;  %v3062_v21 = vand.u32 65535, %v3032_v48  ;;  %v3063_v54 = vshrl.u32 %v3032_v48, 16 }
 0x33c   : > { %v2677_v20 = vsel %vm2670_vm11, %v2673_v43, %v2676_v59  ;;  %v3040_v7 = vand.u32 65535, %v3036_v11  ;;  %v3041_v41 = vshrl.u32 %v3036_v11, 16  ;;  %vm2782_vm14 = vcmp.lt.s32.totalorder %v2781_v39, 0  ;;  %v422_v11 = vpop.permute.xlu1 %421 }
 0x33d   : > { %v2678_v2 = vsel %vm2667_vm5, nan, %v2677_v20  ;;  %v2783_v52 = vsub.s32 0, %v2781_v39  ;;  %v2773_v13 = vadd.s32 %v5819_v16, %v5832_v30  ;;  %v3065_v19 = vmul.u32 %v3063_v54, %v3038_v56 }
 0x33e   : > { %3467 = vst [vmem:[%s4236_s10 + $0x68] sm:$0xff] %v2678_v2  ;;  %v3043_v17 = vmul.u32 %v3041_v41, %v3038_v56  ;;  %v3044_v58 = vmul.u32 %v3040_v7, %v3039_v22  ;;  %v3042_v40 = vmul.u32 %v3040_v7, %v3038_v56  ;;  %v3045_v60 = vmul.u32 %v3041_v41, %v3039_v22 }
 0x33f   : > { %v2784_v18 = vsel %vm2782_vm14, %v2783_v52, %v2781_v39  ;;  %v3066_v45 = vmul.u32 %v3062_v21, %v3039_v22  ;;  %v3064_v53 = vmul.u32 %v3062_v21, %v3038_v56  ;;  %v3068_v26 = vshll.u32 %v3065_v19, 16 }
 0x340   : > { %v2785_v37 = vclz %v2784_v18  ;;  %v3046_v49 = vshll.u32 %v3043_v17, 16  ;;  %v3048_v61 = vshll.u32 %v3044_v58, 16  ;;  %v3047_v63 = vshrl.u32 %v3043_v17, 16 }
 0x341   : > { %v3067_v9 = vmul.u32 %v3063_v54, %v3039_v22  ;;  %v3070_v59 = vshll.u32 %v3066_v45, 16  ;;  %vm3072_vm3 = vc.u32 %v3064_v53, %v3068_v26  ;;  %v3074_v16 = vadd.s32 %v3068_v26, %v3064_v53 }
 0x342   : > { %v3640_v12 = vadd.s32 4294967294, %v2785_v37  ;;  %vm3050_vm0 = vc.u32 %v3042_v40, %v3046_v49  ;;  %v3052_v33 = vadd.s32 %v3046_v49, %v3042_v40  ;;  %v3073_v43 = vsel %vm3072_vm3, 1, %v3815_v0 }
 0x343   : > { %v3051_v42 = vsel %vm3050_vm0, 1, %v3815_v0  ;;  %v3005_v20 = vshrl.u32 %v3817_v62, %v5823_v46  ;;  %v3026_v56 = vsel %vm3024_vm8, %v5852_v51, 2102212464  ;;  %v3075_v7 = vadd.s32 %v3073_v43, %v3067_v9 }
 0x344   : > { %vm3641_vm1 = vcmp.lt.s32.totalorder %v3640_v12, 0  ;;  %v3053_v50 = vadd.s32 %v3051_v42, %v3045_v60  ;;  %vm3054_vm2 = vc.u32 %v3052_v33, %v3048_v61  ;;  %vm3076_vm4 = vc.u32 %v3074_v16, %v3070_v59 }
 0x345   : > { %v2788_v25 = vsel %vm3641_vm1, 0, %v3640_v12  ;;  %v3055_v44 = vsel %vm3054_vm2, 1, %v3815_v0  ;;  %v3049_v41 = vshrl.u32 %v3044_v58, 16  ;;  %v3077_v2 = vsel %vm3076_vm4, 1, %v3815_v0 }
 0x346   : > { %v2789_v8 = vsub.s32 32, %v2788_v25  ;;  %v2793_v32 = vsub.s32 4294967266, %v2788_v25  ;;  %v3057_v47 = vadd.s32 %v3055_v44, %v3053_v50  ;;  %v2790_v34 = vshll.u32 %v2781_v39, %v2788_v25 }
 0x347   : > { %v350_v52 = vmul.f32 %v3945_v31, %v3938_v27  ;;  %v3069_v17 = vshrl.u32 %v3065_v19, 16  ;;  %v3079_v18 = vadd.s32 %v3077_v2, %v3075_v7  ;;  %v446_v21 = vmul.f32 %v3943_v29, %v422_v11 }
 0x348   : > { %v2791_v30 = vshrl.u32 %v2773_v13, %v2789_v8  ;;  %v2794_v48 = vadd.s32 127, %v2793_v32  ;;  %v3058_v28 = vadd.s32 %v3057_v47, %v3047_v63  ;;  %v3025_v46 = vsel %vm3021_vm9, %v3005_v20, %v5834_v35 }
 0x349   : > { %v3027_v51 = vsel %vm3023_vm10, %v5848_v38, %v3026_v56  ;;  %v3071_v58 = vshrl.u32 %v3066_v45, 16  ;;  %v3080_v40 = vadd.s32 %v3079_v18, %v3069_v17  ;;  %v465_v49 = vadd.f32 %v446_v21, %v350_v52 }
 0x34a   : > { %v2792_v22 = vor.u32 %v2791_v30, %v2790_v34  ;;  %v2795_v39 = vshll.u32 %v2794_v48, 23  ;;  %v3059_v37 = vadd.s32 %v3058_v28, %v3049_v41  ;;  %v2803_v27 = vsub.s32 4, %v5863_v57 }
 0x34b   : > { %v3078_v31 = vadd.s32 %v3074_v16, %v3070_v59  ;;  %v3028_v29 = vsel %vm3022_vm15, %v3025_v46, %v3027_v51  ;;  %v3081_v61 = vadd.s32 %v3080_v40, %v3071_v58  ;;  %v488_v33 = vadd.f32 %v5680_v23, %v465_v49 }
 0x34c   : > { %v2796_v54 = vor.u32 4788187, %v2795_v39  ;;  %v2799_v12 = vcvt.s32.f32 %v2792_v22  ;;  %vm2681_vm7 = vcmp.lt.s32.totalorder %v5684_v6, 0  ;;  %v3082_v45 = vmul.u32 %v5861_v4, %v3028_v29 }
 0x34d   : > { %vm3084_vm6 = vc.u32 %v3059_v37, %v3078_v31  ;;  %v3085_v38 = vadd.s32 1, %v3081_v61  ;;  %v5917_v13 = vmul.f32 30.0, %v488_v33  ;;  %v2804_v19 = vsel %vm2681_vm7, %v2803_v27, %v5863_v57 }
 0x34e   : > { %v2797_v60 = vand.u32 2147483647, %v2796_v54  ;;  %vm2680_vm5 = vcmp.le.f32.partialorder %v2679_v15, 0.7853982  ;;  %vm2822_vm11 = vweird.f32 %v5684_v6  ;;  %v3083_v51 = vadd.s32 %v3078_v31, %v3059_v37 }
 0x34f   : > { %v3086_v63 = vsel %vm3084_vm6, %v3085_v38, %v3081_v61  ;;  %v3147_v50 = vand.u32 2139095040, %v5917_v13  ;;  %v2806_v44 = vsel %vm2680_vm5, 0, %v2804_v19  ;;  %v3144_v4 = vand.u32 2147483647, %v5917_v13 }
 0x350   : > { %v2800_v35 = vmul.f32 %v2799_v12, %v2797_v60  ;;  %v3087_v23 = vadd.s32 %v3086_v63, %v3082_v45  ;;  %v2823_v57 = vadd.s32 3, %v2806_v44  ;;  %vm2991_vm0 = vcmp.lt.s32.totalorder %v5692_v24, 0 }
 0x351   : > { %v3148_v53 = vshrl.u32 %v3147_v50, 23  ;;  %v3151_v20 = vand.u32 8388607, %v3144_v4  ;;  %vm5995_vm4 = vcmp.le.f32.partialorder %v2989_v55, 0.7853982 }
 0x352   : > { %v2801_v42 = vxor.u32 2147483648, %v2800_v35  ;;  %v3088_v8 = vadd.s32 536870912, %v3087_v23  ;;  %v2824_v43 = vand.u32 3, %v2823_v57 }
 0x353   : > { %v3648_v32 = vadd.s32 4294967169, %v3148_v53  ;;  %v3152_v58 = vor.u32 8388608, %v3151_v20 }
 0x354   : > { %v2802_v14 = vsel %vm2681_vm7, %v2801_v42, %v2800_v35  ;;  %v5925_v34 = vshrl.u32 %v3088_v8, 30  ;;  %vm2825_vm10 = vcmp.lt.s32.totalorder %v2824_v43, 2  ;;  %vm2826_vm12 = vcmp.eq.s32.totalorder %v2824_v43, 0 }
 0x355   : > { %v2805_v25 = vsel %vm2680_vm5, %v5684_v6, %v2802_v14  ;;  %v3154_v59 = vadd.s32 1, %v3648_v32  ;;  %vm2829_vm15 = vcmp.eq.s32.totalorder %v2824_v43, 2 }
 0x356   : > { %v2807_v26 = vmul.f32 %v2805_v25, %v2805_v25  ;;  %v3090_v15 = vshll.u32 %v5925_v34, 30 }
 0x357   : > { %vm3155_vm8 = vcmp.gt.s32.totalorder %v3154_v59, 0 }
 0x358   : > { %v2808_v47 = vmul.f32 -0.001358992, %v2807_v26  ;;  %v2815_v9 = vmul.f32 -0.00019511016, %v2807_v26  ;;  %v3091_v11 = vsub.s32 %v3087_v23, %v3090_v15  ;;  %v3156_v56 = vsel %vm3155_vm8, %v3154_v59, 0 }
 0x359   : > { %v3158_v41 = vand.u32 31, %v3156_v56  ;;  %v5934_v49 = vshrl.u32 %v3156_v56, 5 }
 0x35a   : > { %v2809_v16 = vadd.f32 0.041655596, %v2808_v47  ;;  %v2816_v30 = vadd.f32 0.008332121, %v2815_v9  ;;  %vm3092_vm9 = vcmp.lt.s32.totalorder %v3091_v11, 0  ;;  %v3093_v39 = vsub.s32 0, %v3091_v11 }
 0x35b   : > { %v5932_v21 = vsub.s32 32, %v3158_v41  ;;  %v3161_v60 = vshll.u32 %v3817_v62, %v3158_v41  ;;  %v3164_v12 = vshll.u32 %v3818_v1, %v3158_v41  ;;  %v3167_v33 = vshll.u32 %v3819_v3, %v3158_v41 }
 0x35c   : > { %v2810_v48 = vmul.f32 %v2809_v16, %v2807_v26  ;;  %v2817_v28 = vmul.f32 %v2816_v30, %v2807_v26  ;;  %v3094_v17 = vsel %vm3092_vm9, %v3093_v39, %v3091_v11  ;;  %v3170_v31 = vshll.u32 %v3820_v5, %v3158_v41 }
 0x35d   : > { %v3095_v18 = vclz %v3094_v17  ;;  %v3162_v61 = vshrl.u32 %v3818_v1, %v5932_v21  ;;  %v3165_v35 = vshrl.u32 %v3819_v3, %v5932_v21  ;;  %v3168_v37 = vshrl.u32 %v3820_v5, %v5932_v21 }
 0x35e   : > { %v2811_v7 = vadd.f32 -0.4999988, %v2810_v48  ;;  %v2818_v22 = vadd.f32 -0.16666654, %v2817_v28  ;;  %v3173_v5 = vshll.u32 %v3821_v10, %v3158_v41  ;;  %v3174_v8 = vshrl.u32 %v6091_v36, %v5932_v21 }
 0x35f   : > { %v3646_v40 = vadd.s32 4294967294, %v3095_v18  ;;  %v5947_v45 = vor.u32 %v3162_v61, %v3161_v60  ;;  %v5949_v14 = vor.u32 %v3165_v35, %v3164_v12  ;;  %v3169_v3 = vor.u32 %v3168_v37, %v3167_v33 }
 0x360   : > { %v2812_v2 = vmul.f32 %v2811_v7, %v2807_v26  ;;  %v2819_v52 = vmul.f32 %v2818_v22, %v2807_v26  ;;  %v5960_v9 = vshll.u32 %v3152_v58, 8  ;;  %v3175_v16 = vor.u32 %v3174_v8, %v3173_v5 }
 0x361   : > { %vm3647_vm13 = vcmp.lt.s32.totalorder %v3646_v40, 0  ;;  %vm3176_vm14 = vcmp.lt.s32.totalorder %v5934_v49, 1  ;;  %vm3179_vm1 = vcmp.lt.s32.totalorder %v5934_v49, 4  ;;  %vm3178_vm2 = vcmp.lt.s32.totalorder %v5934_v49, 3 }
 0x362   : > { %v2813_v54 = vadd.f32 1.0, %v2812_v2  ;;  %v2820_v46 = vadd.f32 1.0, %v2819_v52  ;;  %v3098_v19 = vsel %vm3647_vm13, 0, %v3646_v40  ;;  %v3184_v36 = vsel %vm3176_vm14, %v5947_v45, %v5949_v14 }
 0x363   : > { %v3099_v63 = vsub.s32 32, %v3098_v19  ;;  %v3100_v1 = vshll.u32 %v3091_v11, %v3098_v19  ;;  %v3103_v50 = vsub.s32 4294967266, %v3098_v19  ;;  %v3188_v15 = vsel %vm3176_vm14, %v5949_v14, %v3169_v3 }
 0x364   : > { %v2821_v27 = vmul.f32 %v2820_v46, %v2805_v25  ;;  %v2830_v29 = vxor.u32 2147483648, %v2813_v54  ;;  %v3171_v25 = vshrl.u32 %v3821_v10, %v5932_v21  ;;  %v3113_v10 = vsub.s32 4, %v5925_v34 }
 0x365   : > { %v3101_v53 = vshrl.u32 %v3083_v51, %v3099_v63  ;;  %v3104_v26 = vadd.s32 127, %v3103_v50  ;;  %vm3177_vm3 = vcmp.lt.s32.totalorder %v5934_v49, 2  ;;  %v3189_v28 = vsel %vm3179_vm1, %v3175_v16, 1326507024 }
 0x366   : > { %v2827_v38 = vxor.u32 2147483648, %v2821_v27  ;;  %v2831_v42 = vsel %vm2829_vm15, %v2830_v29, %v2821_v27  ;;  %v3172_v47 = vor.u32 %v3171_v25, %v3170_v31  ;;  %v3193_v43 = vand.u32 65535, %v5960_v9 }
 0x367   : > { %v3102_v57 = vor.u32 %v3101_v53, %v3100_v1  ;;  %v3105_v59 = vshll.u32 %v3104_v26, 23  ;;  %v3114_v22 = vsel %vm2991_vm0, %v3113_v10, %v5925_v34  ;;  %v3194_v17 = vshrl.u32 %v5960_v9, 16 }
 0x368   : > { %v2828_v23 = vsel %vm2826_vm12, %v2813_v54, %v2827_v38  ;;  %v3185_v30 = vsel %vm3179_vm1, %v3172_v47, 920167782  ;;  %v3190_v7 = vsel %vm3178_vm2, %v3172_v47, %v3189_v28  ;;  %v3116_v34 = vsel %vm5995_vm4, 0, %v3114_v22 }
 0x369   : > { %v2832_v44 = vsel %vm2825_vm10, %v2828_v23, %v2831_v42  ;;  %v3106_v6 = vor.u32 4788187, %v3105_v59  ;;  %v3186_v48 = vsel %vm3178_vm2, %v3169_v3, %v3185_v30  ;;  %v3109_v20 = vcvt.s32.f32 %v3102_v57 }
 0x36a   : > { %v2833_v32 = vsel %vm2822_vm11, nan, %v2832_v44  ;;  %v3187_v56 = vsel %vm3177_vm3, %v3184_v36, %v3186_v48  ;;  %v3191_v39 = vsel %vm3177_vm3, %v3188_v15, %v3190_v7  ;;  %v3181_v12 = vsel %vm3179_vm1, %v3169_v3, 2102212464 }
 0x36b   : > { %3468 = vst [vmem:[%s4236_s10 + $0x70] sm:$0xff] %v2833_v32  ;;  %v3107_v11 = vand.u32 2147483647, %v3106_v6  ;;  %v3217_v41 = vand.u32 65535, %v3187_v56  ;;  %v3218_v2 = vshrl.u32 %v3187_v56, 16  ;;  %v3195_v18 = vand.u32 65535, %v3191_v39 }
 0x36c   : > { %v3196_v54 = vshrl.u32 %v3191_v39, 16  ;;  %v3160_v26 = vshrl.u32 %v3817_v62, %v5932_v21  ;;  %v3182_v36 = vsel %vm3178_vm2, %v5949_v14, %v3181_v12  ;;  %v3133_v7 = vadd.s32 3, %v3116_v34 }
 0x36d   : > { %v3110_v52 = vmul.f32 %v3109_v20, %v3107_v11  ;;  %v3220_v51 = vmul.u32 %v3218_v2, %v3193_v43  ;;  %v3199_v60 = vmul.u32 %v3195_v18, %v3194_v17  ;;  %v3219_v27 = vmul.u32 %v3217_v41, %v3193_v43 }
 0x36e   : > { %v3198_v40 = vmul.u32 %v3196_v54, %v3193_v43  ;;  %v3221_v29 = vmul.u32 %v3217_v41, %v3194_v17  ;;  %v3197_v55 = vmul.u32 %v3195_v18, %v3193_v43  ;;  %v3222_v37 = vmul.u32 %v3218_v2, %v3194_v17 }
 0x36f   : > { %v3111_v58 = vxor.u32 2147483648, %v3110_v52  ;;  %v3223_v61 = vshll.u32 %v3220_v51, 16  ;;  %v3200_v38 = vmul.u32 %v3196_v54, %v3194_v17  ;;  %v3203_v42 = vshll.u32 %v3199_v60, 16 }
 0x370   : > { %v3201_v35 = vshll.u32 %v3198_v40, 16  ;;  %v3225_v23 = vshll.u32 %v3221_v29, 16  ;;  %v3202_v8 = vshrl.u32 %v3198_v40, 16  ;;  %v3180_v10 = vsel %vm3176_vm14, %v3160_v26, %v5947_v45 }
 0x371   : > { %v3112_v33 = vsel %vm2991_vm0, %v3111_v58, %v3110_v52  ;;  %vm3227_vm6 = vc.u32 %v3219_v27, %v3223_v61  ;;  %v3229_v3 = vadd.s32 %v3223_v61, %v3219_v27  ;;  %v3224_v6 = vshrl.u32 %v3220_v51, 16 }
 0x372   : > { %v3115_v31 = vsel %vm5995_vm4, %v5692_v24, %v3112_v33  ;;  %vm3205_vm7 = vc.u32 %v3197_v55, %v3201_v35  ;;  %v3207_v63 = vadd.s32 %v3201_v35, %v3197_v55  ;;  %v3228_v1 = vsel %vm3227_vm6, 1, %v3815_v0 }
 0x373   : > { %v3117_v19 = vmul.f32 %v3115_v31, %v3115_v31  ;;  %v3206_v50 = vsel %vm3205_vm7, 1, %v3815_v0  ;;  %v3230_v25 = vadd.s32 %v3228_v1, %v3222_v37  ;;  %vm3231_vm8 = vc.u32 %v3229_v3, %v3225_v23 }
 0x374   : > { %v3208_v53 = vadd.s32 %v3206_v50, %v3200_v38  ;;  %vm3209_vm5 = vc.u32 %v3207_v63, %v3203_v42  ;;  %v3232_v16 = vsel %vm3231_vm8, 1, %v3815_v0  ;;  %v3204_v15 = vshrl.u32 %v3199_v60, 16 }
 0x375   : > { %v3118_v5 = vmul.f32 -0.001358992, %v3117_v19  ;;  %v3125_v44 = vmul.f32 -0.00019511016, %v3117_v19  ;;  %v3210_v32 = vsel %vm3209_vm5, 1, %v3815_v0  ;;  %v3234_v30 = vadd.s32 %v3232_v16, %v3230_v25 }
 0x376   : > { %v3212_v59 = vadd.s32 %v3210_v32, %v3208_v53  ;;  %v3226_v28 = vshrl.u32 %v3221_v29, 16  ;;  %v3233_v0 = vadd.s32 %v3229_v3, %v3225_v23  ;;  %v3183_v45 = vsel %vm3177_vm3, %v3180_v10, %v3182_v36 }
 0x377   : > { %v3119_v47 = vadd.f32 0.041655596, %v3118_v5  ;;  %v3126_v57 = vadd.f32 0.008332121, %v3125_v44  ;;  %v3235_v43 = vadd.s32 %v3234_v30, %v3224_v6  ;;  %v3237_v17 = vmul.u32 %v5960_v9, %v3183_v45 }
 0x378   : > { %v3213_v48 = vadd.s32 %v3212_v59, %v3202_v8  ;;  %v3134_v18 = vand.u32 3, %v3133_v7  ;;  %vm3132_vm15 = vweird.f32 %v5692_v24  ;;  %vm3146_vm0 = vcmp.lt.s32.totalorder %v5917_v13, 0 }
 0x379   : > { %v3120_v62 = vmul.f32 %v3119_v47, %v3117_v19  ;;  %v3127_v21 = vmul.f32 %v3126_v57, %v3117_v19  ;;  %v3236_v22 = vadd.s32 %v3235_v43, %v3226_v28  ;;  %vm3145_vm1 = vcmp.le.f32.partialorder %v3144_v4, 0.7853982 }
 0x37a   : > { %v3214_v56 = vadd.s32 %v3213_v48, %v3204_v15  ;;  %vm3136_vm10 = vcmp.eq.s32.totalorder %v3134_v18, 0  ;;  %vm3139_vm11 = vcmp.eq.s32.totalorder %v3134_v18, 2  ;;  %vm3135_vm12 = vcmp.lt.s32.totalorder %v3134_v18, 2 }
 0x37b   : > { %v3121_v11 = vadd.f32 -0.4999988, %v3120_v62  ;;  %v3128_v20 = vadd.f32 -0.16666654, %v3127_v21  ;;  %v3240_v14 = vadd.s32 1, %v3236_v22  ;;  %vm3287_vm6 = vweird.f32 %v5917_v13 }
 0x37c   : > { %vm3239_vm9 = vc.u32 %v3214_v56, %v3233_v0  ;;  %v3238_v38 = vadd.s32 %v3233_v0, %v3214_v56 }
 0x37d   : > { %v3122_v39 = vmul.f32 %v3121_v11, %v3117_v19  ;;  %v3129_v41 = vmul.f32 %v3128_v20, %v3117_v19  ;;  %v3241_v54 = vsel %vm3239_vm9, %v3240_v14, %v3236_v22 }
 0x37e   : > { %v3242_v58 = vadd.s32 %v3241_v54, %v3237_v17 }
 0x37f   : > { %v3123_v2 = vadd.f32 1.0, %v3122_v39  ;;  %v3130_v52 = vadd.f32 1.0, %v3129_v41 }
 0x380   : > { %v3243_v34 = vadd.s32 536870912, %v3242_v58 }
 0x381   : > { %v3131_v46 = vmul.f32 %v3130_v52, %v3115_v31  ;;  %v3140_v51 = vxor.u32 2147483648, %v3123_v2 }
 0x382   : > { %v3244_v12 = vshrl.u32 %v3243_v34, 30 }
 0x383   : > { %v3137_v40 = vxor.u32 2147483648, %v3131_v46  ;;  %v3141_v60 = vsel %vm3139_vm11, %v3140_v51, %v3131_v46 }
 0x384   : > { %v3245_v61 = vshll.u32 %v3244_v12, 30  ;;  %v3268_v8 = vsub.s32 4, %v3244_v12 }
 0x385   : > { %v3138_v49 = vsel %vm3136_vm10, %v3123_v2, %v3137_v40 }
 0x386   : > { %v3142_v27 = vsel %vm3135_vm12, %v3138_v49, %v3141_v60  ;;  %v3246_v9 = vsub.s32 %v3242_v58, %v3245_v61  ;;  %v3269_v16 = vsel %vm3146_vm0, %v3268_v8, %v3244_v12 }
 0x387   : > { %v3143_v29 = vsel %vm3132_vm15, nan, %v3142_v27  ;;  %v3271_v6 = vsel %vm3145_vm1, 0, %v3269_v16 }
 0x388   : > { %3470 = vst [vmem:[%s4236_s10 + $0x80] sm:$0xff] %v3143_v29  ;;  %vm3247_vm13 = vcmp.lt.s32.totalorder %v3246_v9, 0  ;;  %v3248_v33 = vsub.s32 0, %v3246_v9  ;;  %v3288_v48 = vadd.s32 3, %v3271_v6 }
 0x38a   : > { %v3249_v55 = vsel %vm3247_vm13, %v3248_v33, %v3246_v9  ;;  %v3289_v20 = vand.u32 3, %v3288_v48 }
 0x38b   : > { %v3250_v35 = vclz %v3249_v55 }
 0x38c   : > { %vm3291_vm2 = vcmp.eq.s32.totalorder %v3289_v20, 0  ;;  %vm3294_vm3 = vcmp.eq.s32.totalorder %v3289_v20, 2  ;;  %vm3290_vm4 = vcmp.lt.s32.totalorder %v3289_v20, 2 }
 0x38d   : > { %v3649_v37 = vadd.s32 4294967294, %v3250_v35 }
 0x38f   : > { %vm3650_vm14 = vcmp.lt.s32.totalorder %v3649_v37, 0 }
 0x390   : > { %v3253_v31 = vsel %vm3650_vm14, 0, %v3649_v37 }
 0x391   : > { %v3254_v42 = vsub.s32 32, %v3253_v31  ;;  %v3258_v19 = vsub.s32 4294967266, %v3253_v31  ;;  %v3255_v63 = vshll.u32 %v3246_v9, %v3253_v31 }
 0x393   : > { %v3256_v1 = vshrl.u32 %v3238_v38, %v3254_v42  ;;  %v3259_v50 = vadd.s32 127, %v3258_v19 }
 0x395   : > { %v3257_v23 = vor.u32 %v3256_v1, %v3255_v63  ;;  %v3260_v24 = vshll.u32 %v3259_v50, 23 }
 0x397   : > { %v3261_v3 = vor.u32 4788187, %v3260_v24  ;;  %v3264_v5 = vcvt.s32.f32 %v3257_v23 }
 0x399   : > { %v3262_v25 = vand.u32 2147483647, %v3261_v3 }
 0x39b   : > { %v3265_v44 = vmul.f32 %v3264_v5, %v3262_v25 }
 0x39d   : > { %v3266_v53 = vxor.u32 2147483648, %v3265_v44 }
 0x39f   : > { %v3267_v26 = vsel %vm3146_vm0, %v3266_v53, %v3265_v44 }
 0x3a0   : > { %v3270_v32 = vsel %vm3145_vm1, %v5917_v13, %v3267_v26 }
 0x3a1   : > { %v3272_v47 = vmul.f32 %v3270_v32, %v3270_v32 }
 0x3a3   : > { %v3273_v57 = vmul.f32 -0.001358992, %v3272_v47  ;;  %v3280_v59 = vmul.f32 -0.00019511016, %v3272_v47 }
 0x3a5   : > { %v3274_v10 = vadd.f32 0.041655596, %v3273_v57  ;;  %v3281_v36 = vadd.f32 0.008332121, %v3280_v59 }
 0x3a7   : > { %v3275_v30 = vmul.f32 %v3274_v10, %v3272_v47  ;;  %v3282_v62 = vmul.f32 %v3281_v36, %v3272_v47 }
 0x3a9   : > { %v3276_v21 = vadd.f32 -0.4999988, %v3275_v30  ;;  %v3283_v15 = vadd.f32 -0.16666654, %v3282_v62 }
 0x3ab   : > { %v3277_v4 = vmul.f32 %v3276_v21, %v3272_v47  ;;  %v3284_v28 = vmul.f32 %v3283_v15, %v3272_v47 }
 0x3ad   : > { %v3278_v43 = vadd.f32 1.0, %v3277_v4  ;;  %v3285_v11 = vadd.f32 1.0, %v3284_v28 }
 0x3af   : > { %v3286_v56 = vmul.f32 %v3285_v11, %v3270_v32  ;;  %v3295_v0 = vxor.u32 2147483648, %v3278_v43 }
 0x3b1   : > { %v3292_v7 = vxor.u32 2147483648, %v3286_v56  ;;  %v3296_v22 = vsel %vm3294_vm3, %v3295_v0, %v3286_v56 }
 0x3b3   : > { %v3293_v45 = vsel %vm3291_vm2, %v3278_v43, %v3292_v7 }
 0x3b4   : > { %v3297_v39 = vsel %vm3290_vm4, %v3293_v45, %v3296_v22 }
 0x3b5   : > { %v3298_v41 = vsel %vm3287_vm6, nan, %v3297_v39 }
 0x3b6   : > { %3471 = vst [vmem:[%s4236_s10 + $0x88] sm:$0xff] %v3298_v41 }
 0x3b7   : > { %3762 = shalt.err (!%p3759_p5)
}
 0x3b8   : > { %s3823_s8 = smov 128   ;;  %s3824_s10 = smov 8  }
 0x3b9   : > { %3659 = dma.vmem_to_hbm [thread:$0]  (%p3885_p4), %s3488_s6, 2432, %s3490_s7, %s3474_s15, %s3823_s8, %s3823_s8, %s3824_s10  }
 0x3ba PF: > { %p3665_p6 = scmp.ge.s32.totalorder %s3813_s17, 2  ;;  %s3504_s27 = sand.u32 1, %s3793_s12  }
 0x3bb   : > { %s3505_s28 = scalar_lea.sflag [#allocation3], %s3504_s27 }
 0x3bc   : > { %p3662_p7 = pnand %p3665_p6, %p3892_p8 }
 0x3be   : > { %p3663_p9 = pneg %p3662_p7 }
 0x3c0   : > { %3788 = dma.done.wait (%p3663_p9), %s3505_s28, 2432  }
 0x3c1   : > { %3790 = vsyncadd (%p3663_p9), %s3505_s28, 4294964864  ;;  %s16_s17 = sadd.s32 1, %s3813_s17   ;;  %s6105_s12 = smov %s3797_s13 }
 0x3c2   : > { %p13_p10 = scmp.ge.s32.totalorder %s16_s17, 4   ;;  %s6106_s13 = smov %s3801_s14 }
 0x3c3   : > { %s6107_s14 = smov %s3898_s25  ;;  %s6108_s15 = smov %s3809_s16 }
 0x3c4   : > { %s6109_s16 = smov %s6111_s20  ;;  %15 = sbr.rel (!%p13_p10) target bundleno = 4 (0x4), region = 73 }
 0x3c9   :  { %3511 = vsyncpa [#allocation3], 1 }
 0x3ca   :  { %3513 = vsyncpa [#allocation3 + $0x1], 1 }

</bundles_post_ra>
